<compile_context>
chip_gen: v7x
topology: tpu7x:2x2x1
jax: 0.10.0
libtpu: 0.0.40
codegen_flags: <defaults>
</compile_context>

<pallas_src>
import functools

import numpy as np
import jax
import jax.numpy as jnp
from jax.experimental import pallas as pl
from jax.experimental.pallas import tpu as pltpu

BN_EPS = 0.01       # matches nn.BatchNorm1d(256, eps=0.01)
D_IN = 512
D_HID = 256
N_Y1 = 2
N_Y2 = 1000
N_PAD = 1024        # lane-dense fused output width (multiple of 128)
COL_Y1_0 = 1000     # column holding softmax logit 0
COL_Y1_1 = 1001     # column holding softmax logit 1


def head_kernel(x_ref, w1_ref, b1_ref, gamma_ref, beta_ref, w23_ref, b23_ref,
                out_ref, sum_sc, sumsq_sc, scale_sc, shift_sc, *, inv_batch):
    phase = pl.program_id(0)
    tile = pl.program_id(1)
    n_tiles = pl.num_programs(1)

    # h = relu(x @ W1 + b1) — bf16 operands, f32 accumulation.
    # (Recomputed in both phases; cheaper than staging h through HBM for this
    #  DMA/latency-bound kernel.)
    h = jnp.dot(x_ref[...], w1_ref[...], preferred_element_type=jnp.float32)
    h = jnp.maximum(h + b1_ref[...], 0.0)                       # (tb, 256) f32

    # ---- phase 0: accumulate global (training-mode) BatchNorm statistics ----
    @pl.when(phase == 0)
    def _accumulate_bn_stats():
        @pl.when(tile == 0)
        def _init():
            sum_sc[...] = jnp.zeros_like(sum_sc)
            sumsq_sc[...] = jnp.zeros_like(sumsq_sc)

        sum_sc[...] += jnp.sum(h, axis=0, keepdims=True)
        sumsq_sc[...] += jnp.sum(h * h, axis=0, keepdims=True)

        @pl.when(tile == n_tiles - 1)
        def _finalize():
            mean = sum_sc[...] * inv_batch
            var = sumsq_sc[...] * inv_batch - mean * mean       # biased var (train mode)
            scale = gamma_ref[...] * jax.lax.rsqrt(var + BN_EPS)
            scale_sc[...] = scale
            shift_sc[...] = beta_ref[...] - mean * scale

    # ---- phase 1: normalize, fused projection, activations, lane-dense store ----
    @pl.when(phase == 1)
    def _normalize_and_project():
        hn = h * scale_sc[...] + shift_sc[...]                  # (tb, 256) f32

        logits = jnp.dot(hn.astype(jnp.bfloat16), w23_ref[...],
                         preferred_element_type=jnp.float32) + b23_ref[...]  # (tb, 1024)

        sig = jax.nn.sigmoid(logits)                            # y2 path (EUP)

        # Analytic 2-class softmax on columns 1000/1001:
        #   p0 = sigmoid(l0 - l1), p1 = 1 - p0.
        # Extract (l0 - l1) via a masked lane reduction (no unaligned value slices).
        col = jax.lax.broadcasted_iota(jnp.int32, logits.shape, 1)
        is_c0 = col == COL_Y1_0
        is_c1 = col == COL_Y1_1
        sgn = jnp.where(is_c0, 1.0, 0.0) - jnp.where(is_c1, 1.0, 0.0)
        d = jnp.sum(logits * sgn, axis=1, keepdims=True)        # (tb, 1) = l0 - l1
        p0 = jax.nn.sigmoid(d)

        out_ref[...] = jnp.where(is_c0, p0,
                                 jnp.where(is_c1, 1.0 - p0, sig))


def _pick_batch_tile(batch):
    for tb in (128, 64, 32, 16, 8):
        if batch % tb == 0:
            return tb
    return batch  # odd batch size: one full-batch tile (full-dim block is legal)


def _head_pallas(x_bf16, w1_bf16, b1, gamma, beta, w23_bf16, b23):
    batch = x_bf16.shape[0]
    tb = _pick_batch_tile(batch)
    n_tiles = batch // tb

    kernel = functools.partial(head_kernel, inv_batch=1.0 / batch)

    grid_spec = pltpu.PrefetchScalarGridSpec(
        num_scalar_prefetch=0,
        grid=(2, n_tiles),                       # (phase, batch tile)
        in_specs=[
            pl.BlockSpec((tb, D_IN), lambda p, t: (t, 0)),         # x tile
            pl.BlockSpec((D_IN, D_HID), lambda p, t: (0, 0)),      # w1 (fetched once)
            pl.BlockSpec((1, D_HID), lambda p, t: (0, 0)),         # b1
            pl.BlockSpec((1, D_HID), lambda p, t: (0, 0)),         # gamma
            pl.BlockSpec((1, D_HID), lambda p, t: (0, 0)),         # beta
            pl.BlockSpec((D_HID, N_PAD), lambda p, t: (0, 0)),     # fused w23 (bf16)
            pl.BlockSpec((1, N_PAD), lambda p, t: (0, 0)),         # fused b23
        ],
        # Output blocks are only written in phase 1; mapping phase 0 onto block 0
        # keeps every output block visited in one contiguous run (no garbage flushes).
        out_specs=pl.BlockSpec((tb, N_PAD), lambda p, t: (p * t, 0)),
        scratch_shapes=[
            pltpu.VMEM((1, D_HID), jnp.float32),   # sum(h)
            pltpu.VMEM((1, D_HID), jnp.float32),   # sum(h*h)
            pltpu.VMEM((1, D_HID), jnp.float32),   # BN scale = gamma * rsqrt(var+eps)
            pltpu.VMEM((1, D_HID), jnp.float32),   # BN shift = beta - mean * scale
        ],
    )

    return pl.pallas_call(
        kernel,
        out_shape=jax.ShapeDtypeStruct((batch, N_PAD), jnp.float32),
        grid_spec=grid_spec,
        compiler_params=pltpu.CompilerParams(
            # Both axes carry cross-iteration state (phase ordering, BN-stat
            # accumulation across batch tiles), so they stay "arbitrary".
            dimension_semantics=("arbitrary", "arbitrary")),
    )(x_bf16, w1_bf16, b1, gamma, beta, w23_bf16, b23)


@jax.jit
def multi_output_head(x, w1, b1, gamma, beta, w2, b2, w3, b3):
    # Fuse the two output projections into one lane-dense (256, 1024) weight:
    # cols 0..999 = w3 (sigmoid head), cols 1000..1001 = w2 (softmax head).
    w23 = jnp.zeros((D_HID, N_PAD), jnp.float32)
    w23 = w23.at[:, :N_Y2].set(w3).at[:, COL_Y1_0:COL_Y1_1 + 1].set(w2)
    b23 = jnp.zeros((1, N_PAD), jnp.float32)
    b23 = b23.at[:, :N_Y2].set(b3).at[:, COL_Y1_0:COL_Y1_1 + 1].set(b2)

    out = _head_pallas(x.astype(jnp.bfloat16),
                       w1.astype(jnp.bfloat16),
                       b1, gamma, beta,
                       w23.astype(jnp.bfloat16),
                       b23)

    y1 = out[:, COL_Y1_0:COL_Y1_1 + 1]   # (B, 2)   softmax output
    y2 = out[:, :N_Y2]                   # (B, 1000) sigmoid output
    return y1, y2


def xavier_normal_T(key, fan_out, fan_in):
    # nn.init.xavier_normal_ on a (out, in) weight, returned transposed (in, out).
    std = (2.0 / (fan_in + fan_out)) ** 0.5
    w = std * jax.random.normal(key, (fan_out, fan_in), jnp.float32)
    return jnp.transpose(w)


def linear_bias(key, fan_in, fan_out):
    # PyTorch nn.Linear default bias init: U(-1/sqrt(fan_in), 1/sqrt(fan_in)).
    bound = 1.0 / (fan_in ** 0.5)
    return jax.random.uniform(key, (1, fan_out), jnp.float32, -bound, bound)


def reference(x, w1, b1, gamma, beta, w2, b2, w3, b3):
    # Pure-JAX f32 reference of the PyTorch forward (training-mode BN).
    h = jnp.maximum(x @ w1 + b1, 0.0)
    mean = jnp.mean(h, axis=0, keepdims=True)
    var = jnp.mean((h - mean) ** 2, axis=0, keepdims=True)
    hn = (h - mean) / jnp.sqrt(var + BN_EPS) * gamma + beta
    y1 = jax.nn.softmax(hn @ w2 + b2, axis=1)
    y2 = jax.nn.sigmoid(hn @ w3 + b3)
    return y1, y2


if __name__ == "__main__":
    key = jax.random.PRNGKey(0)
    kx, k1, kb1, k2, kb2, k3, kb3 = jax.random.split(key, 7)

    B = 256  # exercises 2 batch tiles of 128 -> two-phase (global) BatchNorm path

    # Deterministic parameters (shapes from the module's __init__)
    w1 = xavier_normal_T(k1, D_HID, D_IN)        # x1: Linear(512, 256) -> (512, 256)
    b1 = linear_bias(kb1, D_IN, D_HID)           # (1, 256)
    gamma = jnp.ones((1, D_HID), jnp.float32)    # bn1.weight default
    beta = jnp.zeros((1, D_HID), jnp.float32)    # bn1.bias default
    w2 = xavier_normal_T(k2, N_Y1, D_HID)        # y1o: Linear(256, 2) -> (256, 2)
    b2 = linear_bias(kb2, D_HID, N_Y1)           # (1, 2)
    w3 = xavier_normal_T(k3, N_Y2, D_HID)        # y2o: Linear(256, 1000) -> (256, 1000)
    b3 = linear_bias(kb3, D_HID, N_Y2)           # (1, 1000)

    # Synthetic resnet features (stand-in for model_core(x)).
    x = jax.random.normal(kx, (B, D_IN), jnp.float32)

    y1, y2 = multi_output_head(x, w1, b1, gamma, beta, w2, b2, w3, b3)
    jax.block_until_ready((y1, y2))

    r1, r2 = reference(x, w1, b1, gamma, beta, w2, b2, w3, b3)
    assert y1.shape == (B, N_Y1) and y2.shape == (B, N_Y2)
    # bf16 MXU operands -> loosened tolerance vs the f32 reference.
    assert np.allclose(np.asarray(y1), np.asarray(r1), atol=3e-2), \
        float(np.max(np.abs(np.asarray(y1) - np.asarray(r1))))
    assert np.allclose(np.asarray(y2), np.asarray(r2), atol=3e-2), \
        float(np.max(np.abs(np.asarray(y2) - np.asarray(r2))))
    # Softmax rows must sum to exactly ~1 by construction (p0, 1-p0).
    assert np.allclose(np.asarray(y1).sum(axis=1), 1.0, atol=1e-5)

    print("KERNEL_OK")
</pallas_src>

<mosaic_0001>
module attributes {stable_mosaic.version = 11 : i64} {
  func.func @head_kernel(%arg0: i32, %arg1: i32, %arg2: memref<128x512xbf16, #tpu.memory_space<vmem>>, %arg3: memref<512x256xbf16, #tpu.memory_space<vmem>>, %arg4: memref<1x256xf32, #tpu.memory_space<vmem>>, %arg5: memref<1x256xf32, #tpu.memory_space<vmem>>, %arg6: memref<1x256xf32, #tpu.memory_space<vmem>>, %arg7: memref<256x1024xbf16, #tpu.memory_space<vmem>>, %arg8: memref<1x1024xf32, #tpu.memory_space<vmem>>, %arg9: memref<128x1024xf32, #tpu.memory_space<vmem>>, %arg10: memref<1x256xf32, #tpu.memory_space<vmem>>, %arg11: memref<1x256xf32, #tpu.memory_space<vmem>>, %arg12: memref<1x256xf32, #tpu.memory_space<vmem>>, %arg13: memref<1x256xf32, #tpu.memory_space<vmem>>) attributes {dimension_semantics = [#tpu.dimension_semantics<arbitrary>, #tpu.dimension_semantics<arbitrary>], iteration_bounds = array<i64: 2, 2>, scalar_prefetch = 0 : i64, scratch_operands = 4 : i64, tpu.core_type = #tpu.core_type<tc>, window_params = [{transform_indices = @transform_0, window_bounds = array<i64: 128, 512>}, {pipeline_mode = #tpu.pipeline_mode<synchronous>, transform_indices = @transform_1, window_bounds = array<i64: 512, 256>}, {pipeline_mode = #tpu.pipeline_mode<synchronous>, transform_indices = @transform_2, window_bounds = array<i64: 1, 256>}, {pipeline_mode = #tpu.pipeline_mode<synchronous>, transform_indices = @transform_3, window_bounds = array<i64: 1, 256>}, {pipeline_mode = #tpu.pipeline_mode<synchronous>, transform_indices = @transform_4, window_bounds = array<i64: 1, 256>}, {pipeline_mode = #tpu.pipeline_mode<synchronous>, transform_indices = @transform_5, window_bounds = array<i64: 256, 1024>}, {pipeline_mode = #tpu.pipeline_mode<synchronous>, transform_indices = @transform_6, window_bounds = array<i64: 1, 1024>}, {transform_indices = @transform_7, window_bounds = array<i64: 128, 1024>}]} {
    %c0 = arith.constant 0 : index
    %c0_0 = arith.constant 0 : index
    %0 = vector.load %arg2[%c0, %c0_0] : memref<128x512xbf16, #tpu.memory_space<vmem>>, vector<128x512xbf16>
    %c0_1 = arith.constant 0 : index
    %c0_2 = arith.constant 0 : index
    %1 = vector.load %arg3[%c0_1, %c0_2] : memref<512x256xbf16, #tpu.memory_space<vmem>>, vector<512x256xbf16>
    %cst = arith.constant dense<0.000000e+00> : vector<128x256xf32>
    %2 = tpu.matmul %0, %1, %cst {dimension_numbers = #tpu.dot_dimension_numbers<[1], [0], [0], [1], [0, 0, 1, 1], [], []>} : vector<128x512xbf16>, vector<512x256xbf16>, vector<128x256xf32> -> vector<128x256xf32>
    %c0_3 = arith.constant 0 : index
    %c0_4 = arith.constant 0 : index
    %3 = vector.load %arg4[%c0_3, %c0_4] : memref<1x256xf32, #tpu.memory_space<vmem>>, vector<1x256xf32>
    %4 = vector.broadcast %3 : vector<1x256xf32> to vector<128x256xf32>
    %5 = arith.addf %2, %4 : vector<128x256xf32>
    %cst_5 = arith.constant 0.000000e+00 : f32
    %6 = vector.broadcast %cst_5 : f32 to vector<128x256xf32>
    %7 = arith.maximumf %5, %6 : vector<128x256xf32>
    %c0_i32 = arith.constant 0 : i32
    %8 = arith.cmpi eq, %arg0, %c0_i32 : i32
    %9 = arith.extui %8 : i1 to i32
    %c0_i32_6 = arith.constant 0 : i32
    %10 = arith.cmpi ne, %9, %c0_i32_6 : i32
    scf.if %10 {
      %c0_i32_8 = arith.constant 0 : i32
      %14 = arith.cmpi eq, %arg1, %c0_i32_8 : i32
      %15 = arith.extui %14 : i1 to i32
      %c0_i32_9 = arith.constant 0 : i32
      %16 = arith.cmpi ne, %15, %c0_i32_9 : i32
      scf.if %16 {
        %cst_22 = arith.constant 0.000000e+00 : f32
        %31 = vector.broadcast %cst_22 : f32 to vector<1x256xf32>
        %c0_23 = arith.constant 0 : index
        %c0_24 = arith.constant 0 : index
        %32 = vector.load %arg10[%c0_23, %c0_24] : memref<1x256xf32, #tpu.memory_space<vmem>>, vector<1x256xf32>
        tpu.vector_store %arg10[%c0_23, %c0_24], %31 {strides = array<i32>} : memref<1x256xf32, #tpu.memory_space<vmem>>, vector<1x256xf32>,
        %cst_25 = arith.constant 0.000000e+00 : f32
        %33 = vector.broadcast %cst_25 : f32 to vector<1x256xf32>
        %c0_26 = arith.constant 0 : index
        %c0_27 = arith.constant 0 : index
        %34 = vector.load %arg11[%c0_26, %c0_27] : memref<1x256xf32, #tpu.memory_space<vmem>>, vector<1x256xf32>
        tpu.vector_store %arg11[%c0_26, %c0_27], %33 {strides = array<i32>} : memref<1x256xf32, #tpu.memory_space<vmem>>, vector<1x256xf32>,
      } else {
      }
      %c0_10 = arith.constant 0 : index
      %c0_11 = arith.constant 0 : index
      %17 = vector.load %arg10[%c0_10, %c0_11] : memref<1x256xf32, #tpu.memory_space<vmem>>, vector<1x256xf32>
      %cst_12 = arith.constant dense<0.000000e+00> : vector<256xf32>
      %18 = vector.multi_reduction <add>, %7, %cst_12 [0] : vector<128x256xf32> to vector<256xf32>
      %19 = vector.shape_cast %18 : vector<256xf32> to vector<1x256xf32>
      %20 = arith.addf %17, %19 : vector<1x256xf32>
      %c0_13 = arith.constant 0 : index
      %c0_14 = arith.constant 0 : index
      %21 = vector.load %arg10[%c0_13, %c0_14] : memref<1x256xf32, #tpu.memory_space<vmem>>, vector<1x256xf32>
      tpu.vector_store %arg10[%c0_13, %c0_14], %20 {strides = array<i32>} : memref<1x256xf32, #tpu.memory_space<vmem>>, vector<1x256xf32>,
      %c0_15 = arith.constant 0 : index
      %c0_16 = arith.constant 0 : index
      %22 = vector.load %arg11[%c0_15, %c0_16] : memref<1x256xf32, #tpu.memory_space<vmem>>, vector<1x256xf32>
      %23 = arith.mulf %7, %7 : vector<128x256xf32>
      %cst_17 = arith.constant dense<0.000000e+00> : vector<256xf32>
      %24 = vector.multi_reduction <add>, %23, %cst_17 [0] : vector<128x256xf32> to vector<256xf32>
      %25 = vector.shape_cast %24 : vector<256xf32> to vector<1x256xf32>
      %26 = arith.addf %22, %25 : vector<1x256xf32>
      %c0_18 = arith.constant 0 : index
      %c0_19 = arith.constant 0 : index
      %27 = vector.load %arg11[%c0_18, %c0_19] : memref<1x256xf32, #tpu.memory_space<vmem>>, vector<1x256xf32>
      tpu.vector_store %arg11[%c0_18, %c0_19], %26 {strides = array<i32>} : memref<1x256xf32, #tpu.memory_space<vmem>>, vector<1x256xf32>,
      %c1_i32_20 = arith.constant 1 : i32
      %28 = arith.cmpi eq, %arg1, %c1_i32_20 : i32
      %29 = arith.extui %28 : i1 to i32
      %c0_i32_21 = arith.constant 0 : i32
      %30 = arith.cmpi ne, %29, %c0_i32_21 : i32
      scf.if %30 {
        %c0_22 = arith.constant 0 : index
        %c0_23 = arith.constant 0 : index
        %31 = vector.load %arg10[%c0_22, %c0_23] : memref<1x256xf32, #tpu.memory_space<vmem>>, vector<1x256xf32>
        %cst_24 = arith.constant 3.906250e-03 : f32
        %32 = vector.broadcast %cst_24 : f32 to vector<1x256xf32>
        %33 = arith.mulf %31, %32 : vector<1x256xf32>
        %c0_25 = arith.constant 0 : index
        %c0_26 = arith.constant 0 : index
        %34 = vector.load %arg11[%c0_25, %c0_26] : memref<1x256xf32, #tpu.memory_space<vmem>>, vector<1x256xf32>
        %cst_27 = arith.constant 3.906250e-03 : f32
        %35 = vector.broadcast %cst_27 : f32 to vector<1x256xf32>
        %36 = arith.mulf %34, %35 : vector<1x256xf32>
        %37 = arith.mulf %33, %33 : vector<1x256xf32>
        %38 = arith.subf %36, %37 : vector<1x256xf32>
        %c0_28 = arith.constant 0 : index
        %c0_29 = arith.constant 0 : index
        %39 = vector.load %arg5[%c0_28, %c0_29] : memref<1x256xf32, #tpu.memory_space<vmem>>, vector<1x256xf32>
        %cst_30 = arith.constant 0.00999999977 : f32
        %40 = vector.broadcast %cst_30 : f32 to vector<1x256xf32>
        %41 = arith.addf %38, %40 : vector<1x256xf32>
        %42 = math.rsqrt %41 : vector<1x256xf32>
        %43 = arith.mulf %39, %42 : vector<1x256xf32>
        %c0_31 = arith.constant 0 : index
        %c0_32 = arith.constant 0 : index
        %44 = vector.load %arg12[%c0_31, %c0_32] : memref<1x256xf32, #tpu.memory_space<vmem>>, vector<1x256xf32>
        tpu.vector_store %arg12[%c0_31, %c0_32], %43 {strides = array<i32>} : memref<1x256xf32, #tpu.memory_space<vmem>>, vector<1x256xf32>,
        %c0_33 = arith.constant 0 : index
        %c0_34 = arith.constant 0 : index
        %45 = vector.load %arg6[%c0_33, %c0_34] : memref<1x256xf32, #tpu.memory_space<vmem>>, vector<1x256xf32>
        %46 = arith.mulf %33, %43 : vector<1x256xf32>
        %47 = arith.subf %45, %46 : vector<1x256xf32>
        %c0_35 = arith.constant 0 : index
        %c0_36 = arith.constant 0 : index
        %48 = vector.load %arg13[%c0_35, %c0_36] : memref<1x256xf32, #tpu.memory_space<vmem>>, vector<1x256xf32>
        tpu.vector_store %arg13[%c0_35, %c0_36], %47 {strides = array<i32>} : memref<1x256xf32, #tpu.memory_space<vmem>>, vector<1x256xf32>,
      } else {
      }
    } else {
    }
    %c1_i32 = arith.constant 1 : i32
    %11 = arith.cmpi eq, %arg0, %c1_i32 : i32
    %12 = arith.extui %11 : i1 to i32
    %c0_i32_7 = arith.constant 0 : i32
    %13 = arith.cmpi ne, %12, %c0_i32_7 : i32
    scf.if %13 {
      %c0_8 = arith.constant 0 : index
      %c0_9 = arith.constant 0 : index
      %14 = vector.load %arg12[%c0_8, %c0_9] : memref<1x256xf32, #tpu.memory_space<vmem>>, vector<1x256xf32>
      %15 = vector.broadcast %14 : vector<1x256xf32> to vector<128x256xf32>
      %16 = arith.mulf %7, %15 : vector<128x256xf32>
      %c0_10 = arith.constant 0 : index
      %c0_11 = arith.constant 0 : index
      %17 = vector.load %arg13[%c0_10, %c0_11] : memref<1x256xf32, #tpu.memory_space<vmem>>, vector<1x256xf32>
      %18 = vector.broadcast %17 : vector<1x256xf32> to vector<128x256xf32>
      %19 = arith.addf %16, %18 : vector<128x256xf32>
      %20 = arith.truncf %19 : vector<128x256xf32> to vector<128x256xbf16>
      %c0_12 = arith.constant 0 : index
      %c0_13 = arith.constant 0 : index
      %21 = vector.load %arg7[%c0_12, %c0_13] : memref<256x1024xbf16, #tpu.memory_space<vmem>>, vector<256x1024xbf16>
      %cst_14 = arith.constant dense<0.000000e+00> : vector<128x1024xf32>
      %22 = tpu.matmul %20, %21, %cst_14 {dimension_numbers = #tpu.dot_dimension_numbers<[1], [0], [0], [1], [0, 0, 1, 1], [], []>} : vector<128x256xbf16>, vector<256x1024xbf16>, vector<128x1024xf32> -> vector<128x1024xf32>
      %c0_15 = arith.constant 0 : index
      %c0_16 = arith.constant 0 : index
      %23 = vector.load %arg8[%c0_15, %c0_16] : memref<1x1024xf32, #tpu.memory_space<vmem>>, vector<1x1024xf32>
      %24 = vector.broadcast %23 : vector<1x1024xf32> to vector<128x1024xf32>
      %25 = arith.addf %22, %24 : vector<128x1024xf32>
      %26 = arith.negf %25 : vector<128x1024xf32>
      %27 = math.exp %26 : vector<128x1024xf32>
      %cst_17 = arith.constant 1.000000e+00 : f32
      %28 = vector.broadcast %cst_17 : f32 to vector<128x1024xf32>
      %29 = arith.addf %28, %27 : vector<128x1024xf32>
      %30 = arith.divf %28, %29 : vector<128x1024xf32>
      %31 = tpu.iota {dimensions = array<i32: 1>} : vector<128x1024xi32>
      %c1000_i32 = arith.constant 1000 : i32
      %32 = vector.broadcast %c1000_i32 : i32 to vector<128x1024xi32>
      %33 = arith.cmpi eq, %31, %32 : vector<128x1024xi32>
      %c1001_i32 = arith.constant 1001 : i32
      %34 = vector.broadcast %c1001_i32 : i32 to vector<128x1024xi32>
      %35 = arith.cmpi eq, %31, %34 : vector<128x1024xi32>
      %cst_18 = arith.constant 1.000000e+00 : f32
      %cst_19 = arith.constant 0.000000e+00 : f32
      %36 = vector.broadcast %cst_18 : f32 to vector<128x1024xf32>
      %37 = vector.broadcast %cst_19 : f32 to vector<128x1024xf32>
      %38 = arith.select %33, %36, %37 : vector<128x1024xi1>, vector<128x1024xf32>
      %cst_20 = arith.constant 1.000000e+00 : f32
      %cst_21 = arith.constant 0.000000e+00 : f32
      %39 = vector.broadcast %cst_20 : f32 to vector<128x1024xf32>
      %40 = vector.broadcast %cst_21 : f32 to vector<128x1024xf32>
      %41 = arith.select %35, %39, %40 : vector<128x1024xi1>, vector<128x1024xf32>
      %42 = arith.subf %38, %41 : vector<128x1024xf32>
      %43 = arith.mulf %25, %42 : vector<128x1024xf32>
      %cst_22 = arith.constant dense<0.000000e+00> : vector<128xf32>
      %44 = vector.multi_reduction <add>, %43, %cst_22 [1] : vector<128x1024xf32> to vector<128xf32>
      %45 = vector.shape_cast %44 : vector<128xf32> to vector<128x1xf32>
      %46 = arith.negf %45 : vector<128x1xf32>
      %47 = math.exp %46 : vector<128x1xf32>
      %cst_23 = arith.constant 1.000000e+00 : f32
      %48 = vector.broadcast %cst_23 : f32 to vector<128x1xf32>
      %49 = arith.addf %48, %47 : vector<128x1xf32>
      %50 = arith.divf %48, %49 : vector<128x1xf32>
      %cst_24 = arith.constant 1.000000e+00 : f32
      %51 = vector.broadcast %cst_24 : f32 to vector<128x1xf32>
      %52 = arith.subf %51, %50 : vector<128x1xf32>
      %53 = vector.shape_cast %52 : vector<128x1xf32> to vector<128x1xf32>
      %54 = vector.broadcast %53 : vector<128x1xf32> to vector<128x1024xf32>
      %55 = arith.select %35, %54, %30 : vector<128x1024xi1>, vector<128x1024xf32>
      %56 = vector.shape_cast %50 : vector<128x1xf32> to vector<128x1xf32>
      %57 = vector.broadcast %56 : vector<128x1xf32> to vector<128x1024xf32>
      %58 = arith.select %33, %57, %55 : vector<128x1024xi1>, vector<128x1024xf32>
      %c0_25 = arith.constant 0 : index
      %c0_26 = arith.constant 0 : index
      %59 = vector.load %arg9[%c0_25, %c0_26] : memref<128x1024xf32, #tpu.memory_space<vmem>>, vector<128x1024xf32>
      tpu.vector_store %arg9[%c0_25, %c0_26], %58 {strides = array<i32>} : memref<128x1024xf32, #tpu.memory_space<vmem>>, vector<128x1024xf32>,
    } else {
    }
    return
  }
  func.func @transform_0(%arg0: i32, %arg1: i32) -> (i32, i32) {
    %c0_i32 = arith.constant 0 : i32
    %c0_i32_0 = arith.constant 0 : i32
    return %arg1, %c0_i32 : i32, i32
  }
  func.func @transform_1(%arg0: i32, %arg1: i32) -> (i32, i32) {
    %c0_i32 = arith.constant 0 : i32
    %c0_i32_0 = arith.constant 0 : i32
    %c0_i32_1 = arith.constant 0 : i32
    return %c0_i32, %c0_i32_0 : i32, i32
  }
  func.func @transform_2(%arg0: i32, %arg1: i32) -> (i32, i32) {
    %c0_i32 = arith.constant 0 : i32
    %c0_i32_0 = arith.constant 0 : i32
    %c0_i32_1 = arith.constant 0 : i32
    return %c0_i32, %c0_i32_0 : i32, i32
  }
  func.func @transform_3(%arg0: i32, %arg1: i32) -> (i32, i32) {
    %c0_i32 = arith.constant 0 : i32
    %c0_i32_0 = arith.constant 0 : i32
    %c0_i32_1 = arith.constant 0 : i32
    return %c0_i32, %c0_i32_0 : i32, i32
  }
  func.func @transform_4(%arg0: i32, %arg1: i32) -> (i32, i32) {
    %c0_i32 = arith.constant 0 : i32
    %c0_i32_0 = arith.constant 0 : i32
    %c0_i32_1 = arith.constant 0 : i32
    return %c0_i32, %c0_i32_0 : i32, i32
  }
  func.func @transform_5(%arg0: i32, %arg1: i32) -> (i32, i32) {
    %c0_i32 = arith.constant 0 : i32
    %c0_i32_0 = arith.constant 0 : i32
    %c0_i32_1 = arith.constant 0 : i32
    return %c0_i32, %c0_i32_0 : i32, i32
  }
  func.func @transform_6(%arg0: i32, %arg1: i32) -> (i32, i32) {
    %c0_i32 = arith.constant 0 : i32
    %c0_i32_0 = arith.constant 0 : i32
    %c0_i32_1 = arith.constant 0 : i32
    return %c0_i32, %c0_i32_0 : i32, i32
  }
  func.func @transform_7(%arg0: i32, %arg1: i32) -> (i32, i32) {
    %0 = arith.muli %arg0, %arg1 : i32
    %c0_i32 = arith.constant 0 : i32
    %c0_i32_0 = arith.constant 0 : i32
    return %0, %c0_i32 : i32, i32
  }
}

</mosaic_0001>

<bundles_post_ra>
// kernel: multi_output_head.1
= control target key start
LH: loop header
LB: loop body
LE: loop exit
PB: predicated region body
PF: predicated region fallthrough
CT: control target
= control target key end

     0   :  { %s5673_s24 = smov 0   ;;  %s5675_s25 = smov 0   ;;  %s7984_s0 = inlined_call_operand.vmem [shape: bf16[256,512], index: 0, kind: input, shape index: {}]   ;;  %s7985_s1 = inlined_call_operand.vmem [shape: bf16[512,256], index: 1, kind: input, shape index: {}]   ;;  %s7986_s2 = inlined_call_operand.vmem [shape: f32[1,256], index: 2, kind: input, shape index: {}]   ;;  %s7987_s3 = inlined_call_operand.vmem [shape: f32[1,256], index: 3, kind: input, shape index: {}]   ;;  %s7988_s4 = inlined_call_operand.vmem [shape: f32[1,256], index: 4, kind: input, shape index: {}]   ;;  %s7989_s5 = inlined_call_operand.vmem [shape: bf16[256,1024], index: 5, kind: input, shape index: {}]   ;;  %s7990_s6 = inlined_call_operand.vmem [shape: f32[1,1024], index: 6, kind: input, shape index: {}]   ;;  %s7991_s7 = inlined_call_operand.vmem [shape: f32[256,1024], index: 7, kind: output, shape index: {}]  }
   0x1   :  { %s5677_s26 = smov 0   ;;  %s5679_s27 = smov 0  }
   0x2   :  { %s5681_s28 = smov 0  }
   0x3 LB: > { %s26_s29 = sadd.s32 1, %s5620_s26  ;;  %s29_s30 = sadd.s32 1, %s5624_s27  ;;  %s5628_s28 = sphi %s5681_s28, %s17_s28   ;;  %s5624_s27 = sphi %s5679_s27, %s8081_s27   ;;  %s5620_s26 = sphi %s5677_s26, %s8080_s26   ;;  %s5616_s25 = sphi %s5675_s25, %s8079_s25   ;;  %s5612_s24 = sphi %s5673_s24, %s8078_s24  }
   0x4   : > { %p27_p0 = scmp.ge.s32.totalorder %s26_s29, 2  ;;  %p4377_p1 = scmp.ge.s32.totalorder %s5628_s28, 1 }
   0x5   : > { %p253_p2 = scmp.lt.s32.totalorder %s5628_s28, 5 }
   0x6   : > { %s8083_s29 = smov (%p27_p0, %s26_s29), 0  ;;  %s8085_s30 = smov (!%p27_p0, %s29_s30), %s5624_s27 }
   0x7   : > { %p254_p3 = pnand %p4377_p1, %p253_p2  ;;  %p31_p4 = scmp.ge.s32.totalorder %s8085_s30, 2 }
   0x8   : > { %s295_s8 = smul.u32 (!%p254_p3), %s5612_s24, %s5616_s25  ;;  %v4867_v0 = vld [vmem:[%s7985_s1 + $0x4] ss:$8 sps:$4 sm:$0xff] (!%p254_p3)   ;;  %v4871_v2 = vld [vmem:[%s7985_s1] ss:$8 sps:$4 sm:$0xff] (!%p254_p3)   ;;  %v4873_v4 = vld [vmem:[%s7985_s1 + $0x14] ss:$8 sps:$4 sm:$0xff] (!%p254_p3)  }
   0x9   : > { %s8087_s30 = smov (%p31_p4, %s8085_s30), 0  ;;  %257 = sbr.rel (%p254_p3) target bundleno = 1112 (0x458), region = 48 }
   0xa   : > { %v4869_v1 = vld [vmem:[%s7985_s1 + $0x104] ss:$8 sps:$4 sm:$0xff] (!%p254_p3)   ;;  %s4381_s13 = sshll.u32 (!%p254_p3), %s295_s8, 4  ;;  %892 = vmatprep.subr.bf16.mxu1 (!%p254_p3), %v4867_v0  ;;  %v4872_v3 = vld [vmem:[%s7985_s1 + $0x100] ss:$8 sps:$4 sm:$0xff] (!%p254_p3)   ;;  %p4480_p7 = scmp.ne.s32.totalorder (!%p254_p3), %s5616_s25, 0 }
   0xb   : > { %p297_p5 = scmp.lt.s32.totalorder (!%p254_p3), %s4381_s13, 31  ;;  %1005 = vmatprep.subr.bf16.mxu0 (!%p254_p3), %v4869_v1  ;;  %893 = vmatpush1.bf16.msra.mxu1 (!%p254_p3), %v4871_v2  ;;  %v4875_v5 = vld [vmem:[%s7985_s1 + $0x114] ss:$8 sps:$4 sm:$0xff] (!%p254_p3)   ;;  %v4877_v6 = vld [vmem:[%s7985_s1 + $0x10] ss:$8 sps:$4 sm:$0xff] (!%p254_p3)  }
   0xc   : > { %1006 = vmatpush1.bf16.msra.mxu0 (!%p254_p3), %v4872_v3  ;;  %894 = vmatprep.subr.bf16.mxu1 (!%p254_p3), %v4873_v4  ;;  %v4878_v7 = vld [vmem:[%s7985_s1 + $0x110] ss:$8 sps:$4 sm:$0xff] (!%p254_p3)   ;;  %v4879_v8 = vld [vmem:[%s7985_s1 + $0x24] ss:$8 sps:$4 sm:$0xff] (!%p254_p3)   ;;  %v4883_v10 = vld [vmem:[%s7985_s1 + $0x20] ss:$8 sps:$4 sm:$0xff] (!%p254_p3)  }
   0xd   : > { %1007 = vmatprep.subr.bf16.mxu0 (!%p254_p3), %v4875_v5  ;;  %v4881_v9 = vld [vmem:[%s7985_s1 + $0x124] ss:$8 sps:$4 sm:$0xff] (!%p254_p3)   ;;  %v4884_v11 = vld [vmem:[%s7985_s1 + $0x120] ss:$8 sps:$4 sm:$0xff] (!%p254_p3)   ;;  %v4885_v12 = vld [vmem:[%s7985_s1 + $0x34] ss:$8 sps:$4 sm:$0xff] (!%p254_p3)  }
   0xe   : > { %v4887_v13 = vld [vmem:[%s7985_s1 + $0x134] ss:$8 sps:$4 sm:$0xff] (!%p254_p3)   ;;  %v4889_v14 = vld [vmem:[%s7985_s1 + $0x30] ss:$8 sps:$4 sm:$0xff] (!%p254_p3)   ;;  %v4891_v16 = vld [vmem:[%s7985_s1 + $0x44] ss:$8 sps:$4 sm:$0xff] (!%p254_p3)  }
   0xf   : > { %895 = vmatpush1.bf16.msra.mxu1 (!%p254_p3), %v4877_v6  ;;  %v4890_v15 = vld [vmem:[%s7985_s1 + $0x130] ss:$8 sps:$4 sm:$0xff] (!%p254_p3)   ;;  %v4893_v17 = vld [vmem:[%s7985_s1 + $0x144] ss:$8 sps:$4 sm:$0xff] (!%p254_p3)   ;;  %v4895_v18 = vld [vmem:[%s7985_s1 + $0x40] ss:$8 sps:$4 sm:$0xff] (!%p254_p3)  }
  0x10   : > { %s8089_s13 = smov (!%p297_p5, %s4381_s13), 31  ;;  %1008 = vmatpush1.bf16.msra.mxu0 %v4878_v7  ;;  %896 = vmatprep.subr.bf16.mxu1 %v4879_v8  ;;  %v4896_v19 = vld [vmem:[%s7985_s1 + $0x140] ss:$8 sps:$4 sm:$0xff]   ;;  %v4897_v20 = vld [vmem:[%s7985_s1 + $0x54] ss:$8 sps:$4 sm:$0xff]   ;;  %p4481_p8 = scmp.ne.s32.totalorder (!%p4480_p7), %s5612_s24, 0 }
  0x11   : > { %s4759_s12 = sshll.u32 %s8089_s13, 6  ;;  %1009 = vmatprep.subr.bf16.mxu0 %v4881_v9  ;;  %v4899_v21 = vld [vmem:[%s7985_s1 + $0x154] ss:$8 sps:$4 sm:$0xff]   ;;  %v4901_v22 = vld [vmem:[%s7985_s1 + $0x50] ss:$8 sps:$4 sm:$0xff]  }
  0x12   : > { %s5745_s20 = scalar_lea.vmem %s7991_s7, %s4759_s12  ;;  %v4902_v23 = vld [vmem:[%s7985_s1 + $0x150] ss:$8 sps:$4 sm:$0xff]   ;;  %v4903_v24 = vld [vmem:[%s7985_s1 + $0x64] ss:$8 sps:$4 sm:$0xff]   ;;  %v4907_v26 = vld [vmem:[%s7985_s1 + $0x60] ss:$8 sps:$4 sm:$0xff]  }
  0x13   : > { %897 = vmatpush1.bf16.msra.mxu1 %v4883_v10  ;;  %v4905_v25 = vld [vmem:[%s7985_s1 + $0x164] ss:$8 sps:$4 sm:$0xff]   ;;  %v4908_v27 = vld [vmem:[%s7985_s1 + $0x160] ss:$8 sps:$4 sm:$0xff]   ;;  %v4909_v28 = vld [vmem:[%s7985_s1 + $0x74] ss:$8 sps:$4 sm:$0xff]  }
  0x14   : > { %1010 = vmatpush1.bf16.msra.mxu0 %v4884_v11  ;;  %898 = vmatprep.subr.bf16.mxu1 %v4885_v12  ;;  %v4911_v29 = vld [vmem:[%s7985_s1 + $0x174] ss:$8 sps:$4 sm:$0xff]   ;;  %s4378_s12 = sshll.u32 %s5612_s24, 4  ;;  %v4913_v30 = vld [vmem:[%s7985_s1 + $0x70] ss:$8 sps:$4 sm:$0xff]  }
  0x15   : > { %1011 = vmatprep.subr.bf16.mxu0 %v4887_v13  ;;  %v4914_v31 = vld [vmem:[%s7985_s1 + $0x170] ss:$8 sps:$4 sm:$0xff]   ;;  %v4915_v32 = vld [vmem:[%s7985_s1 + $0x84] ss:$8 sps:$4 sm:$0xff]   ;;  %p289_p6 = scmp.lt.s32.totalorder %s4378_s12, 31 }
  0x16   : > { %v4917_v33 = vld [vmem:[%s7985_s1 + $0x184] ss:$8 sps:$4 sm:$0xff]   ;;  %v4919_v34 = vld [vmem:[%s7985_s1 + $0x80] ss:$8 sps:$4 sm:$0xff]   ;;  %v4921_v36 = vld [vmem:[%s7985_s1 + $0x94] ss:$8 sps:$4 sm:$0xff]  }
  0x17   : > { %899 = vmatpush1.bf16.msra.mxu1 %v4889_v14  ;;  %v4920_v35 = vld [vmem:[%s7985_s1 + $0x180] ss:$8 sps:$4 sm:$0xff]   ;;  %v4923_v37 = vld [vmem:[%s7985_s1 + $0x194] ss:$8 sps:$4 sm:$0xff]   ;;  %s8091_s12 = smov (!%p289_p6, %s4378_s12), 31 }
  0x18   : > { %1012 = vmatpush1.bf16.msra.mxu0 %v4890_v15  ;;  %900 = vmatprep.subr.bf16.mxu1 %v4891_v16  ;;  %v4925_v38 = vld [vmem:[%s7985_s1 + $0x90] ss:$8 sps:$4 sm:$0xff]   ;;  %v4927_v40 = vld [vmem:[%s7985_s1 + $0xa4] ss:$8 sps:$4 sm:$0xff]   ;;  %s4758_s8 = sshll.u32 %s8091_s12, 4 }
  0x19   : > { %1013 = vmatprep.subr.bf16.mxu0 %v4893_v17  ;;  %v4926_v39 = vld [vmem:[%s7985_s1 + $0x190] ss:$8 sps:$4 sm:$0xff]   ;;  %v4929_v41 = vld [vmem:[%s7985_s1 + $0x1a4] ss:$8 sps:$4 sm:$0xff]   ;;  %v4931_v42 = vld [vmem:[%s7985_s1 + $0xa0] ss:$8 sps:$4 sm:$0xff]   ;;  %s5853_s19 = scalar_lea.vmem %s7984_s0, %s4758_s8 }
  0x1a   : > { %v4932_v43 = vld [vmem:[%s7985_s1 + $0x1a0] ss:$8 sps:$4 sm:$0xff]   ;;  %v4933_v44 = vld [vmem:[%s7985_s1 + $0xb4] ss:$8 sps:$4 sm:$0xff]   ;;  %v4937_v46 = vld [vmem:[%s7985_s1 + $0xb0] ss:$8 sps:$4 sm:$0xff]  }
  0x1b   : > { %901 = vmatpush1.bf16.msra.mxu1 %v4895_v18  ;;  %v4935_v45 = vld [vmem:[%s7985_s1 + $0x1b4] ss:$8 sps:$4 sm:$0xff]   ;;  %v4938_v47 = vld [vmem:[%s7985_s1 + $0x1b0] ss:$8 sps:$4 sm:$0xff]   ;;  %v4939_v48 = vld [vmem:[%s7985_s1 + $0xc4] ss:$8 sps:$4 sm:$0xff]  }
  0x1c   : > { %1014 = vmatpush1.bf16.msra.mxu0 %v4896_v19  ;;  %902 = vmatprep.subr.bf16.mxu1 %v4897_v20  ;;  %v4965_v49 = vld [vmem:[%s5853_s19 + $0x4] ss:$16 sps:$4 sm:$0xff]   ;;  %v4968_v51 = vld [vmem:[%s5853_s19 + $0xc] ss:$16 sps:$4 sm:$0xff]   ;;  %v4943_v52 = vld [vmem:[%s7985_s1 + $0xc0] ss:$8 sps:$4 sm:$0xff]  }
  0x1d   : > { %1015 = vmatprep.subr.bf16.mxu0 %v4899_v21  ;;  %v4941_v50 = vld [vmem:[%s7985_s1 + $0x1c4] ss:$8 sps:$4 sm:$0xff]   ;;  %924 = vmatprep.mubr.bf16.mxu1 %v4965_v49  ;;  %v4944_v53 = vld [vmem:[%s7985_s1 + $0x1c0] ss:$8 sps:$4 sm:$0xff]   ;;  %v4945_v54 = vld [vmem:[%s7985_s1 + $0xd4] ss:$8 sps:$4 sm:$0xff]  }
  0x1e   : > { %1037 = vmatprep.mubr.bf16.mxu0 %v4968_v51  ;;  %v4947_v55 = vld [vmem:[%s7985_s1 + $0x1d4] ss:$8 sps:$4 sm:$0xff]   ;;  %v4949_v56 = vld [vmem:[%s7985_s1 + $0xd0] ss:$8 sps:$4 sm:$0xff]   ;;  %v4951_v58 = vld [vmem:[%s7985_s1 + $0xe4] ss:$8 sps:$4 sm:$0xff]  }
  0x1f   : > { %903 = vmatpush1.bf16.msra.mxu1 %v4901_v22  ;;  %v4950_v57 = vld [vmem:[%s7985_s1 + $0x1d0] ss:$8 sps:$4 sm:$0xff]   ;;  %v4953_v59 = vld [vmem:[%s7985_s1 + $0x1e4] ss:$8 sps:$4 sm:$0xff]   ;;  %v4955_v60 = vld [vmem:[%s7985_s1 + $0xe0] ss:$8 sps:$4 sm:$0xff]  }
  0x20   : > { %1016 = vmatpush1.bf16.msra.mxu0 %v4902_v23  ;;  %904 = vmatprep.subr.bf16.mxu1 %v4903_v24  ;;  %v4956_v61 = vld [vmem:[%s7985_s1 + $0x1e0] ss:$8 sps:$4 sm:$0xff]   ;;  %v4957_v62 = vld [vmem:[%s7985_s1 + $0xf4] ss:$8 sps:$4 sm:$0xff]   ;;  %v4961_v0 = vld [vmem:[%s7985_s1 + $0xf0] ss:$8 sps:$4 sm:$0xff]  }
  0x21   : > { %1017 = vmatprep.subr.bf16.mxu0 %v4905_v25  ;;  %v4959_v63 = vld [vmem:[%s7985_s1 + $0x1f4] ss:$8 sps:$4 sm:$0xff]   ;;  %v4962_v1 = vld [vmem:[%s7985_s1 + $0x1f0] ss:$8 sps:$4 sm:$0xff]  }
  0x22   : > { %v4963_v2 = vld [vmem:[%s5853_s19] ss:$16 sps:$4 sm:$0xff]   ;;  %v4966_v3 = vld [vmem:[%s5853_s19 + $0x8] ss:$16 sps:$4 sm:$0xff]   ;;  %v4969_v4 = vld [vmem:[%s5853_s19 + $0x24] ss:$16 sps:$4 sm:$0xff]  }
  0x23   : > { %905 = vmatpush1.bf16.msra.mxu1 %v4907_v26  ;;  %v4971_v5 = vld [vmem:[%s5853_s19 + $0x2c] ss:$16 sps:$4 sm:$0xff]   ;;  %v4973_v6 = vld [vmem:[%s5853_s19 + $0x20] ss:$16 sps:$4 sm:$0xff]   ;;  %v4974_v7 = vld [vmem:[%s5853_s19 + $0x28] ss:$16 sps:$4 sm:$0xff]  }
  0x24   : > { %1018 = vmatpush1.bf16.msra.mxu0 %v4908_v27  ;;  %906 = vmatprep.subr.bf16.mxu1 %v4909_v28  ;;  %v4975_v8 = vld [vmem:[%s5853_s19 + $0x44] ss:$16 sps:$4 sm:$0xff]   ;;  %v4977_v9 = vld [vmem:[%s5853_s19 + $0x4c] ss:$16 sps:$4 sm:$0xff]   ;;  %v4979_v10 = vld [vmem:[%s5853_s19 + $0x40] ss:$16 sps:$4 sm:$0xff]  }
  0x25   : > { %1019 = vmatprep.subr.bf16.mxu0 %v4911_v29  ;;  %v4980_v11 = vld [vmem:[%s5853_s19 + $0x48] ss:$16 sps:$4 sm:$0xff]   ;;  %v4981_v12 = vld [vmem:[%s5853_s19 + $0x64] ss:$16 sps:$4 sm:$0xff]   ;;  %v4983_v13 = vld [vmem:[%s5853_s19 + $0x6c] ss:$16 sps:$4 sm:$0xff]  }
  0x26   : > { %v4985_v14 = vld [vmem:[%s5853_s19 + $0x60] ss:$16 sps:$4 sm:$0xff]   ;;  %v4986_v15 = vld [vmem:[%s5853_s19 + $0x68] ss:$16 sps:$4 sm:$0xff]   ;;  %v4987_v16 = vld [vmem:[%s5853_s19 + $0x84] ss:$16 sps:$4 sm:$0xff]  }
  0x27   : > { %907 = vmatpush1.bf16.msra.mxu1 %v4913_v30  ;;  %v4989_v17 = vld [vmem:[%s5853_s19 + $0x8c] ss:$16 sps:$4 sm:$0xff]   ;;  %v4991_v18 = vld [vmem:[%s5853_s19 + $0x80] ss:$16 sps:$4 sm:$0xff]   ;;  %v4992_v19 = vld [vmem:[%s5853_s19 + $0x88] ss:$16 sps:$4 sm:$0xff]  }
  0x28   : > { %1020 = vmatpush1.bf16.msra.mxu0 %v4914_v31  ;;  %908 = vmatprep.subr.bf16.mxu1 %v4915_v32  ;;  %v4993_v20 = vld [vmem:[%s5853_s19 + $0xa4] ss:$16 sps:$4 sm:$0xff]   ;;  %v4995_v21 = vld [vmem:[%s5853_s19 + $0xac] ss:$16 sps:$4 sm:$0xff]   ;;  %v4997_v22 = vld [vmem:[%s5853_s19 + $0xa0] ss:$16 sps:$4 sm:$0xff]   ;;  %v7992_v32 = vlaneseq }
  0x29   : > { %1021 = vmatprep.subr.bf16.mxu0 %v4917_v33  ;;  %v4998_v23 = vld [vmem:[%s5853_s19 + $0xa8] ss:$16 sps:$4 sm:$0xff]   ;;  %v4999_v24 = vld [vmem:[%s5853_s19 + $0xc4] ss:$16 sps:$4 sm:$0xff]   ;;  %v5001_v25 = vld [vmem:[%s5853_s19 + $0xcc] ss:$16 sps:$4 sm:$0xff]  }
  0x2a   : > { %v5003_v26 = vld [vmem:[%s5853_s19 + $0xc0] ss:$16 sps:$4 sm:$0xff]   ;;  %v5004_v27 = vld [vmem:[%s5853_s19 + $0xc8] ss:$16 sps:$4 sm:$0xff]   ;;  %v5005_v28 = vld [vmem:[%s5853_s19 + $0xe4] ss:$16 sps:$4 sm:$0xff]  }
  0x2b   : > { %909 = vmatpush1.bf16.msra.mxu1 %v4919_v34  ;;  %v5007_v29 = vld [vmem:[%s5853_s19 + $0xec] ss:$16 sps:$4 sm:$0xff]   ;;  %v5009_v30 = vld [vmem:[%s5853_s19 + $0xe0] ss:$16 sps:$4 sm:$0xff]   ;;  %v5010_v31 = vld [vmem:[%s5853_s19 + $0xe8] ss:$16 sps:$4 sm:$0xff]  }
  0x2c   : > { %1022 = vmatpush1.bf16.msra.mxu0 %v4920_v35  ;;  %910 = vmatprep.subr.bf16.mxu1 %v4921_v36  ;;  %v5945_v33 = vshrl.u32 %v7992_v32, 7  ;;  %v400_v35 = vld [vmem:[%s7986_s2] sm:$0x3] }
  0x2d   : > { %1023 = vmatprep.subr.bf16.mxu0 %v4923_v37 }
  0x2e   : > { %v5948_v34 = vsub.s32 0, %v5945_v33  ;;  %v5954_v36 = vsub.s32 1, %v5945_v33 }
  0x2f   : > { %911 = vmatpush1.bf16.msra.mxu1 %v4925_v38 }
  0x30   : > { %1024 = vmatpush1.bf16.msra.mxu0 %v4926_v39  ;;  %912 = vmatprep.subr.bf16.mxu1 %v4927_v40  ;;  %v5957_v37 = vrot.slane %v400_v35, %v5948_v34  ;;  %v5960_v38 = vrot.slane %v400_v35, %v5954_v36 }
  0x31   : > { %1025 = vmatprep.subr.bf16.mxu0 %v4929_v41 }
  0x33   : > { %913 = vmatpush1.bf16.msra.mxu1 %v4931_v42 }
  0x34   : > { %1026 = vmatpush1.bf16.msra.mxu0 %v4932_v43  ;;  %914 = vmatprep.subr.bf16.mxu1 %v4933_v44 }
  0x35   : > { %1027 = vmatprep.subr.bf16.mxu0 %v4935_v45 }
  0x37   : > { %915 = vmatpush1.bf16.msra.mxu1 %v4937_v46 }
  0x38   : > { %1028 = vmatpush1.bf16.msra.mxu0 %v4938_v47  ;;  %916 = vmatprep.subr.bf16.mxu1 %v4939_v48 }
  0x39   : > { %1029 = vmatprep.subr.bf16.mxu0 %v4941_v50 }
  0x3b   : > { %917 = vmatpush1.bf16.msra.mxu1 %v4943_v52 }
  0x3c   : > { %1030 = vmatpush1.bf16.msra.mxu0 %v4944_v53  ;;  %918 = vmatprep.subr.bf16.mxu1 %v4945_v54 }
  0x3d   : > { %1031 = vmatprep.subr.bf16.mxu0 %v4947_v55 }
  0x3f   : > { %919 = vmatpush1.bf16.msra.mxu1 %v4949_v56 }
  0x40   : > { %1032 = vmatpush1.bf16.msra.mxu0 %v4950_v57  ;;  %920 = vmatprep.subr.bf16.mxu1 %v4951_v58 }
  0x41   : > { %1033 = vmatprep.subr.bf16.mxu0 %v4953_v59 }
  0x43   : > { %921 = vmatpush1.bf16.msra.mxu1 %v4955_v60 }
  0x44   : > { %1034 = vmatpush1.bf16.msra.mxu0 %v4956_v61  ;;  %922 = vmatprep.subr.bf16.mxu1 %v4957_v62 }
  0x45   : > { %1035 = vmatprep.subr.bf16.mxu0 %v4959_v63 }
  0x47   : > { %923 = vmatpush1.bf16.msra.mxu1 %v4961_v0 }
  0x48   : > { %1036 = vmatpush1.bf16.msra.mxu0 %v4962_v1 }
  0x4a   : > { %925 = vmatmul.mubr.bf16.vlgmr.msra.gmra.mrb[0].mxu1 %v4963_v2 }
  0x4b   : > { %1038 = vmatmul.mubr.bf16.vlgmr.msra.gmra.mrb[0].mxu0 %v4966_v3  ;;  %934 = vmatprep.mubr.bf16.mxu1 %v4969_v4 }
  0x4c   : > { %1047 = vmatprep.mubr.bf16.mxu0 %v4971_v5 }
  0x52   : > { %935 = vmatmul.mubr.bf16.gmra.mrb[4].mxu1 %v4973_v6 }
  0x53   : > { %1048 = vmatmul.mubr.bf16.gmra.mrb[4].mxu0 %v4974_v7  ;;  %944 = vmatprep.mubr.bf16.mxu1 %v4975_v8 }
  0x54   : > { %1057 = vmatprep.mubr.bf16.mxu0 %v4977_v9 }
  0x5a   : > { %945 = vmatmul.mubr.bf16.gmra.mrb[8].mxu1 %v4979_v10 }
  0x5b   : > { %1058 = vmatmul.mubr.bf16.gmra.mrb[8].mxu0 %v4980_v11  ;;  %954 = vmatprep.mubr.bf16.mxu1 %v4981_v12 }
  0x5c   : > { %1067 = vmatprep.mubr.bf16.mxu0 %v4983_v13 }
  0x62   : > { %955 = vmatmul.mubr.bf16.gmra.mrb[12].mxu1 %v4985_v14 }
  0x63   : > { %1068 = vmatmul.mubr.bf16.gmra.mrb[12].mxu0 %v4986_v15  ;;  %964 = vmatprep.mubr.bf16.mxu1 %v4987_v16 }
  0x64   : > { %1077 = vmatprep.mubr.bf16.mxu0 %v4989_v17 }
  0x6a   : > { %965 = vmatmul.mubr.bf16.gmra.mrb[16].mxu1 %v4991_v18 }
  0x6b   : > { %1078 = vmatmul.mubr.bf16.gmra.mrb[16].mxu0 %v4992_v19  ;;  %974 = vmatprep.mubr.bf16.mxu1 %v4993_v20 }
  0x6c   : > { %1087 = vmatprep.mubr.bf16.mxu0 %v4995_v21 }
  0x72   : > { %975 = vmatmul.mubr.bf16.gmra.mrb[20].mxu1 %v4997_v22 }
  0x73   : > { %1088 = vmatmul.mubr.bf16.gmra.mrb[20].mxu0 %v4998_v23  ;;  %984 = vmatprep.mubr.bf16.mxu1 %v4999_v24 }
  0x74   : > { %1097 = vmatprep.mubr.bf16.mxu0 %v5001_v25 }
  0x7a   : > { %985 = vmatmul.mubr.bf16.gmra.mrb[24].mxu1 %v5003_v26 }
  0x7b   : > { %1098 = vmatmul.mubr.bf16.gmra.mrb[24].mxu0 %v5004_v27  ;;  %994 = vmatprep.mubr.bf16.mxu1 %v5005_v28 }
  0x7c   : > { %1107 = vmatprep.mubr.bf16.mxu0 %v5007_v29 }
  0x82   : > { %995 = vmatmul.mubr.bf16.gmra.mrb[28].mxu1 %v5009_v30 }
  0x83   : > { %1108 = vmatmul.mubr.bf16.gmra.mrb[28].mxu0 %v5010_v31 }
 0x11d   : > { %v926_v39 = vpop.f32.mrb[0].mxu1 }
 0x11e   : > { %v1039_v40 = vpop.f32.mrb[0].mxu0  ;;  %v927_v41 = vadd.f32 %v926_v39, %v5957_v37  ;;  %v928_v42 = vpop.f32.mrb[1].mxu1 }
 0x11f   : > { %v1041_v43 = vpop.f32.mrb[1].mxu0  ;;  %v929_v44 = vadd.f32 %v928_v42, %v5960_v38  ;;  %v930_v45 = vpop.f32.mrb[2].mxu1 }
 0x120   : > { %v1043_v46 = vpop.f32.mrb[2].mxu0  ;;  %v1040_v47 = vadd.f32 %v1039_v40, %v927_v41  ;;  %v931_v48 = vadd.f32 %v930_v45, %v5957_v37  ;;  %v932_v49 = vpop.f32.mrb[3].mxu1 }
 0x121   : > { %v1045_v50 = vpop.f32.mrb[3].mxu0  ;;  %v1042_v51 = vadd.f32 %v1041_v43, %v929_v44  ;;  %v933_v52 = vadd.f32 %v932_v49, %v5960_v38 }
 0x122   : > { %v5966_v53 = vmax.f32 %v1040_v47, 0.0  ;;  %v1044_v54 = vadd.f32 %v1043_v46, %v931_v48 }
 0x123   : > { %v5968_v55 = vmax.f32 %v1042_v51, 0.0  ;;  %v1046_v56 = vadd.f32 %v1045_v50, %v933_v52 }
 0x124   : > { %v5970_v57 = vmax.f32 %v1044_v54, 0.0 }
 0x125   : > { %v5972_v58 = vmax.f32 %v1046_v56, 0.0  ;;  %v936_v59 = vpop.f32.mrb[4].mxu1 }
 0x126   : > { %v1049_v60 = vpop.f32.mrb[4].mxu0  ;;  %v937_v61 = vadd.f32 %v936_v59, %v5957_v37  ;;  %v938_v62 = vpop.f32.mrb[5].mxu1 }
 0x127   : > { %v1051_v63 = vpop.f32.mrb[5].mxu0  ;;  %v939_v0 = vadd.f32 %v938_v62, %v5960_v38  ;;  %v940_v1 = vpop.f32.mrb[6].mxu1 }
 0x128   : > { %v1053_v2 = vpop.f32.mrb[6].mxu0  ;;  %v1050_v3 = vadd.f32 %v1049_v60, %v937_v61  ;;  %v941_v4 = vadd.f32 %v940_v1, %v5957_v37  ;;  %v942_v5 = vpop.f32.mrb[7].mxu1 }
 0x129   : > { %v1055_v6 = vpop.f32.mrb[7].mxu0  ;;  %v1052_v7 = vadd.f32 %v1051_v63, %v939_v0  ;;  %v943_v8 = vadd.f32 %v942_v5, %v5960_v38 }
 0x12a   : > { %v5978_v9 = vmax.f32 %v1050_v3, 0.0  ;;  %v1054_v10 = vadd.f32 %v1053_v2, %v941_v4 }
 0x12b   : > { %v5980_v11 = vmax.f32 %v1052_v7, 0.0  ;;  %v1056_v12 = vadd.f32 %v1055_v6, %v943_v8 }
 0x12c   : > { %v5982_v13 = vmax.f32 %v1054_v10, 0.0 }
 0x12d   : > { %v5984_v14 = vmax.f32 %v1056_v12, 0.0  ;;  %v946_v15 = vpop.f32.mrb[8].mxu1 }
 0x12e   : > { %v1059_v16 = vpop.f32.mrb[8].mxu0  ;;  %v947_v17 = vadd.f32 %v946_v15, %v5957_v37  ;;  %v948_v18 = vpop.f32.mrb[9].mxu1 }
 0x12f   : > { %v1061_v19 = vpop.f32.mrb[9].mxu0  ;;  %v949_v20 = vadd.f32 %v948_v18, %v5960_v38  ;;  %v950_v21 = vpop.f32.mrb[10].mxu1 }
 0x130   : > { %v1063_v22 = vpop.f32.mrb[10].mxu0  ;;  %v1060_v23 = vadd.f32 %v1059_v16, %v947_v17  ;;  %v951_v24 = vadd.f32 %v950_v21, %v5957_v37  ;;  %v952_v25 = vpop.f32.mrb[11].mxu1 }
 0x131   : > { %v1065_v26 = vpop.f32.mrb[11].mxu0  ;;  %v1062_v27 = vadd.f32 %v1061_v19, %v949_v20  ;;  %v953_v28 = vadd.f32 %v952_v25, %v5960_v38 }
 0x132   : > { %v5990_v29 = vmax.f32 %v1060_v23, 0.0  ;;  %v1064_v30 = vadd.f32 %v1063_v22, %v951_v24 }
 0x133   : > { %v5992_v31 = vmax.f32 %v1062_v27, 0.0  ;;  %v1066_v35 = vadd.f32 %v1065_v26, %v953_v28 }
 0x134   : > { %v5994_v39 = vmax.f32 %v1064_v30, 0.0 }
 0x135   : > { %v5996_v40 = vmax.f32 %v1066_v35, 0.0  ;;  %v956_v41 = vpop.f32.mrb[12].mxu1 }
 0x136   : > { %v1069_v42 = vpop.f32.mrb[12].mxu0  ;;  %v957_v43 = vadd.f32 %v956_v41, %v5957_v37  ;;  %v958_v44 = vpop.f32.mrb[13].mxu1 }
 0x137   : > { %v1071_v45 = vpop.f32.mrb[13].mxu0  ;;  %v959_v46 = vadd.f32 %v958_v44, %v5960_v38  ;;  %v960_v47 = vpop.f32.mrb[14].mxu1 }
 0x138   : > { %v1073_v48 = vpop.f32.mrb[14].mxu0  ;;  %v1070_v49 = vadd.f32 %v1069_v42, %v957_v43  ;;  %v961_v50 = vadd.f32 %v960_v47, %v5957_v37  ;;  %v962_v51 = vpop.f32.mrb[15].mxu1 }
 0x139   : > { %v1075_v52 = vpop.f32.mrb[15].mxu0  ;;  %v1072_v54 = vadd.f32 %v1071_v45, %v959_v46  ;;  %v963_v56 = vadd.f32 %v962_v51, %v5960_v38 }
 0x13a   : > { %v6002_v59 = vmax.f32 %v1070_v49, 0.0  ;;  %v1074_v60 = vadd.f32 %v1073_v48, %v961_v50 }
 0x13b   : > { %v6004_v61 = vmax.f32 %v1072_v54, 0.0  ;;  %v1076_v62 = vadd.f32 %v1075_v52, %v963_v56 }
 0x13c   : > { %v6006_v63 = vmax.f32 %v1074_v60, 0.0 }
 0x13d   : > { %v6008_v0 = vmax.f32 %v1076_v62, 0.0  ;;  %v966_v1 = vpop.f32.mrb[16].mxu1 }
 0x13e   : > { %v1079_v2 = vpop.f32.mrb[16].mxu0  ;;  %v967_v3 = vadd.f32 %v966_v1, %v5957_v37  ;;  %v968_v4 = vpop.f32.mrb[17].mxu1 }
 0x13f   : > { %v1081_v5 = vpop.f32.mrb[17].mxu0  ;;  %v969_v6 = vadd.f32 %v968_v4, %v5960_v38  ;;  %v970_v7 = vpop.f32.mrb[18].mxu1 }
 0x140   : > { %v1083_v8 = vpop.f32.mrb[18].mxu0  ;;  %v1080_v10 = vadd.f32 %v1079_v2, %v967_v3  ;;  %v971_v12 = vadd.f32 %v970_v7, %v5957_v37  ;;  %v972_v15 = vpop.f32.mrb[19].mxu1 }
 0x141   : > { %v1085_v16 = vpop.f32.mrb[19].mxu0  ;;  %v1082_v17 = vadd.f32 %v1081_v5, %v969_v6  ;;  %v973_v18 = vadd.f32 %v972_v15, %v5960_v38 }
 0x142   : > { %v6014_v19 = vmax.f32 %v1080_v10, 0.0  ;;  %v1084_v20 = vadd.f32 %v1083_v8, %v971_v12 }
 0x143   : > { %v6016_v21 = vmax.f32 %v1082_v17, 0.0  ;;  %v1086_v22 = vadd.f32 %v1085_v16, %v973_v18 }
 0x144   : > { %v6018_v23 = vmax.f32 %v1084_v20, 0.0 }
 0x145   : > { %v6020_v24 = vmax.f32 %v1086_v22, 0.0  ;;  %v976_v25 = vpop.f32.mrb[20].mxu1 }
 0x146   : > { %v1089_v26 = vpop.f32.mrb[20].mxu0  ;;  %v977_v27 = vadd.f32 %v976_v25, %v5957_v37  ;;  %v978_v28 = vpop.f32.mrb[21].mxu1 }
 0x147   : > { %v1091_v30 = vpop.f32.mrb[21].mxu0  ;;  %v979_v35 = vadd.f32 %v978_v28, %v5960_v38  ;;  %v980_v41 = vpop.f32.mrb[22].mxu1 }
 0x148   : > { %v1093_v42 = vpop.f32.mrb[22].mxu0  ;;  %v1090_v43 = vadd.f32 %v1089_v26, %v977_v27  ;;  %v981_v44 = vadd.f32 %v980_v41, %v5957_v37  ;;  %v982_v45 = vpop.f32.mrb[23].mxu1 }
 0x149   : > { %v1095_v46 = vpop.f32.mrb[23].mxu0  ;;  %v1092_v47 = vadd.f32 %v1091_v30, %v979_v35  ;;  %v983_v48 = vadd.f32 %v982_v45, %v5960_v38 }
 0x14a   : > { %v6026_v49 = vmax.f32 %v1090_v43, 0.0  ;;  %v1094_v50 = vadd.f32 %v1093_v42, %v981_v44 }
 0x14b   : > { %v6028_v51 = vmax.f32 %v1092_v47, 0.0  ;;  %v1096_v52 = vadd.f32 %v1095_v46, %v983_v48 }
 0x14c   : > { %v6030_v54 = vmax.f32 %v1094_v50, 0.0 }
 0x14d   : > { %v6032_v56 = vmax.f32 %v1096_v52, 0.0  ;;  %v986_v60 = vpop.f32.mrb[24].mxu1 }
 0x14e   : > { %v1099_v62 = vpop.f32.mrb[24].mxu0  ;;  %v987_v1 = vadd.f32 %v986_v60, %v5957_v37  ;;  %v988_v2 = vpop.f32.mrb[25].mxu1 }
 0x14f   : > { %v1101_v3 = vpop.f32.mrb[25].mxu0  ;;  %v989_v4 = vadd.f32 %v988_v2, %v5960_v38  ;;  %v990_v5 = vpop.f32.mrb[26].mxu1 }
 0x150   : > { %v1103_v6 = vpop.f32.mrb[26].mxu0  ;;  %v1100_v7 = vadd.f32 %v1099_v62, %v987_v1  ;;  %v991_v8 = vadd.f32 %v990_v5, %v5957_v37  ;;  %v992_v10 = vpop.f32.mrb[27].mxu1 }
 0x151   : > { %v1105_v12 = vpop.f32.mrb[27].mxu0  ;;  %v1102_v15 = vadd.f32 %v1101_v3, %v989_v4  ;;  %v993_v16 = vadd.f32 %v992_v10, %v5960_v38 }
 0x152   : > { %v6038_v17 = vmax.f32 %v1100_v7, 0.0  ;;  %v1104_v18 = vadd.f32 %v1103_v6, %v991_v8 }
 0x153   : > { %v6040_v20 = vmax.f32 %v1102_v15, 0.0  ;;  %v1106_v22 = vadd.f32 %v1105_v12, %v993_v16 }
 0x154   : > { %v6042_v25 = vmax.f32 %v1104_v18, 0.0 }
 0x155   : > { %v6044_v26 = vmax.f32 %v1106_v22, 0.0  ;;  %v996_v27 = vpop.f32.mrb[28].mxu1 }
 0x156   : > { %v1109_v28 = vpop.f32.mrb[28].mxu0  ;;  %v997_v30 = vadd.f32 %v996_v27, %v5957_v37  ;;  %v998_v35 = vpop.f32.mrb[29].mxu1 }
 0x157   : > { %v1111_v41 = vpop.f32.mrb[29].mxu0  ;;  %v999_v42 = vadd.f32 %v998_v35, %v5960_v38  ;;  %v1000_v43 = vpop.f32.mrb[30].mxu1  ;;  %1153 = sbr.rel (%p4480_p7) target bundleno = 446 (0x1be), region = 52 }
 0x158   : > { %v1113_v44 = vpop.f32.mrb[30].mxu0  ;;  %v1110_v45 = vadd.f32 %v1109_v28, %v997_v30  ;;  %v1001_v46 = vadd.f32 %v1000_v43, %v5957_v37  ;;  %v1002_v47 = vpop.f32.mrb[31].mxu1 }
 0x159   : > { %v1115_v48 = vpop.f32.mrb[31].mxu0  ;;  %v1112_v50 = vadd.f32 %v1111_v41, %v999_v42  ;;  %v1003_v52 = vadd.f32 %v1002_v47, %v5960_v38 }
 0x15a   : > { %v6050_v60 = vmax.f32 %v1110_v45, 0.0  ;;  %v1114_v62 = vadd.f32 %v1113_v44, %v1001_v46 }
 0x15b   : > { %v6052_v1 = vmax.f32 %v1112_v50, 0.0  ;;  %v1116_v2 = vadd.f32 %v1115_v48, %v1003_v52 }
 0x15c   : > { %v6054_v3 = vmax.f32 %v1114_v62, 0.0 }
 0x15d   : > { %v6056_v4 = vmax.f32 %v1116_v2, 0.0 }
 0x15e   : > { %1157 = sbr.rel (%p4481_p8) target bundleno = 357 (0x165), region = 56  ;;  %vm1160_vm0 = vcmp.lt.s32.totalorder (!%p4481_p8), %v7992_v32, 256  ;;  %v5630_v37 = vmov (!%p4481_p8), 0.0  }
 0x15f   : > { %1162 = vst.msk [vmem:[#allocation2] sm:$0x3] (!%p4481_p8), %vm1160_vm0, %v5630_v37  ;;  %1163 = vst.msk [vmem:[#allocation3] sm:$0x3] (!%p4481_p8), %vm1160_vm0, %v5630_v37 }
 0x165 PF: > { %v1165_v38 = vadd.f32 %v5970_v57, %v5966_v53  ;;  %v1186_v5 = vadd.f32 %v5972_v58, %v5968_v55  ;;  %v1232_v22 = vmul.f32 %v5966_v53, %v5966_v53  ;;  %v1234_v27 = vmul.f32 %v5970_v57, %v5970_v57  ;;  %p4482_p9 = scmp.ne.s32.totalorder %s5612_s24, 1 }
 0x166   : > { %v1233_v28 = vmul.f32 %v5968_v55, %v5968_v55  ;;  %v1235_v30 = vmul.f32 %v5972_v58, %v5972_v58  ;;  %v1236_v42 = vmul.f32 %v5978_v9, %v5978_v9  ;;  %v1237_v43 = vmul.f32 %v5980_v11, %v5980_v11 }
 0x167   : > { %v1166_v6 = vadd.f32 %v1165_v38, %v5978_v9  ;;  %v1187_v7 = vadd.f32 %v1186_v5, %v5980_v11  ;;  %v1238_v46 = vmul.f32 %v5982_v13, %v5982_v13  ;;  %v1264_v47 = vadd.f32 %v1234_v27, %v1232_v22 }
 0x168   : > { %v1239_v48 = vmul.f32 %v5984_v14, %v5984_v14  ;;  %v1285_v50 = vadd.f32 %v1235_v30, %v1233_v28  ;;  %v1240_v2 = vmul.f32 %v5990_v29, %v5990_v29  ;;  %v1241_v38 = vmul.f32 %v5992_v31, %v5992_v31 }
 0x169   : > { %v1167_v8 = vadd.f32 %v1166_v6, %v5982_v13  ;;  %v1188_v10 = vadd.f32 %v1187_v7, %v5984_v14  ;;  %v1265_v37 = vadd.f32 %v1264_v47, %v1236_v42  ;;  %v1244_v22 = vmul.f32 %v6002_v59, %v6002_v59 }
 0x16a   : > { %v1286_v5 = vadd.f32 %v1285_v50, %v1237_v43  ;;  %v1245_v28 = vmul.f32 %v6004_v61, %v6004_v61  ;;  %v1246_v42 = vmul.f32 %v6006_v63, %v6006_v63 }
 0x16b   : > { %v1168_v12 = vadd.f32 %v1167_v8, %v5990_v29  ;;  %v1189_v15 = vadd.f32 %v1188_v10, %v5992_v31  ;;  %v1242_v8 = vmul.f32 %v5994_v39, %v5994_v39  ;;  %v1266_v10 = vadd.f32 %v1265_v37, %v1238_v46 }
 0x16d   : > { %v1169_v16 = vadd.f32 %v1168_v12, %v5994_v39  ;;  %v1190_v18 = vadd.f32 %v1189_v15, %v5996_v40  ;;  %v1243_v12 = vmul.f32 %v5996_v40, %v5996_v40  ;;  %v1287_v15 = vadd.f32 %v1286_v5, %v1239_v48 }
 0x16e   : > { %v1267_v27 = vadd.f32 %v1266_v10, %v1240_v2  ;;  %v1248_v48 = vmul.f32 %v6014_v19, %v6014_v19 }
 0x16f   : > { %v1170_v35 = vadd.f32 %v1169_v16, %v6002_v59  ;;  %v1191_v41 = vadd.f32 %v1190_v18, %v6004_v61  ;;  %v1288_v30 = vadd.f32 %v1287_v15, %v1241_v38  ;;  %v1250_v38 = vmul.f32 %v6018_v23, %v6018_v23 }
 0x170   : > { %v1268_v43 = vadd.f32 %v1267_v27, %v1242_v8 }
 0x171   : > { %v1171_v44 = vadd.f32 %v1170_v35, %v6006_v63  ;;  %v1192_v45 = vadd.f32 %v1191_v41, %v6008_v0 }
 0x172   : > { %v1269_v50 = vadd.f32 %v1268_v43, %v1244_v22 }
 0x173   : > { %v1172_v52 = vadd.f32 %v1171_v44, %v6014_v19  ;;  %v1193_v62 = vadd.f32 %v1192_v45, %v6016_v21  ;;  %v1247_v44 = vmul.f32 %v6008_v0, %v6008_v0  ;;  %v1289_v45 = vadd.f32 %v1288_v30, %v1243_v12 }
 0x174   : > { %v1270_v5 = vadd.f32 %v1269_v50, %v1246_v42  ;;  %v1252_v12 = vmul.f32 %v6026_v49, %v6026_v49 }
 0x175   : > { %v1173_v6 = vadd.f32 %v1172_v52, %v6018_v23  ;;  %v1194_v7 = vadd.f32 %v1193_v62, %v6020_v24  ;;  %v1249_v52 = vmul.f32 %v6016_v21, %v6016_v21  ;;  %v1290_v62 = vadd.f32 %v1289_v45, %v1245_v28 }
 0x176   : > { %v1271_v15 = vadd.f32 %v1270_v5, %v1248_v48  ;;  %v1254_v28 = vmul.f32 %v6030_v54, %v6030_v54  ;;  %v1257_v48 = vmul.f32 %v6040_v20, %v6040_v20 }
 0x177   : > { %v1174_v16 = vadd.f32 %v1173_v6, %v6026_v49  ;;  %v1195_v18 = vadd.f32 %v1194_v7, %v6028_v51  ;;  %v1251_v6 = vmul.f32 %v6020_v24, %v6020_v24  ;;  %v1291_v7 = vadd.f32 %v1290_v62, %v1247_v44 }
 0x178   : > { %v1272_v30 = vadd.f32 %v1271_v15, %v1250_v38  ;;  %v1256_v44 = vmul.f32 %v6038_v17, %v6038_v17  ;;  %v1259_v38 = vmul.f32 %v6044_v26, %v6044_v26  ;;  %v1261_v15 = vmul.f32 %v6052_v1, %v6052_v1 }
 0x179   : > { %v1175_v35 = vadd.f32 %v1174_v16, %v6030_v54  ;;  %v1196_v41 = vadd.f32 %v1195_v18, %v6032_v56  ;;  %v1253_v16 = vmul.f32 %v6028_v51, %v6028_v51  ;;  %v1292_v18 = vadd.f32 %v1291_v7, %v1249_v52 }
 0x17a   : > { %v1273_v45 = vadd.f32 %v1272_v30, %v1252_v12  ;;  %v1263_v30 = vmul.f32 %v6056_v4, %v6056_v4 }
 0x17b   : > { %v1176_v46 = vadd.f32 %v1175_v35, %v6038_v17  ;;  %v1197_v47 = vadd.f32 %v1196_v41, %v6040_v20  ;;  %v1255_v35 = vmul.f32 %v6032_v56, %v6032_v56  ;;  %v1293_v41 = vadd.f32 %v1292_v18, %v1251_v6 }
 0x17d   : > { %v1177_v2 = vadd.f32 %v1176_v46, %v6042_v25  ;;  %v1198_v37 = vadd.f32 %v1197_v47, %v6044_v26  ;;  %v5631_v46 = vmov 1966171168   ;;  %v1294_v50 = vadd.f32 %v1293_v41, %v1253_v16 }
 0x17e   : > { %v1211_v47 = vunpack.c.l.s4 %v5631_v46 }
 0x17f   : > { %v1178_v8 = vadd.f32 %v1177_v2, %v6050_v60  ;;  %v1199_v10 = vadd.f32 %v1198_v37, %v6052_v1  ;;  %v1258_v2 = vmul.f32 %v6042_v25, %v6042_v25  ;;  %v1274_v37 = vadd.f32 %v1273_v45, %v1254_v28 }
 0x180   : > { %v1295_v5 = vadd.f32 %v1294_v50, %v1255_v35  ;;  %v1212_v12 = vunpack.c.0.s8 %v1211_v47 }
 0x181   : > { %v1179_v22 = vadd.f32 %v1178_v8, %v6054_v3  ;;  %v1200_v27 = vadd.f32 %v1199_v10, %v6056_v4  ;;  %v1260_v8 = vmul.f32 %v6050_v60, %v6050_v60  ;;  %v1275_v10 = vadd.f32 %v1274_v37, %v1256_v44 }
 0x182   : > { %v1296_v16 = vadd.f32 %v1295_v5, %v1257_v48  ;;  %v1215_v47 = vsub.s32 %v1212_v12, %v5945_v33 }
 0x183   : > { %v1180_v42 = vrot.slane %v1179_v22, 4  ;;  %v1201_v43 = vrot.slane %v1200_v27, 4  ;;  %v1276_v28 = vadd.f32 %v1275_v10, %v1258_v2  ;;  %v1164_v2 = vld [vmem:[#allocation2] sm:$0x3] }
 0x184   : > { %v1297_v35 = vadd.f32 %v1296_v16, %v1259_v38  ;;  %v7997_v38 = vlaneseq }
 0x185   : > { %v1181_v52 = vadd.f32 %v1180_v42, %v1179_v22  ;;  %v1202_v62 = vadd.f32 %v1201_v43, %v1200_v27  ;;  %v1262_v27 = vmul.f32 %v6054_v3, %v6054_v3  ;;  %v1277_v43 = vadd.f32 %v1276_v28, %v1260_v8 }
 0x186   : > { %v1298_v45 = vadd.f32 %v1297_v35, %v1261_v15  ;;  %vm6159_vm1 = vcmp.lt.s32.totalorder %v7997_v38, 256 }
 0x187   : > { %v1182_v6 = vrot.slane %v1181_v52, 2  ;;  %v1203_v7 = vrot.slane %v1202_v62, 2  ;;  %v1278_v50 = vadd.f32 %v1277_v43, %v1262_v27 }
 0x188   : > { %v1299_v48 = vadd.f32 %v1298_v45, %v1263_v30 }
 0x189   : > { %v1183_v18 = vadd.f32 %v1182_v6, %v1181_v52  ;;  %v1204_v22 = vadd.f32 %v1203_v7, %v1202_v62  ;;  %v1279_v62 = vrot.slane %v1278_v50, 4 }
 0x18a   : > { %v1300_v37 = vrot.slane %v1299_v48, 4 }
 0x18b   : > { %v1184_v41 = vrot.slane %v1183_v18, 1  ;;  %v1205_v42 = vrot.slane %v1204_v22, 1  ;;  %v1280_v6 = vadd.f32 %v1279_v62, %v1278_v50 }
 0x18c   : > { %v1301_v7 = vadd.f32 %v1300_v37, %v1299_v48  ;;  %v1336_v37 = vld [vmem:[%s7987_s3] sm:$0x3] (!%p4482_p9) }
 0x18d   : > { %v1185_v44 = vadd.f32 %v1184_v41, %v1183_v18  ;;  %v1206_v46 = vadd.f32 %v1205_v42, %v1204_v22  ;;  %v1281_v32 = vrot.slane %v1280_v6, 2  ;;  %v1231_v42 = vld [vmem:[#allocation3] sm:$0x3] }
 0x18e   : > { %v1302_v8 = vrot.slane %v1301_v7, 2 }
 0x18f   : > { %v1209_v52 = vcombine.low %v1185_v44, %v1206_v46  ;;  %v1282_v18 = vadd.f32 %v1281_v32, %v1280_v6  ;;  %v1341_v6 = vld [vmem:[%s7988_s4] sm:$0x3] (!%p4482_p9) }
 0x190   : > { %v1303_v12 = vadd.f32 %v1302_v8, %v1301_v7 }
 0x191   : > { %v1216_v5 = vrot.slane %v1209_v52, %v1215_v47  ;;  %v1283_v22 = vrot.slane %v1282_v18, 1 }
 0x192   : > { %v1304_v27 = vrot.slane %v1303_v12, 1 }
 0x193   : > { %v1223_v10 = vrot.slane %v1216_v5, %v1215_v47  ;;  %v1284_v28 = vadd.f32 %v1283_v22, %v1282_v18 }
 0x194   : > { %v1305_v30 = vadd.f32 %v1304_v27, %v1303_v12 }
 0x195   : > { %v1225_v15 = vadd.f32 %v1223_v10, %v1164_v2 }
 0x196   : > { %v1308_v35 = vcombine.low %v1284_v28, %v1305_v30 }
 0x197   : > { %1230 = vst.msk [vmem:[#allocation2] sm:$0x3] %vm6159_vm1, %v1225_v15 }
 0x198   : > { %v1315_v41 = vrot.slane %v1308_v35, %v1215_v47  ;;  %1329 = sbr.rel (%p4482_p9) target bundleno = 446 (0x1be), region = 60 }
 0x19a   : > { %v1322_v43 = vrot.slane %v1315_v41, %v1215_v47 }
 0x19c   : > { %v1324_v45 = vadd.f32 %v1322_v43, %v1231_v42 }
 0x19e   : > { %1325 = vst.msk [vmem:[#allocation3] sm:$0x3] %vm6159_vm1, %v1324_v45  ;;  %v1330_v32 = vld [vmem:[#allocation2] sm:$0x3] (!%p4482_p9) }
 0x19f   : > { %v1331_v46 = vmul.f32 0.00390625, %v1330_v32 }
 0x1a1   : > { %v1334_v48 = vmul.f32 %v1331_v46, %v1331_v46 }
 0x1a5   : > { %v1332_v44 = vld [vmem:[#allocation3] sm:$0x3] }
 0x1a6   : > { %v1333_v50 = vmul.f32 0.00390625, %v1332_v44 }
 0x1a8   : > { %v1335_v52 = vsub.f32 %v1333_v50, %v1334_v48 }
 0x1aa   : > { %v1337_v62 = vadd.f32 0.01, %v1335_v52 }
 0x1ac   : > { %5011 = vrsqrt.f32 %v1337_v62 }
 0x1b6   : > { %v5012_v47 = vpop.eup %5011 }
 0x1b7   : > { %v1339_v5 = vmul.f32 %v5012_v47, %v1336_v37 }
 0x1b9   : > { %1340 = vst.msk [vmem:[#allocation4] sm:$0x3] %vm6159_vm1, %v1339_v5  ;;  %v1342_v2 = vmul.f32 %v1339_v5, %v1331_v46 }
 0x1bb   : > { %v1343_v7 = vsub.f32 %v1341_v6, %v1342_v2 }
 0x1bd   : > { %1344 = vst.msk [vmem:[#allocation5] sm:$0x3] %vm6159_vm1, %v1343_v7 }
 0x1be PF: > { %p4483_p10 = scmp.ne.s32.totalorder %s5616_s25, 1 }
 0x1c0   : > { %1348 = sbr.rel (%p4483_p10) target bundleno = 1112 (0x458), region = 64 }
 0x1c7   : > { %v1453_v10 = vld [vmem:[%s7989_s5] sm:$0xff]  ;;  %v1454_v8 = vld [vmem:[%s7989_s5 + $0x8] sm:$0xff] }
 0x1c8   : > { %v1457_v38 = vld [vmem:[%s7989_s5 + $0x20] sm:$0xff]  ;;  %v1458_v18 = vld [vmem:[%s7989_s5 + $0x28] sm:$0xff] }
 0x1c9   : > { %v4485_v15 = vcombine.high %v1453_v10, %v1457_v38  ;;  %v4484_v16 = vcombine.low %v1453_v10, %v1457_v38  ;;  %v1461_v12 = vld [vmem:[%s7989_s5 + $0x40] sm:$0xff]  ;;  %v4487_v27 = vcombine.high %v1454_v8, %v1458_v18  ;;  %v4486_v28 = vcombine.low %v1454_v8, %v1458_v18  ;;  %v1462_v35 = vld [vmem:[%s7989_s5 + $0x48] sm:$0xff] }
 0x1ca   : > { %v1465_v22 = vld [vmem:[%s7989_s5 + $0x60] sm:$0xff]  ;;  %v1466_v41 = vld [vmem:[%s7989_s5 + $0x68] sm:$0xff] }
 0x1cb   : > { %v4493_v30 = vcombine.high %v1461_v12, %v1465_v22  ;;  %v1469_v42 = vld [vmem:[%s7989_s5 + $0x80] sm:$0xff]  ;;  %2263 = vmatprep.subr.bf16.mxu0 %v4485_v15  ;;  %v4495_v43 = vcombine.high %v1462_v35, %v1466_v41  ;;  %v1470_v32 = vld [vmem:[%s7989_s5 + $0x88] sm:$0xff]  ;;  %2376 = vmatprep.subr.bf16.mxu1 %v4487_v27  ;;  %v4492_v46 = vcombine.low %v1461_v12, %v1465_v22 }
 0x1cc   : > { %v1473_v45 = vld [vmem:[%s7989_s5 + $0xa0] sm:$0xff]  ;;  %v1474_v44 = vld [vmem:[%s7989_s5 + $0xa8] sm:$0xff]  ;;  %2264 = vmatpush1.bf16.msra.mxu0 %v4484_v16  ;;  %2377 = vmatpush1.bf16.msra.mxu1 %v4486_v28  ;;  %v4494_v50 = vcombine.low %v1462_v35, %v1466_v41 }
 0x1cd   : > { %2265 = vmatprep.subr.bf16.mxu0 %v4493_v30  ;;  %v4501_v48 = vcombine.high %v1469_v42, %v1473_v45  ;;  %2378 = vmatprep.subr.bf16.mxu1 %v4495_v43  ;;  %v4503_v52 = vcombine.high %v1470_v32, %v1474_v44  ;;  %v1477_v62 = vld [vmem:[%s7989_s5 + $0xc0] sm:$0xff]  ;;  %v1478_v47 = vld [vmem:[%s7989_s5 + $0xc8] sm:$0xff]  ;;  %v4500_v6 = vcombine.low %v1469_v42, %v1473_v45 }
 0x1ce   : > { %v1481_v37 = vld [vmem:[%s7989_s5 + $0xe0] sm:$0xff]  ;;  %v1482_v5 = vld [vmem:[%s7989_s5 + $0xe8] sm:$0xff]  ;;  %v4502_v2 = vcombine.low %v1470_v32, %v1474_v44 }
 0x1cf   : > { %v4509_v7 = vcombine.high %v1477_v62, %v1481_v37  ;;  %v4511_v10 = vcombine.high %v1478_v47, %v1482_v5  ;;  %v1485_v38 = vld [vmem:[%s7989_s5 + $0x100] sm:$0xff]  ;;  %v1486_v15 = vld [vmem:[%s7989_s5 + $0x108] sm:$0xff]  ;;  %v4508_v18 = vcombine.low %v1477_v62, %v1481_v37  ;;  %v4510_v12 = vcombine.low %v1478_v47, %v1482_v5 }
 0x1d0   : > { %2266 = vmatpush1.bf16.msra.mxu0 %v4492_v46  ;;  %2379 = vmatpush1.bf16.msra.mxu1 %v4494_v50  ;;  %v1489_v8 = vld [vmem:[%s7989_s5 + $0x120] sm:$0xff]  ;;  %v1490_v16 = vld [vmem:[%s7989_s5 + $0x128] sm:$0xff] }
 0x1d1   : > { %2267 = vmatprep.subr.bf16.mxu0 %v4501_v48  ;;  %2380 = vmatprep.subr.bf16.mxu1 %v4503_v52  ;;  %v4517_v22 = vcombine.high %v1485_v38, %v1489_v8  ;;  %v4519_v27 = vcombine.high %v1486_v15, %v1490_v16  ;;  %v1493_v28 = vld [vmem:[%s7989_s5 + $0x140] sm:$0xff]  ;;  %v1494_v35 = vld [vmem:[%s7989_s5 + $0x148] sm:$0xff]  ;;  %v4516_v42 = vcombine.low %v1485_v38, %v1489_v8 }
 0x1d2   : > { %v1497_v30 = vld [vmem:[%s7989_s5 + $0x160] sm:$0xff]  ;;  %v1498_v41 = vld [vmem:[%s7989_s5 + $0x168] sm:$0xff]  ;;  %v4518_v43 = vcombine.low %v1486_v15, %v1490_v16 }
 0x1d3   : > { %v4525_v45 = vcombine.high %v1493_v28, %v1497_v30  ;;  %v4527_v32 = vcombine.high %v1494_v35, %v1498_v41  ;;  %v1501_v44 = vld [vmem:[%s7989_s5 + $0x180] sm:$0xff]  ;;  %v1502_v50 = vld [vmem:[%s7989_s5 + $0x188] sm:$0xff]  ;;  %v4524_v52 = vcombine.low %v1493_v28, %v1497_v30  ;;  %v4526_v62 = vcombine.low %v1494_v35, %v1498_v41 }
 0x1d4   : > { %2268 = vmatpush1.bf16.msra.mxu0 %v4500_v6  ;;  %2381 = vmatpush1.bf16.msra.mxu1 %v4502_v2  ;;  %v1505_v46 = vld [vmem:[%s7989_s5 + $0x1a0] sm:$0xff]  ;;  %v1506_v48 = vld [vmem:[%s7989_s5 + $0x1a8] sm:$0xff] }
 0x1d5   : > { %2269 = vmatprep.subr.bf16.mxu0 %v4509_v7  ;;  %2382 = vmatprep.subr.bf16.mxu1 %v4511_v10  ;;  %v4533_v37 = vcombine.high %v1501_v44, %v1505_v46  ;;  %v6263_v47 = vld [vmem:[#allocation4] sm:$0x3]  ;;  %v6265_v5 = vld [vmem:[#allocation5] sm:$0x3]  ;;  %v4535_v6 = vcombine.high %v1502_v50, %v1506_v48  ;;  %v1510_v8 = vld [vmem:[%s7989_s5 + $0x1c8] sm:$0xff]  ;;  %v4532_v16 = vcombine.low %v1501_v44, %v1505_v46 }
 0x1d6   : > { %v1509_v2 = vld [vmem:[%s7989_s5 + $0x1c0] sm:$0xff]  ;;  %v6275_v10 = vrot.slane %v6263_v47, %v5954_v36  ;;  %v6279_v38 = vrot.slane %v6265_v5, %v5954_v36  ;;  %v1514_v15 = vld [vmem:[%s7989_s5 + $0x1e8] sm:$0xff] }
 0x1d7   : > { %v1513_v7 = vld [vmem:[%s7989_s5 + $0x1e0] sm:$0xff]  ;;  %v4543_v28 = vcombine.high %v1510_v8, %v1514_v15 }
 0x1d8   : > { %2270 = vmatpush1.bf16.msra.mxu0 %v4508_v18  ;;  %2383 = vmatpush1.bf16.msra.mxu1 %v4510_v12  ;;  %v1362_v18 = vmul.f32 %v6275_v10, %v5968_v55  ;;  %v1364_v12 = vmul.f32 %v6275_v10, %v5972_v58  ;;  %v1517_v30 = vld [vmem:[%s7989_s5 + $0x200] sm:$0xff]  ;;  %v1518_v58 = vld [vmem:[%s7989_s5 + $0x208] sm:$0xff] }
 0x1d9   : > { %2271 = vmatprep.subr.bf16.mxu0 %v4517_v22  ;;  %2384 = vmatprep.subr.bf16.mxu1 %v4519_v27  ;;  %v4534_v22 = vcombine.low %v1502_v50, %v1506_v48  ;;  %v4541_v27 = vcombine.high %v1509_v2, %v1513_v7  ;;  %v1521_v35 = vld [vmem:[%s7989_s5 + $0x220] sm:$0xff] }
 0x1da   : > { %v1406_v41 = vadd.f32 %v6279_v38, %v1362_v18  ;;  %v1408_v55 = vadd.f32 %v6279_v38, %v1364_v12  ;;  %v4549_v44 = vcombine.high %v1517_v30, %v1521_v35  ;;  %v1525_v50 = vld [vmem:[%s7989_s5 + $0x240] sm:$0xff]  ;;  %v1538_v18 = vld [vmem:[%s7989_s5 + $0x2a8] sm:$0xff] }
 0x1db   : > { %v1529_v48 = vld [vmem:[%s7989_s5 + $0x260] sm:$0xff] }
 0x1dc   : > { %2272 = vmatpush1.bf16.msra.mxu0 %v4516_v42  ;;  %2385 = vmatpush1.bf16.msra.mxu1 %v4518_v43  ;;  %v1522_v42 = vld [vmem:[%s7989_s5 + $0x228] sm:$0xff]  ;;  %v4540_v43 = vcombine.low %v1509_v2, %v1513_v7  ;;  %v4557_v2 = vcombine.high %v1525_v50, %v1529_v48  ;;  %v4556_v12 = vcombine.low %v1525_v50, %v1529_v48 }
 0x1dd   : > { %2273 = vmatprep.subr.bf16.mxu0 %v4525_v45  ;;  %2386 = vmatprep.subr.bf16.mxu1 %v4527_v32  ;;  %v6305_v45 = vpack.c.bf16 %v1408_v55, %v1406_v41  ;;  %v4542_v32 = vcombine.low %v1510_v8, %v1514_v15  ;;  %v4551_v46 = vcombine.high %v1518_v58, %v1522_v42  ;;  %v1533_v8 = vld [vmem:[%s7989_s5 + $0x280] sm:$0xff]  ;;  %v1542_v41 = vld [vmem:[%s7989_s5 + $0x2c8] sm:$0xff] }
 0x1de   : > { %v1537_v15 = vld [vmem:[%s7989_s5 + $0x2a0] sm:$0xff]  ;;  %v1546_v55 = vld [vmem:[%s7989_s5 + $0x2e8] sm:$0xff]  ;;  %v1378_v50 = vmul.f32 %v6275_v10, %v6016_v21 }
 0x1df   : > { %2295 = vmatprep.mubr.bf16.mxu0 %v6305_v45  ;;  %2408 = vmatprep.mubr.bf16.mxu1 %v6305_v45  ;;  %v1550_v48 = vld [vmem:[%s7989_s5 + $0x308] sm:$0xff] }
 0x1e0   : > { %2274 = vmatpush1.bf16.msra.mxu0 %v4524_v52  ;;  %2387 = vmatpush1.bf16.msra.mxu1 %v4526_v62  ;;  %v1526_v52 = vld [vmem:[%s7989_s5 + $0x248] sm:$0xff] }
 0x1e1   : > { %2275 = vmatprep.subr.bf16.mxu0 %v4533_v37  ;;  %2388 = vmatprep.subr.bf16.mxu1 %v4535_v6  ;;  %v1530_v62 = vld [vmem:[%s7989_s5 + $0x268] sm:$0xff]  ;;  %v4548_v37 = vcombine.low %v1517_v30, %v1521_v35  ;;  %v4550_v6 = vcombine.low %v1518_v58, %v1522_v42  ;;  %v1541_v30 = vld [vmem:[%s7989_s5 + $0x2c0] sm:$0xff]  ;;  %v4564_v58 = vcombine.low %v1533_v8, %v1537_v15 }
 0x1e2   : > { %v4559_v7 = vcombine.high %v1526_v52, %v1530_v62  ;;  %v1545_v35 = vld [vmem:[%s7989_s5 + $0x2e0] sm:$0xff] }
 0x1e4   : > { %2276 = vmatpush1.bf16.msra.mxu0 %v4532_v16  ;;  %2389 = vmatpush1.bf16.msra.mxu1 %v4534_v22  ;;  %v1534_v16 = vld [vmem:[%s7989_s5 + $0x288] sm:$0xff]  ;;  %v4558_v22 = vcombine.low %v1526_v52, %v1530_v62  ;;  %v1380_v62 = vmul.f32 %v6275_v10, %v6020_v24  ;;  %v1561_v24 = vld [vmem:[%s7989_s5 + $0x360] sm:$0xff] }
 0x1e5   : > { %2277 = vmatprep.subr.bf16.mxu0 %v4541_v27  ;;  %2390 = vmatprep.subr.bf16.mxu1 %v4543_v28  ;;  %v4565_v27 = vcombine.high %v1533_v8, %v1537_v15  ;;  %v4567_v28 = vcombine.high %v1534_v16, %v1538_v18  ;;  %v4566_v42 = vcombine.low %v1534_v16, %v1538_v18  ;;  %v1554_v52 = vld [vmem:[%s7989_s5 + $0x328] sm:$0xff]  ;;  %v1557_v15 = vld [vmem:[%s7989_s5 + $0x340] sm:$0xff] }
 0x1e6   : > { %v1424_v21 = vadd.f32 %v6279_v38, %v1380_v62  ;;  %v4583_v8 = vcombine.high %v1550_v48, %v1554_v52  ;;  %v1558_v16 = vld [vmem:[%s7989_s5 + $0x348] sm:$0xff] }
 0x1e7   : > { %v1562_v18 = vld [vmem:[%s7989_s5 + $0x368] sm:$0xff] }
 0x1e8   : > { %2278 = vmatpush1.bf16.msra.mxu0 %v4540_v43  ;;  %2391 = vmatpush1.bf16.msra.mxu1 %v4542_v32  ;;  %v4573_v43 = vcombine.high %v1541_v30, %v1545_v35  ;;  %v4575_v32 = vcombine.high %v1542_v41, %v1546_v55 }
 0x1e9   : > { %2279 = vmatprep.subr.bf16.mxu0 %v4549_v44  ;;  %2392 = vmatprep.subr.bf16.mxu1 %v4551_v46  ;;  %v1549_v44 = vld [vmem:[%s7989_s5 + $0x300] sm:$0xff] }
 0x1ea   : > { %v1553_v46 = vld [vmem:[%s7989_s5 + $0x320] sm:$0xff] }
 0x1ec   : > { %2280 = vmatpush1.bf16.msra.mxu0 %v4548_v37  ;;  %2393 = vmatpush1.bf16.msra.mxu1 %v4550_v6  ;;  %v4572_v37 = vcombine.low %v1541_v30, %v1545_v35  ;;  %v1422_v6 = vadd.f32 %v6279_v38, %v1378_v50  ;;  %v4582_v30 = vcombine.low %v1550_v48, %v1554_v52 }
 0x1ed   : > { %2281 = vmatprep.subr.bf16.mxu0 %v4557_v2  ;;  %2394 = vmatprep.subr.bf16.mxu1 %v4559_v7  ;;  %v4574_v2 = vcombine.low %v1542_v41, %v1546_v55  ;;  %v4581_v7 = vcombine.high %v1549_v44, %v1553_v46  ;;  %v4589_v35 = vcombine.high %v1557_v15, %v1561_v24 }
 0x1ee   : > { %v4591_v55 = vcombine.high %v1558_v16, %v1562_v18  ;;  %v1386_v50 = vmul.f32 %v6275_v10, %v6040_v20  ;;  %v1388_v48 = vmul.f32 %v6275_v10, %v6044_v26  ;;  %v4590_v52 = vcombine.low %v1558_v16, %v1562_v18  ;;  %v1574_v26 = vld [vmem:[%s7989_s5 + $0x3c8] sm:$0xff] }
 0x1f0   : > { %2282 = vmatpush1.bf16.msra.mxu0 %v4556_v12  ;;  %2395 = vmatpush1.bf16.msra.mxu1 %v4558_v22  ;;  %v6375_v12 = vpack.c.bf16 %v1424_v21, %v1422_v6  ;;  %v1382_v22 = vmul.f32 %v6275_v10, %v6028_v51  ;;  %v1569_v51 = vld [vmem:[%s7989_s5 + $0x3a0] sm:$0xff]  ;;  %v1432_v20 = vadd.f32 %v6279_v38, %v1388_v48 }
 0x1f1   : > { %2283 = vmatprep.subr.bf16.mxu0 %v4565_v27  ;;  %2396 = vmatprep.subr.bf16.mxu1 %v4567_v28  ;;  %v4580_v27 = vcombine.low %v1549_v44, %v1553_v46  ;;  %v1384_v28 = vmul.f32 %v6275_v10, %v6032_v56  ;;  %v1566_v56 = vld [vmem:[%s7989_s5 + $0x388] sm:$0xff]  ;;  %v4588_v44 = vcombine.low %v1557_v15, %v1561_v24  ;;  %v1577_v6 = vld [vmem:[%s7989_s5 + $0x3e0] sm:$0xff] }
 0x1f2   : > { %v1426_v41 = vadd.f32 %v6279_v38, %v1382_v22  ;;  %v6425_v15 = vrot.slane %v6265_v5, %v5948_v34  ;;  %v1455_v5 = vld [vmem:[%s7989_s5 + $0x10] sm:$0xff] }
 0x1f4   : > { %2284 = vmatpush1.bf16.msra.mxu0 %v4564_v58  ;;  %2397 = vmatpush1.bf16.msra.mxu1 %v4566_v42  ;;  %v1565_v58 = vld [vmem:[%s7989_s5 + $0x380] sm:$0xff]  ;;  %v1428_v42 = vadd.f32 %v6279_v38, %v1384_v28  ;;  %v1459_v28 = vld [vmem:[%s7989_s5 + $0x30] sm:$0xff] }
 0x1f5   : > { %2285 = vmatprep.subr.bf16.mxu0 %v4573_v43  ;;  %2398 = vmatprep.subr.bf16.mxu1 %v4575_v32  ;;  %v1570_v43 = vld [vmem:[%s7989_s5 + $0x3a8] sm:$0xff]  ;;  %v6397_v32 = vrot.slane %v6263_v47, %v5948_v34  ;;  %v4597_v62 = vcombine.high %v1565_v58, %v1569_v51  ;;  %v1573_v47 = vld [vmem:[%s7989_s5 + $0x3c0] sm:$0xff]  ;;  %v4596_v24 = vcombine.low %v1565_v58, %v1569_v51 }
 0x1f6   : > { %v6399_v46 = vpack.c.bf16 %v1428_v42, %v1426_v41  ;;  %v4598_v16 = vcombine.low %v1566_v56, %v1570_v43  ;;  %v4605_v22 = vcombine.high %v1573_v47, %v1577_v6  ;;  %v1456_v41 = vld [vmem:[%s7989_s5 + $0x18] sm:$0xff]  ;;  %v4489_v42 = vcombine.high %v1455_v5, %v1459_v28 }
 0x1f7   : > { %v1361_v21 = vmul.f32 %v6397_v32, %v5966_v53  ;;  %v1392_v53 = vmul.f32 %v6275_v10, %v6056_v4 }
 0x1f8   : > { %2286 = vmatpush1.bf16.msra.mxu0 %v4572_v37  ;;  %2399 = vmatpush1.bf16.msra.mxu1 %v4574_v2  ;;  %v4599_v37 = vcombine.high %v1566_v56, %v1570_v43  ;;  %v1430_v2 = vadd.f32 %v6279_v38, %v1386_v50  ;;  %v1467_v50 = vld [vmem:[%s7989_s5 + $0x70] sm:$0xff] }
 0x1f9   : > { %2287 = vmatprep.subr.bf16.mxu0 %v4581_v7  ;;  %2400 = vmatprep.subr.bf16.mxu1 %v4583_v8  ;;  %v1578_v7 = vld [vmem:[%s7989_s5 + $0x3e8] sm:$0xff]  ;;  %v1363_v8 = vmul.f32 %v6397_v32, %v5970_v57  ;;  %v1436_v51 = vadd.f32 %v6279_v38, %v1392_v53  ;;  %v1472_v53 = vld [vmem:[%s7989_s5 + $0x98] sm:$0xff] }
 0x1fa   : > { %v6427_v18 = vpack.c.bf16 %v1432_v20, %v1430_v2  ;;  %v4607_v57 = vcombine.high %v1574_v26, %v1578_v7  ;;  %v1367_v2 = vmul.f32 %v6397_v32, %v5982_v13  ;;  %v4488_v20 = vcombine.low %v1455_v5, %v1459_v28 }
 0x1fb   : > { %v1407_v4 = vadd.f32 %v6425_v15, %v1363_v8  ;;  %v1370_v13 = vmul.f32 %v6275_v10, %v5992_v31 }
 0x1fc   : > { %2288 = vmatpush1.bf16.msra.mxu0 %v4580_v27  ;;  %2401 = vmatpush1.bf16.msra.mxu1 %v4582_v30  ;;  %v1390_v27 = vmul.f32 %v6275_v10, %v6052_v1  ;;  %v1366_v30 = vmul.f32 %v6275_v10, %v5980_v11  ;;  %v1405_v1 = vadd.f32 %v6425_v15, %v1361_v21 }
 0x1fd   : > { %2289 = vmatprep.subr.bf16.mxu0 %v4589_v35  ;;  %2402 = vmatprep.subr.bf16.mxu1 %v4591_v55  ;;  %v1368_v35 = vmul.f32 %v6275_v10, %v5984_v14  ;;  %v1460_v55 = vld [vmem:[%s7989_s5 + $0x38] sm:$0xff]  ;;  %v4604_v11 = vcombine.low %v1573_v47, %v1577_v6  ;;  %v4606_v14 = vcombine.low %v1574_v26, %v1578_v7 }
 0x1fe   : > { %v1434_v58 = vadd.f32 %v6279_v38, %v1390_v27  ;;  %v4491_v43 = vcombine.high %v1456_v41, %v1460_v55  ;;  %v1410_v48 = vadd.f32 %v6279_v38, %v1366_v30  ;;  %v1468_v47 = vld [vmem:[%s7989_s5 + $0x78] sm:$0xff]  ;;  %v1365_v6 = vmul.f32 %v6397_v32, %v5978_v9  ;;  %v1475_v9 = vld [vmem:[%s7989_s5 + $0xb0] sm:$0xff] }
 0x1ff   : > { %v4490_v26 = vcombine.low %v1456_v41, %v1460_v55  ;;  %v1411_v27 = vadd.f32 %v6425_v15, %v1367_v2  ;;  %v1479_v30 = vld [vmem:[%s7989_s5 + $0xd0] sm:$0xff]  ;;  %v1480_v55 = vld [vmem:[%s7989_s5 + $0xd8] sm:$0xff] }
 0x200   : > { %2290 = vmatpush1.bf16.msra.mxu0 %v4588_v44  ;;  %2403 = vmatpush1.bf16.msra.mxu1 %v4590_v52  ;;  %v6453_v56 = vpack.c.bf16 %v1436_v51, %v1434_v58  ;;  %v1463_v44 = vld [vmem:[%s7989_s5 + $0x50] sm:$0xff]  ;;  %v1412_v52 = vadd.f32 %v6279_v38, %v1368_v35  ;;  %v1484_v58 = vld [vmem:[%s7989_s5 + $0xf8] sm:$0xff]  ;;  %v1369_v51 = vmul.f32 %v6397_v32, %v5990_v29 }
 0x201   : > { %2291 = vmatprep.subr.bf16.mxu0 %v4597_v62  ;;  %2404 = vmatprep.subr.bf16.mxu1 %v4599_v37  ;;  %v6463_v62 = vpack.c.bf16 %v1407_v4, %v1405_v1  ;;  %v1464_v37 = vld [vmem:[%s7989_s5 + $0x58] sm:$0xff]  ;;  %v4497_v7 = vcombine.high %v1463_v44, %v1467_v50  ;;  %v4496_v31 = vcombine.low %v1463_v44, %v1467_v50  ;;  %v1483_v35 = vld [vmem:[%s7989_s5 + $0xf0] sm:$0xff] }
 0x202   : > { %v4499_v21 = vcombine.high %v1464_v37, %v1468_v47  ;;  %v6475_v8 = vpack.c.bf16 %v1412_v52, %v1410_v48  ;;  %v1414_v1 = vadd.f32 %v6279_v38, %v1370_v13  ;;  %v4515_v44 = vcombine.high %v1480_v55, %v1484_v58  ;;  %v1487_v48 = vld [vmem:[%s7989_s5 + $0x110] sm:$0xff]  ;;  %v1492_v2 = vld [vmem:[%s7989_s5 + $0x138] sm:$0xff] }
 0x203   : > { %v1491_v29 = vld [vmem:[%s7989_s5 + $0x130] sm:$0xff]  ;;  %v1376_v52 = vmul.f32 %v6275_v10, %v6008_v0  ;;  %v4514_v0 = vcombine.low %v1480_v55, %v1484_v58  ;;  %v1496_v13 = vld [vmem:[%s7989_s5 + $0x158] sm:$0xff] }
 0x204   : > { %2292 = vmatpush1.bf16.msra.mxu0 %v4596_v24  ;;  %2405 = vmatpush1.bf16.msra.mxu1 %v4598_v16  ;;  %v1471_v24 = vld [vmem:[%s7989_s5 + $0x90] sm:$0xff]  ;;  %v1372_v16 = vmul.f32 %v6275_v10, %v5996_v40  ;;  %v4498_v40 = vcombine.low %v1464_v37, %v1468_v47  ;;  %v1413_v37 = vadd.f32 %v6425_v15, %v1369_v51 }
 0x205   : > { %2293 = vmatprep.subr.bf16.mxu0 %v4605_v22  ;;  %2406 = vmatprep.subr.bf16.mxu1 %v4607_v57  ;;  %v1409_v22 = vadd.f32 %v6425_v15, %v1365_v6  ;;  %v1476_v57 = vld [vmem:[%s7989_s5 + $0xb8] sm:$0xff]  ;;  %v4505_v5 = vcombine.high %v1471_v24, %v1475_v9  ;;  %v1511_v51 = vld [vmem:[%s7989_s5 + $0x1d0] sm:$0xff] }
 0x206   : > { %v4507_v28 = vcombine.high %v1472_v53, %v1476_v57  ;;  %v1416_v4 = vadd.f32 %v6279_v38, %v1372_v16  ;;  %v1488_v6 = vld [vmem:[%s7989_s5 + $0x118] sm:$0xff] }
 0x207   : > { %v6506_v41 = vpack.c.bf16 %v1411_v27, %v1409_v22  ;;  %v1500_v16 = vld [vmem:[%s7989_s5 + $0x178] sm:$0xff]  ;;  %v1373_v22 = vmul.f32 %v6397_v32, %v6002_v59  ;;  %v1375_v27 = vmul.f32 %v6397_v32, %v6006_v63  ;;  %v1507_v59 = vld [vmem:[%s7989_s5 + $0x1b0] sm:$0xff] }
 0x208   : > { %2294 = vmatpush1.bf16.msra.mxu0 %v4604_v11  ;;  %2407 = vmatpush1.bf16.msra.mxu1 %v4606_v14  ;;  %v1371_v11 = vmul.f32 %v6397_v32, %v5994_v39  ;;  %v4504_v14 = vcombine.low %v1471_v24, %v1475_v9  ;;  %v6519_v50 = vpack.c.bf16 %v1416_v4, %v1414_v1 }
 0x209   : > { %2489 = vmatprep.subr.bf16.mxu0 %v4489_v42  ;;  %2602 = vmatprep.subr.bf16.mxu1 %v4491_v43  ;;  %v4506_v42 = vcombine.low %v1472_v53, %v1476_v57  ;;  %v4513_v43 = vcombine.high %v1479_v30, %v1483_v35  ;;  %v1374_v39 = vmul.f32 %v6275_v10, %v6004_v61 }
 0x20a   : > { %v1415_v47 = vadd.f32 %v6425_v15, %v1371_v11  ;;  %v4512_v61 = vcombine.low %v1479_v30, %v1483_v35  ;;  %v4521_v10 = vcombine.high %v1487_v48, %v1491_v29  ;;  %v1420_v24 = vadd.f32 %v6279_v38, %v1376_v52  ;;  %v1504_v30 = vld [vmem:[%s7989_s5 + $0x198] sm:$0xff]  ;;  %v1515_v11 = vld [vmem:[%s7989_s5 + $0x1f0] sm:$0xff] }
 0x20b   : > { %2296 = vmatmul.mubr.bf16.vlgmr.msra.gmra.mrb[0].mxu0 %v6463_v62  ;;  %2409 = vmatmul.mubr.bf16.vlgmr.msra.gmra.mrb[0].mxu1 %v6463_v62  ;;  %v4522_v53 = vcombine.low %v1488_v6, %v1492_v2  ;;  %v1417_v63 = vadd.f32 %v6425_v15, %v1373_v22  ;;  %v1508_v35 = vld [vmem:[%s7989_s5 + $0x1b8] sm:$0xff]  ;;  %v4530_v4 = vcombine.low %v1496_v13, %v1500_v16 }
 0x20c   : > { %2490 = vmatpush1.bf16.msra.mxu0 %v4488_v20  ;;  %2603 = vmatpush1.bf16.msra.mxu1 %v4490_v26  ;;  %v4523_v20 = vcombine.high %v1488_v6, %v1492_v2  ;;  %v1495_v26 = vld [vmem:[%s7989_s5 + $0x150] sm:$0xff]  ;;  %v6550_v9 = vpack.c.bf16 %v1415_v47, %v1413_v37  ;;  %v4539_v58 = vcombine.high %v1504_v30, %v1508_v35  ;;  %v1520_v2 = vld [vmem:[%s7989_s5 + $0x218] sm:$0xff] }
 0x20d   : > { %2491 = vmatprep.subr.bf16.mxu0 %v4497_v7  ;;  %2604 = vmatprep.subr.bf16.mxu1 %v4499_v21  ;;  %v1499_v7 = vld [vmem:[%s7989_s5 + $0x170] sm:$0xff]  ;;  %v1418_v21 = vadd.f32 %v6279_v38, %v1374_v39  ;;  %v4520_v38 = vcombine.low %v1487_v48, %v1491_v29  ;;  %v1379_v48 = vmul.f32 %v6397_v32, %v6018_v23 }
 0x20e   : > { %2305 = vmatprep.mubr.bf16.mxu0 %v6475_v8  ;;  %2418 = vmatprep.mubr.bf16.mxu1 %v6475_v8  ;;  %v4529_v57 = vcombine.high %v1495_v26, %v1499_v7  ;;  %v4528_v1 = vcombine.low %v1495_v26, %v1499_v7  ;;  %v4538_v39 = vcombine.low %v1504_v30, %v1508_v35  ;;  %v1519_v47 = vld [vmem:[%s7989_s5 + $0x210] sm:$0xff] }
 0x20f   : > { %v4545_v52 = vcombine.high %v1511_v51, %v1515_v11  ;;  %v1523_v6 = vld [vmem:[%s7989_s5 + $0x230] sm:$0xff]  ;;  %v1423_v23 = vadd.f32 %v6425_v15, %v1379_v48  ;;  %v1381_v22 = vmul.f32 %v6397_v32, %v6026_v49 }
 0x210   : > { %2492 = vmatpush1.bf16.msra.mxu0 %v4496_v31  ;;  %2605 = vmatpush1.bf16.msra.mxu1 %v4498_v40  ;;  %v4531_v31 = vcombine.high %v1496_v13, %v1500_v16  ;;  %v6563_v40 = vpack.c.bf16 %v1420_v24, %v1418_v21  ;;  %v1527_v7 = vld [vmem:[%s7989_s5 + $0x250] sm:$0xff]  ;;  %v1528_v13 = vld [vmem:[%s7989_s5 + $0x258] sm:$0xff] }
 0x211   : > { %2493 = vmatprep.subr.bf16.mxu0 %v4505_v5  ;;  %2606 = vmatprep.subr.bf16.mxu1 %v4507_v28  ;;  %v1503_v5 = vld [vmem:[%s7989_s5 + $0x190] sm:$0xff]  ;;  %v1419_v28 = vadd.f32 %v6425_v15, %v1375_v27  ;;  %v1532_v16 = vld [vmem:[%s7989_s5 + $0x278] sm:$0xff]  ;;  %v1383_v27 = vmul.f32 %v6397_v32, %v6030_v54  ;;  %v1425_v49 = vadd.f32 %v6425_v15, %v1381_v22 }
 0x212   : > { %v4537_v55 = vcombine.high %v1503_v5, %v1507_v59  ;;  %v4536_v29 = vcombine.low %v1503_v5, %v1507_v59  ;;  %v1531_v21 = vld [vmem:[%s7989_s5 + $0x270] sm:$0xff]  ;;  %v4562_v35 = vcombine.low %v1528_v13, %v1532_v16 }
 0x213   : > { %2306 = vmatmul.mubr.bf16.gmra.mrb[4].mxu0 %v6506_v41  ;;  %2419 = vmatmul.mubr.bf16.gmra.mrb[4].mxu1 %v6506_v41  ;;  %v1535_v5 = vld [vmem:[%s7989_s5 + $0x290] sm:$0xff]  ;;  %v1427_v54 = vadd.f32 %v6425_v15, %v1383_v27  ;;  %v4560_v30 = vcombine.low %v1527_v7, %v1531_v21 }
 0x214   : > { %2494 = vmatpush1.bf16.msra.mxu0 %v4504_v14  ;;  %2607 = vmatpush1.bf16.msra.mxu1 %v4506_v42  ;;  %v6588_v14 = vpack.c.bf16 %v1419_v28, %v1417_v63  ;;  %v1512_v42 = vld [vmem:[%s7989_s5 + $0x1d8] sm:$0xff]  ;;  %v1539_v59 = vld [vmem:[%s7989_s5 + $0x2b0] sm:$0xff] }
 0x215   : > { %2495 = vmatprep.subr.bf16.mxu0 %v4513_v43  ;;  %2608 = vmatprep.subr.bf16.mxu1 %v4515_v44  ;;  %v1516_v43 = vld [vmem:[%s7989_s5 + $0x1f8] sm:$0xff]  ;;  %v1377_v44 = vmul.f32 %v6397_v32, %v6014_v19  ;;  %v4568_v48 = vcombine.low %v1535_v5, %v1539_v59 }
 0x216   : > { %2315 = vmatprep.mubr.bf16.mxu0 %v6519_v50  ;;  %2428 = vmatprep.mubr.bf16.mxu1 %v6519_v50  ;;  %v4547_v37 = vcombine.high %v1512_v42, %v1516_v43  ;;  %v1536_v63 = vld [vmem:[%s7989_s5 + $0x298] sm:$0xff] }
 0x217   : > { %v1421_v19 = vadd.f32 %v6425_v15, %v1377_v44  ;;  %v1540_v28 = vld [vmem:[%s7989_s5 + $0x2b8] sm:$0xff]  ;;  %v1387_v44 = vmul.f32 %v6397_v32, %v6042_v25 }
 0x218   : > { %2496 = vmatpush1.bf16.msra.mxu0 %v4512_v61  ;;  %2609 = vmatpush1.bf16.msra.mxu1 %v4514_v0  ;;  %v1524_v61 = vld [vmem:[%s7989_s5 + $0x238] sm:$0xff]  ;;  %v4544_v0 = vcombine.low %v1511_v51, %v1515_v11  ;;  %v6660_v51 = vpack.c.bf16 %v1427_v54, %v1425_v49 }
 0x219   : > { %2497 = vmatprep.subr.bf16.mxu0 %v4521_v10  ;;  %2610 = vmatprep.subr.bf16.mxu1 %v4523_v20  ;;  %v4546_v10 = vcombine.low %v1512_v42, %v1516_v43  ;;  %v4553_v20 = vcombine.high %v1519_v47, %v1523_v6  ;;  %v4555_v26 = vcombine.high %v1520_v2, %v1524_v61  ;;  %v1544_v11 = vld [vmem:[%s7989_s5 + $0x2d8] sm:$0xff] }
 0x21a   : > { %v6624_v24 = vpack.c.bf16 %v1423_v23, %v1421_v19  ;;  %v1548_v42 = vld [vmem:[%s7989_s5 + $0x2f8] sm:$0xff]  ;;  %v1385_v43 = vmul.f32 %v6397_v32, %v6038_v17  ;;  %v1431_v25 = vadd.f32 %v6425_v15, %v1387_v44 }
 0x21b   : > { %2316 = vmatmul.mubr.bf16.gmra.mrb[8].mxu0 %v6550_v9  ;;  %2429 = vmatmul.mubr.bf16.gmra.mrb[8].mxu1 %v6550_v9  ;;  %v1556_v19 = vld [vmem:[%s7989_s5 + $0x338] sm:$0xff] }
 0x21c   : > { %2498 = vmatpush1.bf16.msra.mxu0 %v4520_v38  ;;  %2611 = vmatpush1.bf16.msra.mxu1 %v4522_v53  ;;  %v4552_v38 = vcombine.low %v1519_v47, %v1523_v6  ;;  %v4554_v53 = vcombine.low %v1520_v2, %v1524_v61  ;;  %v1555_v47 = vld [vmem:[%s7989_s5 + $0x330] sm:$0xff]  ;;  %v1429_v17 = vadd.f32 %v6425_v15, %v1385_v43  ;;  %v1552_v6 = vld [vmem:[%s7989_s5 + $0x318] sm:$0xff] }
 0x21d   : > { %2499 = vmatprep.subr.bf16.mxu0 %v4529_v57  ;;  %2612 = vmatprep.subr.bf16.mxu1 %v4531_v31  ;;  %v4561_v57 = vcombine.high %v1527_v7, %v1531_v21  ;;  %v4563_v31 = vcombine.high %v1528_v13, %v1532_v16  ;;  %v4578_v2 = vcombine.low %v1544_v11, %v1548_v42  ;;  %v1560_v7 = vld [vmem:[%s7989_s5 + $0x358] sm:$0xff] }
 0x21e   : > { %2325 = vmatprep.mubr.bf16.mxu0 %v6563_v40  ;;  %2438 = vmatprep.mubr.bf16.mxu1 %v6563_v40  ;;  %v1564_v21 = vld [vmem:[%s7989_s5 + $0x378] sm:$0xff]  ;;  %v1389_v13 = vmul.f32 %v6397_v32, %v6050_v60  ;;  %v1391_v16 = vmul.f32 %v6397_v32, %v6054_v3  ;;  %v4586_v27 = vcombine.low %v1552_v6, %v1556_v19 }
 0x21f   : > { %v1568_v32 = vld [vmem:[%s7989_s5 + $0x398] sm:$0xff]  ;;  %v4594_v49 = vcombine.low %v1560_v7, %v1564_v21 }
 0x220   : > { %2500 = vmatpush1.bf16.msra.mxu0 %v4528_v1  ;;  %2613 = vmatpush1.bf16.msra.mxu1 %v4530_v4  ;;  %v4569_v1 = vcombine.high %v1535_v5, %v1539_v59  ;;  %v4571_v4 = vcombine.high %v1536_v63, %v1540_v28  ;;  %v1433_v60 = vadd.f32 %v6425_v15, %v1389_v13  ;;  %v1572_v5 = vld [vmem:[%s7989_s5 + $0x3b8] sm:$0xff] }
 0x221   : > { %2501 = vmatprep.subr.bf16.mxu0 %v4537_v55  ;;  %2614 = vmatprep.subr.bf16.mxu1 %v4539_v58  ;;  %v1543_v55 = vld [vmem:[%s7989_s5 + $0x2d0] sm:$0xff]  ;;  %v1435_v3 = vadd.f32 %v6425_v15, %v1391_v16  ;;  %v4603_v15 = vcombine.high %v1568_v32, %v1572_v5 }
 0x222   : > { %v1547_v58 = vld [vmem:[%s7989_s5 + $0x2f0] sm:$0xff] }
 0x223   : > { %2326 = vmatmul.mubr.bf16.gmra.mrb[12].mxu0 %v6588_v14  ;;  %2439 = vmatmul.mubr.bf16.gmra.mrb[12].mxu1 %v6588_v14  ;;  %v4576_v23 = vcombine.low %v1543_v55, %v1547_v58 }
 0x224   : > { %2502 = vmatpush1.bf16.msra.mxu0 %v4536_v29  ;;  %2615 = vmatpush1.bf16.msra.mxu1 %v4538_v39  ;;  %v4570_v29 = vcombine.low %v1536_v63, %v1540_v28  ;;  %v4577_v39 = vcombine.high %v1543_v55, %v1547_v58  ;;  %v1575_v63 = vld [vmem:[%s7989_s5 + $0x3d0] sm:$0xff]  ;;  %v4602_v55 = vcombine.low %v1568_v32, %v1572_v5 }
 0x225   : > { %2503 = vmatprep.subr.bf16.mxu0 %v4545_v52  ;;  %2616 = vmatprep.subr.bf16.mxu1 %v4547_v37  ;;  %v4579_v52 = vcombine.high %v1544_v11, %v1548_v42  ;;  %v1551_v37 = vld [vmem:[%s7989_s5 + $0x310] sm:$0xff] }
 0x226   : > { %2335 = vmatprep.mubr.bf16.mxu0 %v6375_v12  ;;  %2448 = vmatprep.mubr.bf16.mxu1 %v6375_v12  ;;  %v4585_v61 = vcombine.high %v1551_v37, %v1555_v47  ;;  %v4584_v22 = vcombine.low %v1551_v37, %v1555_v47  ;;  %v1579_v28 = vld [vmem:[%s7989_s5 + $0x3f0] sm:$0xff] }
 0x227   : > { %v4609_v58 = vcombine.high %v1575_v63, %v1579_v28  ;;  %v4608_v42 = vcombine.low %v1575_v63, %v1579_v28 }
 0x228   : > { %2504 = vmatpush1.bf16.msra.mxu0 %v4544_v0  ;;  %2617 = vmatpush1.bf16.msra.mxu1 %v4546_v10  ;;  %v4587_v0 = vcombine.high %v1552_v6, %v1556_v19  ;;  %v1559_v10 = vld [vmem:[%s7989_s5 + $0x350] sm:$0xff] }
 0x229   : > { %2505 = vmatprep.subr.bf16.mxu0 %v4553_v20  ;;  %2618 = vmatprep.subr.bf16.mxu1 %v4555_v26  ;;  %v1563_v20 = vld [vmem:[%s7989_s5 + $0x370] sm:$0xff]  ;;  %v6696_v26 = vpack.c.bf16 %v1431_v25, %v1429_v17 }
 0x22a   : > { %v4592_v59 = vcombine.low %v1559_v10, %v1563_v20 }
 0x22b   : > { %2336 = vmatmul.mubr.bf16.gmra.mrb[16].mxu0 %v6624_v24  ;;  %2449 = vmatmul.mubr.bf16.gmra.mrb[16].mxu1 %v6624_v24 }
 0x22c   : > { %2506 = vmatpush1.bf16.msra.mxu0 %v4552_v38  ;;  %2619 = vmatpush1.bf16.msra.mxu1 %v4554_v53  ;;  %v4593_v38 = vcombine.high %v1559_v10, %v1563_v20  ;;  %v4595_v53 = vcombine.high %v1560_v7, %v1564_v21 }
 0x22d   : > { %2507 = vmatprep.subr.bf16.mxu0 %v4561_v57  ;;  %2620 = vmatprep.subr.bf16.mxu1 %v4563_v31  ;;  %v1567_v57 = vld [vmem:[%s7989_s5 + $0x390] sm:$0xff] }
 0x22e   : > { %2345 = vmatprep.mubr.bf16.mxu0 %v6399_v46  ;;  %2458 = vmatprep.mubr.bf16.mxu1 %v6399_v46  ;;  %v1571_v31 = vld [vmem:[%s7989_s5 + $0x3b0] sm:$0xff] }
 0x22f   : > { %v4601_v54 = vcombine.high %v1567_v57, %v1571_v31 }
 0x230   : > { %2508 = vmatpush1.bf16.msra.mxu0 %v4560_v30  ;;  %2621 = vmatpush1.bf16.msra.mxu1 %v4562_v35  ;;  %v1451_v30 = vpack.c.bf16 %v1435_v3, %v1433_v60  ;;  %v1576_v35 = vld [vmem:[%s7989_s5 + $0x3d8] sm:$0xff] }
 0x231   : > { %2509 = vmatprep.subr.bf16.mxu0 %v4569_v1  ;;  %2622 = vmatprep.subr.bf16.mxu1 %v4571_v4  ;;  %v1580_v1 = vld [vmem:[%s7989_s5 + $0x3f8] sm:$0xff]  ;;  %v4600_v4 = vcombine.low %v1567_v57, %v1571_v31 }
 0x232   : > { %v4611_v11 = vcombine.high %v1576_v35, %v1580_v1  ;;  %v4610_v43 = vcombine.low %v1576_v35, %v1580_v1 }
 0x233   : > { %2346 = vmatmul.mubr.bf16.gmra.mrb[20].mxu0 %v6660_v51  ;;  %2459 = vmatmul.mubr.bf16.gmra.mrb[20].mxu1 %v6660_v51 }
 0x234   : > { %2510 = vmatpush1.bf16.msra.mxu0 %v4568_v48  ;;  %2623 = vmatpush1.bf16.msra.mxu1 %v4570_v29 }
 0x235   : > { %2511 = vmatprep.subr.bf16.mxu0 %v4577_v39  ;;  %2624 = vmatprep.subr.bf16.mxu1 %v4579_v52 }
 0x236   : > { %2355 = vmatprep.mubr.bf16.mxu0 %v6427_v18  ;;  %2468 = vmatprep.mubr.bf16.mxu1 %v6427_v18 }
 0x238   : > { %2512 = vmatpush1.bf16.msra.mxu0 %v4576_v23  ;;  %2625 = vmatpush1.bf16.msra.mxu1 %v4578_v2 }
 0x239   : > { %2513 = vmatprep.subr.bf16.mxu0 %v4585_v61  ;;  %2626 = vmatprep.subr.bf16.mxu1 %v4587_v0 }
 0x23b   : > { %2356 = vmatmul.mubr.bf16.gmra.mrb[24].mxu0 %v6696_v26  ;;  %2469 = vmatmul.mubr.bf16.gmra.mrb[24].mxu1 %v6696_v26 }
 0x23c   : > { %2514 = vmatpush1.bf16.msra.mxu0 %v4584_v22  ;;  %2627 = vmatpush1.bf16.msra.mxu1 %v4586_v27 }
 0x23d   : > { %2515 = vmatprep.subr.bf16.mxu0 %v4593_v38  ;;  %2628 = vmatprep.subr.bf16.mxu1 %v4595_v53 }
 0x23e   : > { %2365 = vmatprep.mubr.bf16.mxu0 %v6453_v56  ;;  %2478 = vmatprep.mubr.bf16.mxu1 %v6453_v56 }
 0x240   : > { %2516 = vmatpush1.bf16.msra.mxu0 %v4592_v59  ;;  %2629 = vmatpush1.bf16.msra.mxu1 %v4594_v49 }
 0x241   : > { %2517 = vmatprep.subr.bf16.mxu0 %v4601_v54  ;;  %2630 = vmatprep.subr.bf16.mxu1 %v4603_v15 }
 0x243   : > { %2366 = vmatmul.mubr.bf16.gmra.mrb[28].mxu0 %v1451_v30  ;;  %2479 = vmatmul.mubr.bf16.gmra.mrb[28].mxu1 %v1451_v30 }
 0x244   : > { %2518 = vmatpush1.bf16.msra.mxu0 %v4600_v4  ;;  %2631 = vmatpush1.bf16.msra.mxu1 %v4602_v55 }
 0x245   : > { %2519 = vmatprep.subr.bf16.mxu0 %v4609_v58  ;;  %2632 = vmatprep.subr.bf16.mxu1 %v4611_v11 }
 0x246   : > { %2521 = vmatprep.mubr.bf16.mxu0 %v6305_v45  ;;  %2634 = vmatprep.mubr.bf16.mxu1 %v6305_v45  ;;  %v1581_v45 = vld [vmem:[%s7990_s6] sm:$0xff] }
 0x248   : > { %2520 = vmatpush1.bf16.msra.mxu0 %v4608_v42  ;;  %2633 = vmatpush1.bf16.msra.mxu1 %v4610_v43 }
 0x24b   : > { %2522 = vmatmul.mubr.bf16.vlgmr.msra.gmra.mrb[32].mxu0 %v6463_v62  ;;  %2635 = vmatmul.mubr.bf16.vlgmr.msra.gmra.mrb[32].mxu1 %v6463_v62  ;;  %v6778_v62 = vrot.slane %v1581_v45, %v5954_v36 }
 0x24c   : > { %2531 = vmatprep.mubr.bf16.mxu0 %v6475_v8  ;;  %2644 = vmatprep.mubr.bf16.mxu1 %v6475_v8 }
 0x253   : > { %2532 = vmatmul.mubr.bf16.gmra.mrb[36].mxu0 %v6506_v41  ;;  %2645 = vmatmul.mubr.bf16.gmra.mrb[36].mxu1 %v6506_v41 }
 0x254   : > { %2541 = vmatprep.mubr.bf16.mxu0 %v6519_v50  ;;  %2654 = vmatprep.mubr.bf16.mxu1 %v6519_v50 }
 0x25b   : > { %2542 = vmatmul.mubr.bf16.gmra.mrb[40].mxu0 %v6550_v9  ;;  %2655 = vmatmul.mubr.bf16.gmra.mrb[40].mxu1 %v6550_v9 }
 0x25c   : > { %2551 = vmatprep.mubr.bf16.mxu0 %v6563_v40  ;;  %2664 = vmatprep.mubr.bf16.mxu1 %v6563_v40 }
 0x263   : > { %2552 = vmatmul.mubr.bf16.gmra.mrb[44].mxu0 %v6588_v14  ;;  %2665 = vmatmul.mubr.bf16.gmra.mrb[44].mxu1 %v6588_v14 }
 0x264   : > { %2561 = vmatprep.mubr.bf16.mxu0 %v6375_v12  ;;  %2674 = vmatprep.mubr.bf16.mxu1 %v6375_v12  ;;  %v1593_v12 = vsub.s32 2, %v5945_v33 }
 0x266   : > { %v6780_v8 = vrot.slane %v1581_v45, %v1593_v12 }
 0x26b   : > { %2562 = vmatmul.mubr.bf16.gmra.mrb[48].mxu0 %v6624_v24  ;;  %2675 = vmatmul.mubr.bf16.gmra.mrb[48].mxu1 %v6624_v24 }
 0x26c   : > { %2571 = vmatprep.mubr.bf16.mxu0 %v6399_v46  ;;  %2684 = vmatprep.mubr.bf16.mxu1 %v6399_v46  ;;  %v1597_v46 = vsub.s32 3, %v5945_v33 }
 0x26e   : > { %v6782_v41 = vrot.slane %v1581_v45, %v1597_v46 }
 0x273   : > { %2572 = vmatmul.mubr.bf16.gmra.mrb[52].mxu0 %v6660_v51  ;;  %2685 = vmatmul.mubr.bf16.gmra.mrb[52].mxu1 %v6660_v51 }
 0x274   : > { %2581 = vmatprep.mubr.bf16.mxu0 %v6427_v18  ;;  %2694 = vmatprep.mubr.bf16.mxu1 %v6427_v18  ;;  %v6775_v18 = vrot.slane %v1581_v45, %v5948_v34 }
 0x27b   : > { %2582 = vmatmul.mubr.bf16.gmra.mrb[56].mxu0 %v6696_v26  ;;  %2695 = vmatmul.mubr.bf16.gmra.mrb[56].mxu1 %v6696_v26 }
 0x27c   : > { %2591 = vmatprep.mubr.bf16.mxu0 %v6453_v56  ;;  %2704 = vmatprep.mubr.bf16.mxu1 %v6453_v56 }
 0x283   : > { %2592 = vmatmul.mubr.bf16.gmra.mrb[60].mxu0 %v1451_v30  ;;  %2705 = vmatmul.mubr.bf16.gmra.mrb[60].mxu1 %v1451_v30 }
 0x2de   : > { %v2297_v56 = vpop.f32.mrb[0].mxu0  ;;  %v2410_v40 = vpop.f32.mrb[0].mxu1 }
 0x2df   : > { %v2298_v50 = vadd.f32 %v2297_v56, %v6775_v18  ;;  %v2299_v9 = vpop.f32.mrb[1].mxu0  ;;  %v2411_v51 = vadd.f32 %v2410_v40, %v6780_v8  ;;  %v2412_v44 = vpop.f32.mrb[1].mxu1 }
 0x2e0   : > { %v2300_v14 = vadd.f32 %v2299_v9, %v6778_v62  ;;  %v2301_v24 = vpop.f32.mrb[2].mxu0  ;;  %v2413_v39 = vadd.f32 %v2412_v44, %v6782_v41  ;;  %v2414_v52 = vpop.f32.mrb[2].mxu1 }
 0x2e1   : > { %v4612_v34 = vmul.f32 -1.442695, %v2298_v50  ;;  %v3532_v48 = vmul.f32 0.0, %v2298_v50  ;;  %v2302_v36 = vadd.f32 %v2301_v24, %v6775_v18  ;;  %v2303_v29 = vpop.f32.mrb[3].mxu0  ;;  %v4614_v17 = vmul.f32 -1.442695, %v2411_v51 }
 0x2e2   : > { %v4613_v37 = vmul.f32 -1.442695, %v2300_v14  ;;  %v3533_v47 = vmul.f32 0.0, %v2300_v14  ;;  %v3534_v25 = vmul.f32 0.0, %v2411_v51  ;;  %v2304_v23 = vadd.f32 %v2303_v29, %v6778_v62  ;;  %v2416_v2 = vpop.f32.mrb[3].mxu1 }
 0x2e3   : > { %5013 = vpow2.f32 %v4612_v34  ;;  %v4620_v6 = vmul.f32 -1.442695, %v2302_v36  ;;  %v3540_v19 = vmul.f32 0.0, %v2302_v36  ;;  %v4615_v0 = vmul.f32 -1.442695, %v2413_v39 }
 0x2e4   : > { %5015 = vpow2.f32 %v4613_v37  ;;  %v3660_v61 = vadd.f32 %v3533_v47, %v3532_v48  ;;  %v3535_v10 = vmul.f32 0.0, %v2413_v39  ;;  %v4621_v20 = vmul.f32 -1.442695, %v2304_v23 }
 0x2e5   : > { %5017 = vpow2.f32 %v4620_v6  ;;  %v3541_v26 = vmul.f32 0.0, %v2304_v23  ;;  %v2415_v7 = vadd.f32 %v2414_v52, %v6780_v8  ;;  %v2417_v13 = vadd.f32 %v2416_v2, %v6782_v41 }
 0x2e6   : > { %5019 = vpow2.f32 %v4614_v17  ;;  %v3661_v21 = vadd.f32 %v3660_v61, %v3534_v25  ;;  %v2307_v16 = vpop.f32.mrb[4].mxu0  ;;  %v2420_v57 = vpop.f32.mrb[4].mxu1 }
 0x2e7   : > { %5021 = vpow2.f32 %v4621_v20  ;;  %v3669_v22 = vadd.f32 %v3541_v26, %v3540_v19  ;;  %v4622_v27 = vmul.f32 -1.442695, %v2415_v7  ;;  %v3542_v38 = vmul.f32 0.0, %v2415_v7  ;;  %v2309_v53 = vpop.f32.mrb[5].mxu0  ;;  %v2422_v5 = vpop.f32.mrb[5].mxu1 }
 0x2e8   : > { %5023 = vpow2.f32 %v4615_v0  ;;  %v6792_v31 = vadd.f32 %v3661_v21, %v3535_v10  ;;  %v4623_v60 = vmul.f32 -1.442695, %v2417_v13  ;;  %v3543_v3 = vmul.f32 0.0, %v2417_v13  ;;  %v2311_v32 = vpop.f32.mrb[6].mxu0  ;;  %v2424_v63 = vpop.f32.mrb[6].mxu1 }
 0x2e9   : > { %5025 = vpow2.f32 %v4622_v27  ;;  %v3670_v59 = vadd.f32 %v3669_v22, %v3542_v38  ;;  %v2308_v49 = vadd.f32 %v2307_v16, %v6775_v18  ;;  %v2310_v54 = vadd.f32 %v2309_v53, %v6778_v62  ;;  %v2313_v15 = vpop.f32.mrb[7].mxu0  ;;  %v2426_v1 = vpop.f32.mrb[7].mxu1 }
 0x2ea   : > { %5027 = vpow2.f32 %v4623_v60  ;;  %v2312_v28 = vadd.f32 %v2311_v32, %v6775_v18  ;;  %v2421_v30 = vadd.f32 %v2420_v57, %v6780_v8  ;;  %v2314_v35 = vadd.f32 %v2313_v15, %v6778_v62 }
 0x2eb   : > { %v6799_v4 = vadd.f32 %v3670_v59, %v3543_v3  ;;  %v4628_v55 = vmul.f32 -1.442695, %v2308_v49  ;;  %v3548_v58 = vmul.f32 0.0, %v2308_v49  ;;  %v4629_v11 = vmul.f32 -1.442695, %v2310_v54 }
 0x2ec   : > { %v3549_v42 = vmul.f32 0.0, %v2310_v54  ;;  %v4636_v43 = vmul.f32 -1.442695, %v2312_v28  ;;  %v3556_v45 = vmul.f32 0.0, %v2312_v28  ;;  %v3550_v46 = vmul.f32 0.0, %v2421_v30 }
 0x2ed   : > { %v5014_v12 = vpop.eup %5013  ;;  %5029 = vpow2.f32 %v4628_v55  ;;  %v3557_v56 = vmul.f32 0.0, %v2314_v35  ;;  %v2423_v14 = vadd.f32 %v2422_v5, %v6782_v41  ;;  %v2425_v48 = vadd.f32 %v2424_v63, %v6780_v8 }
 0x2ee   : > { %v5016_v50 = vpop.eup %5015  ;;  %v3099_v9 = vadd.f32 1.0, %v5014_v12  ;;  %5031 = vpow2.f32 %v4629_v11  ;;  %v3678_v40 = vadd.f32 %v3549_v42, %v3548_v58  ;;  %v2317_v24 = vpop.f32.mrb[8].mxu0  ;;  %v4630_v19 = vmul.f32 -1.442695, %v2421_v30 }
 0x2ef   : > { %v5018_v51 = vpop.eup %5017  ;;  %v3100_v44 = vadd.f32 1.0, %v5016_v50  ;;  %5033 = vpow2.f32 %v4636_v43  ;;  %v3687_v34 = vadd.f32 %v3557_v56, %v3556_v45  ;;  %v2319_v36 = vpop.f32.mrb[9].mxu0  ;;  %v3551_v23 = vmul.f32 0.0, %v2423_v14 }
 0x2f0   : > { %v2430_v29 = vpop.f32.mrb[8].mxu1  ;;  %v5020_v39 = vpop.eup %5019  ;;  %5035 = vrcp.f32 %v3099_v9  ;;  %v3107_v52 = vadd.f32 1.0, %v5018_v51  ;;  %v3679_v37 = vadd.f32 %v3678_v40, %v3550_v46  ;;  %v3558_v20 = vmul.f32 0.0, %v2425_v48 }
 0x2f1   : > { %v2321_v47 = vpop.f32.mrb[10].mxu0  ;;  %v6803_v17 = vpop.f32.mrb[9].mxu1  ;;  %5037 = vrcp.f32 %v3100_v44  ;;  %v3101_v6 = vadd.f32 1.0, %v5020_v39  ;;  %v2427_v26 = vadd.f32 %v2426_v1, %v6782_v41  ;;  %v2318_v22 = vadd.f32 %v2317_v24, %v6775_v18 }
 0x2f2   : > { %v5022_v25 = vpop.eup %5021  ;;  %v2323_v2 = vpop.f32.mrb[11].mxu0  ;;  %5039 = vrcp.f32 %v3107_v52  ;;  %v6808_v16 = vadd.f32 %v3679_v37, %v3551_v23  ;;  %v4637_v53 = vmul.f32 -1.442695, %v2314_v35  ;;  %v3688_v57 = vadd.f32 %v3687_v34, %v3558_v20 }
 0x2f3   : > { %v6805_v61 = vpop.f32.mrb[10].mxu1  ;;  %v5024_v0 = vpop.eup %5023  ;;  %v3108_v10 = vadd.f32 1.0, %v5022_v25  ;;  %5041 = vrcp.f32 %v3101_v6  ;;  %v4631_v3 = vmul.f32 -1.442695, %v2423_v14  ;;  %v3559_v32 = vmul.f32 0.0, %v2427_v26 }
 0x2f4   : > { %v2436_v7 = vpop.f32.mrb[11].mxu1  ;;  %v5026_v21 = vpop.eup %5025  ;;  %v3102_v13 = vadd.f32 1.0, %v5024_v0  ;;  %v3564_v5 = vmul.f32 0.0, %v2318_v22  ;;  %v2320_v59 = vadd.f32 %v2319_v36, %v6778_v62  ;;  %v2322_v49 = vadd.f32 %v2321_v47, %v6775_v18 }
 0x2f5   : > { %v5028_v27 = vpop.eup %5027  ;;  %5043 = vrcp.f32 %v3108_v10  ;;  %v3109_v38 = vadd.f32 1.0, %v5026_v21  ;;  %v6813_v63 = vadd.f32 %v3688_v57, %v3559_v32  ;;  %v2431_v28 = vadd.f32 %v2430_v29, %v6780_v8 }
 0x2f6   : > { %5045 = vrcp.f32 %v3102_v13  ;;  %v3110_v60 = vadd.f32 1.0, %v5028_v27  ;;  %v2327_v54 = vpop.f32.mrb[12].mxu0  ;;  %v2324_v30 = vadd.f32 %v2323_v2, %v6778_v62  ;;  %v6819_v1 = vpop.f32.mrb[12].mxu1  ;;  %v4638_v11 = vmul.f32 -1.442695, %v2425_v48 }
 0x2f7   : > { %5047 = vrcp.f32 %v3109_v38  ;;  %v5030_v15 = vpop.eup %5029  ;;  %v6817_v35 = vpop.f32.mrb[13].mxu0  ;;  %v3565_v42 = vmul.f32 0.0, %v2320_v59  ;;  %v4639_v56 = vmul.f32 -1.442695, %v2427_v26  ;;  %v3572_v50 = vmul.f32 0.0, %v2322_v49 }
 0x2f8   : > { %5049 = vrcp.f32 %v3110_v60  ;;  %v5032_v55 = vpop.eup %5031  ;;  %v3115_v58 = vadd.f32 1.0, %v5030_v15  ;;  %v2331_v43 = vpop.f32.mrb[14].mxu0  ;;  %v4644_v51 = vmul.f32 -1.442695, %v2318_v22  ;;  %v4645_v36 = vmul.f32 -1.442695, %v2320_v59 }
 0x2f9   : > { %5051 = vpow2.f32 %v4630_v19  ;;  %v6821_v45 = vpop.f32.mrb[13].mxu1  ;;  %v5034_v12 = vpop.eup %5033  ;;  %v3116_v46 = vadd.f32 1.0, %v5032_v55  ;;  %v3696_v44 = vadd.f32 %v3565_v42, %v3564_v5  ;;  %v3566_v29 = vmul.f32 0.0, %v2431_v28 }
 0x2fa   : > { %5053 = vpow2.f32 %v4637_v53  ;;  %v2333_v9 = vpop.f32.mrb[15].mxu0  ;;  %v6823_v40 = vpop.f32.mrb[14].mxu1  ;;  %v3123_v24 = vadd.f32 1.0, %v5034_v12  ;;  %v3573_v39 = vmul.f32 0.0, %v2324_v30  ;;  %v2433_v37 = vadd.f32 %v6803_v17, %v6782_v41 }
 0x2fb   : > { %v5036_v14 = vpop.eup %5035  ;;  %5055 = vrcp.f32 %v3115_v58  ;;  %v6825_v34 = vpop.f32.mrb[15].mxu1  ;;  %v2435_v47 = vadd.f32 %v6805_v61, %v6780_v8  ;;  %v2437_v25 = vadd.f32 %v2436_v7, %v6782_v41  ;;  %v4652_v19 = vmul.f32 -1.442695, %v2322_v49 }
 0x2fc   : > { %v5038_v48 = vpop.eup %5037  ;;  %4172 = vst [vmem:[%s5745_s20] sm:$0xff] %v5036_v14  ;;  %5057 = vrcp.f32 %v3116_v46  ;;  %v3697_v23 = vadd.f32 %v3696_v44, %v3566_v29  ;;  %v3705_v2 = vadd.f32 %v3573_v39, %v3572_v50  ;;  %v4646_v10 = vmul.f32 -1.442695, %v2431_v28 }
 0x2fd   : > { %v5040_v52 = vpop.eup %5039  ;;  %4173 = vst [vmem:[%s5745_s20 + $0x8] sm:$0xff] %v5038_v48  ;;  %5059 = vrcp.f32 %v3123_v24  ;;  %v3567_v20 = vmul.f32 0.0, %v2433_v37  ;;  %v6837_v17 = vadd.f32 %v2327_v54, %v6775_v18  ;;  %v4653_v7 = vmul.f32 -1.442695, %v2324_v30 }
 0x2fe   : > { %v5042_v6 = vpop.eup %5041  ;;  %4180 = vst [vmem:[%s5745_s20 + $0x40] sm:$0xff] %v5040_v52  ;;  %5061 = vpow2.f32 %v4631_v3  ;;  %v6839_v26 = vpop.f32.mrb[16].mxu0  ;;  %v3574_v21 = vmul.f32 0.0, %v2435_v47  ;;  %v4647_v38 = vmul.f32 -1.442695, %v2433_v37  ;;  %v3575_v57 = vmul.f32 0.0, %v2437_v25 }
 0x2ff   : > { %v5044_v0 = vpop.eup %5043  ;;  %4174 = vst [vmem:[%s5745_s20 + $0x10] sm:$0xff] %v5042_v6  ;;  %5063 = vpow2.f32 %v4638_v11  ;;  %v6842_v13 = vpop.f32.mrb[17].mxu0  ;;  %v6847_v53 = vadd.f32 %v3697_v23, %v3567_v20  ;;  %v6856_v59 = vadd.f32 %v6817_v35, %v6778_v62  ;;  %v6859_v49 = vadd.f32 %v2331_v43, %v6775_v18 }
 0x300   : > { %v5046_v61 = vpop.eup %5045  ;;  %4181 = vst [vmem:[%s5745_s20 + $0x48] sm:$0xff] %v5044_v0  ;;  %5065 = vpow2.f32 %v4639_v56  ;;  %v6844_v22 = vpop.f32.mrb[16].mxu1  ;;  %v3706_v5 = vadd.f32 %v3705_v2, %v3574_v21  ;;  %v3580_v30 = vmul.f32 0.0, %v6837_v17  ;;  %v6869_v55 = vadd.f32 %v6819_v1, %v6780_v8 }
 0x301   : > { %v5048_v27 = vpop.eup %5047  ;;  %4175 = vst [vmem:[%s5745_s20 + $0x18] sm:$0xff] %v5046_v61  ;;  %5067 = vpow2.f32 %v4644_v51  ;;  %v6849_v60 = vpop.f32.mrb[18].mxu0  ;;  %v6872_v35 = vadd.f32 %v2333_v9, %v6778_v62  ;;  %v6880_v12 = vadd.f32 %v6821_v45, %v6782_v41  ;;  %v4654_v1 = vmul.f32 -1.442695, %v2435_v47 }
 0x302   : > { %v6851_v3 = vpop.f32.mrb[17].mxu1  ;;  %v5050_v32 = vpop.eup %5049  ;;  %4182 = vst [vmem:[%s5745_s20 + $0x50] sm:$0xff] %v5048_v27  ;;  %5069 = vpow2.f32 %v4645_v36  ;;  %v6876_v43 = vadd.f32 %v3706_v5, %v3575_v57  ;;  %v3581_v50 = vmul.f32 0.0, %v6856_v59  ;;  %v4655_v14 = vmul.f32 -1.442695, %v2437_v25 }
 0x303   : > { %v6861_v54 = vpop.f32.mrb[19].mxu0  ;;  %v6863_v15 = vpop.f32.mrb[18].mxu1  ;;  %4183 = vst [vmem:[%s5745_s20 + $0x58] sm:$0xff] %v5050_v32  ;;  %5071 = vpow2.f32 %v4652_v19  ;;  %v3588_v24 = vmul.f32 0.0, %v6859_v49  ;;  %v3582_v51 = vmul.f32 0.0, %v6869_v55  ;;  %v3589_v48 = vmul.f32 0.0, %v6872_v35 }
 0x304   : > { %v5052_v28 = vpop.eup %5051  ;;  %v6874_v58 = vpop.f32.mrb[19].mxu1  ;;  %5073 = vpow2.f32 %v4646_v10  ;;  %8000 = vst [vmem:[#allocation6_spill] sm:$0xff] %v6876_v43  ;;  %v3714_v45 = vadd.f32 %v3581_v50, %v3580_v30  ;;  %v3583_v39 = vmul.f32 0.0, %v6880_v12  ;;  %v6894_v52 = vadd.f32 %v6823_v40, %v6780_v8 }
 0x305   : > { %v5054_v11 = vpop.eup %5053  ;;  %v3117_v42 = vadd.f32 1.0, %v5052_v28  ;;  %5075 = vpow2.f32 %v4653_v7  ;;  %v3723_v23 = vadd.f32 %v3589_v48, %v3588_v24  ;;  %v6913_v57 = vadd.f32 %v6825_v34, %v6782_v41 }
 0x306   : > { %v5056_v46 = vpop.eup %5055  ;;  %v3124_v56 = vadd.f32 1.0, %v5054_v11  ;;  %v6888_v36 = vpop.f32.mrb[20].mxu0  ;;  %v3715_v19 = vadd.f32 %v3714_v45, %v3582_v51  ;;  %v3590_v61 = vmul.f32 0.0, %v6894_v52  ;;  %v6919_v11 = vadd.f32 %v6839_v26, %v6775_v18 }
 0x307   : > { %v5058_v9 = vpop.eup %5057  ;;  %4188 = vst [vmem:[%s5745_s20 + $0x80] sm:$0xff] %v5056_v46  ;;  %5077 = vrcp.f32 %v3117_v42  ;;  %v6896_v37 = vpop.f32.mrb[21].mxu0 }
 0x308   : > { %v5060_v44 = vpop.eup %5059  ;;  %4189 = vst [vmem:[%s5745_s20 + $0x88] sm:$0xff] %v5058_v9  ;;  %5079 = vrcp.f32 %v3124_v56  ;;  %v6898_v47 = vpop.f32.mrb[20].mxu1  ;;  %v3724_v30 = vadd.f32 %v3723_v23, %v3590_v61  ;;  %v4660_v56 = vmul.f32 -1.442695, %v6837_v17  ;;  %v4661_v9 = vmul.f32 -1.442695, %v6856_v59 }
 0x309   : > { %v5062_v29 = vpop.eup %5061  ;;  %4196 = vst [vmem:[%s5745_s20 + $0xc0] sm:$0xff] %v5060_v44  ;;  %5081 = vpow2.f32 %v4647_v38  ;;  %v6900_v2 = vpop.f32.mrb[22].mxu0  ;;  %v6909_v38 = vadd.f32 %v3715_v19, %v3583_v39  ;;  %v6929_v44 = vadd.f32 %v6842_v13, %v6778_v62  ;;  %v6935_v59 = vadd.f32 %v6849_v60, %v6775_v18 }
 0x30a   : > { %v5064_v25 = vpop.eup %5063  ;;  %v3118_v6 = vadd.f32 1.0, %v5062_v29  ;;  %5083 = vpow2.f32 %v4654_v1  ;;  %v6902_v0 = vpop.f32.mrb[21].mxu1  ;;  %v3591_v1 = vmul.f32 0.0, %v6913_v57  ;;  %v6939_v29 = vadd.f32 %v6844_v22, %v6780_v8 }
 0x30b   : > { %v5066_v10 = vpop.eup %5065  ;;  %v3125_v20 = vadd.f32 1.0, %v5064_v25  ;;  %5085 = vpow2.f32 %v4655_v14  ;;  %v6905_v40 = vpop.f32.mrb[23].mxu0  ;;  %8001 = vst [vmem:[#allocation7_spill] sm:$0xff] %v6909_v38  ;;  %v3596_v14 = vmul.f32 0.0, %v6919_v11  ;;  %v3597_v19 = vmul.f32 0.0, %v6929_v44 }
 0x30c   : > { %v6907_v7 = vpop.f32.mrb[22].mxu1  ;;  %v5068_v21 = vpop.eup %5067  ;;  %5087 = vrcp.f32 %v3118_v6  ;;  %v3126_v27 = vadd.f32 1.0, %v5066_v10  ;;  %v6925_v26 = vadd.f32 %v3724_v30, %v3591_v1  ;;  %v4668_v6 = vmul.f32 -1.442695, %v6859_v49 }
 0x30d   : > { %v6915_v32 = vpop.f32.mrb[23].mxu1  ;;  %v5070_v5 = vpop.eup %5069  ;;  %5089 = vrcp.f32 %v3125_v20  ;;  %v3131_v28 = vadd.f32 1.0, %v5068_v21  ;;  %v6950_v23 = vadd.f32 %v6861_v54, %v6778_v62  ;;  %v4662_v20 = vmul.f32 -1.442695, %v6869_v55 }
 0x30e   : > { %v5072_v42 = vpop.eup %5071  ;;  %5091 = vrcp.f32 %v3126_v27  ;;  %v3132_v46 = vadd.f32 1.0, %v5070_v5  ;;  %8002 = vst [vmem:[#allocation8_spill] sm:$0xff] %v6925_v26  ;;  %v6931_v17 = vpop.f32.mrb[24].mxu0  ;;  %v4669_v61 = vmul.f32 -1.442695, %v6872_v35  ;;  %v3604_v21 = vmul.f32 0.0, %v6935_v59 }
 0x30f   : > { %v5074_v50 = vpop.eup %5073  ;;  %5093 = vrcp.f32 %v3131_v28  ;;  %v3139_v34 = vadd.f32 1.0, %v5072_v42  ;;  %v6941_v39 = vpop.f32.mrb[25].mxu0  ;;  %v3732_v54 = vadd.f32 %v3597_v19, %v3596_v14  ;;  %v3598_v28 = vmul.f32 0.0, %v6939_v29 }
 0x310   : > { %v5076_v24 = vpop.eup %5075  ;;  %5095 = vrcp.f32 %v3132_v46  ;;  %v3133_v51 = vadd.f32 1.0, %v5074_v50  ;;  %v6943_v25 = vpop.f32.mrb[24].mxu1  ;;  %v4663_v55 = vmul.f32 -1.442695, %v6880_v12  ;;  %v3605_v35 = vmul.f32 0.0, %v6950_v23 }
 0x311   : > { %v5078_v45 = vpop.eup %5077  ;;  %5097 = vrcp.f32 %v3139_v34  ;;  %v3140_v48 = vadd.f32 1.0, %v5076_v24  ;;  %v6952_v60 = vpop.f32.mrb[26].mxu0  ;;  %v6971_v14 = vadd.f32 %v6851_v3, %v6782_v41  ;;  %v6976_v12 = vadd.f32 %v6863_v15, %v6780_v8 }
 0x312   : > { %v5080_v13 = vpop.eup %5079  ;;  %4190 = vst [vmem:[%s5745_s20 + $0x90] sm:$0xff] %v5078_v45  ;;  %5099 = vrcp.f32 %v3133_v51  ;;  %v6954_v10 = vpop.f32.mrb[25].mxu1  ;;  %v6980_v51 = vadd.f32 %v6874_v58, %v6782_v41  ;;  %v4671_v58 = vmul.f32 -1.442695, %v6913_v57 }
 0x313   : > { %v5082_v22 = vpop.eup %5081  ;;  %4197 = vst [vmem:[%s5745_s20 + $0xc8] sm:$0xff] %v5080_v13  ;;  %5101 = vrcp.f32 %v3140_v48  ;;  %v6960_v49 = vpop.f32.mrb[27].mxu0  ;;  %v4670_v48 = vmul.f32 -1.442695, %v6894_v52  ;;  %v3599_v3 = vmul.f32 0.0, %v6971_v14  ;;  %v6987_v13 = vadd.f32 %v6888_v36, %v6775_v18 }
 0x314   : > { %v5084_v27 = vpop.eup %5083  ;;  %v3134_v5 = vadd.f32 1.0, %v5082_v22  ;;  %5103 = vpow2.f32 %v4660_v56  ;;  %v6963_v30 = vpop.f32.mrb[26].mxu1  ;;  %v3733_v56 = vadd.f32 %v3732_v54, %v3598_v28  ;;  %v4676_v22 = vmul.f32 -1.442695, %v6919_v11 }
 0x315   : > { %v5086_v42 = vpop.eup %5085  ;;  %v3141_v46 = vadd.f32 1.0, %v5084_v27  ;;  %5105 = vpow2.f32 %v4661_v9  ;;  %v6967_v1 = vpop.f32.mrb[27].mxu1  ;;  %v3741_v9 = vadd.f32 %v3605_v35, %v3604_v21  ;;  %v3606_v21 = vmul.f32 0.0, %v6976_v12 }
 0x316   : > { %v5088_v50 = vpop.eup %5087  ;;  %5107 = vrcp.f32 %v3134_v5  ;;  %v3142_v34 = vadd.f32 1.0, %v5086_v42  ;;  %v6989_v19 = vpop.f32.mrb[28].mxu0  ;;  %v4677_v36 = vmul.f32 -1.442695, %v6929_v44  ;;  %v6999_v5 = vadd.f32 %v3733_v56, %v3599_v3 }
 0x317   : > { %v5090_v24 = vpop.eup %5089  ;;  %4191 = vst [vmem:[%s5745_s20 + $0x98] sm:$0xff] %v5088_v50  ;;  %5109 = vrcp.f32 %v3141_v46  ;;  %v6995_v27 = vpop.f32.mrb[29].mxu0  ;;  %v3607_v54 = vmul.f32 0.0, %v6980_v51  ;;  %v3742_v11 = vadd.f32 %v3741_v9, %v3606_v21  ;;  %v3612_v42 = vmul.f32 0.0, %v6987_v13 }
 0x318   : > { %v5092_v45 = vpop.eup %5091  ;;  %4198 = vst [vmem:[%s5745_s20 + $0xd0] sm:$0xff] %v5090_v24  ;;  %5111 = vrcp.f32 %v3142_v34  ;;  %8003 = vst [vmem:[#allocation9_spill] sm:$0xff] %v6999_v5  ;;  %v7002_v28 = vpop.f32.mrb[30].mxu0  ;;  %v7019_v50 = vadd.f32 %v6900_v2, %v6775_v18 }
 0x319   : > { %v5094_v15 = vpop.eup %5093  ;;  %4199 = vst [vmem:[%s5745_s20 + $0xd8] sm:$0xff] %v5092_v45  ;;  %5113 = vpow2.f32 %v4668_v6  ;;  %v7004_v6 = vpop.f32.mrb[28].mxu1  ;;  %v7032_v24 = vadd.f32 %v3742_v11, %v3607_v54 }
 0x31a   : > { %v5096_v52 = vpop.eup %5095  ;;  %4204 = vst [vmem:[%s5745_s20 + $0x100] sm:$0xff] %v5094_v15  ;;  %5115 = vpow2.f32 %v4662_v20  ;;  %v7010_v20 = vadd.f32 %v6896_v37, %v6778_v62  ;;  %v7012_v44 = vpop.f32.mrb[31].mxu0  ;;  %v7027_v37 = vadd.f32 %v6905_v40, %v6778_v62  ;;  %v4678_v40 = vmul.f32 -1.442695, %v6939_v29 }
 0x31b   : > { %v5098_v57 = vpop.eup %5097  ;;  %4205 = vst [vmem:[%s5745_s20 + $0x108] sm:$0xff] %v5096_v52  ;;  %5117 = vpow2.f32 %v4669_v61  ;;  %v7014_v46 = vpop.f32.mrb[29].mxu1  ;;  %v7023_v61 = vadd.f32 %v6898_v47, %v6780_v8  ;;  %8004 = vst [vmem:[#allocation10_spill] sm:$0xff] %v7032_v24  ;;  %v4684_v47 = vmul.f32 -1.442695, %v6935_v59  ;;  %v3620_v45 = vmul.f32 0.0, %v7019_v50 }
 0x31c   : > { %v5100_v35 = vpop.eup %5099  ;;  %4212 = vst [vmem:[%s5745_s20 + $0x140] sm:$0xff] %v5098_v57  ;;  %5119 = vpow2.f32 %v4663_v55  ;;  %v7029_v34 = vpop.f32.mrb[30].mxu1  ;;  %v3613_v55 = vmul.f32 0.0, %v7010_v20  ;;  %v4685_v57 = vmul.f32 -1.442695, %v6950_v23 }
 0x31d   : > { %v5102_v56 = vpop.eup %5101  ;;  %4206 = vst [vmem:[%s5745_s20 + $0x110] sm:$0xff] %v5100_v35  ;;  %5121 = vpow2.f32 %v4670_v48  ;;  %v7035_v9 = vpop.f32.mrb[31].mxu1  ;;  %v3614_v21 = vmul.f32 0.0, %v7023_v61 }
 0x31e   : > { %v5104_v2 = vpop.eup %5103  ;;  %4213 = vst [vmem:[%s5745_s20 + $0x148] sm:$0xff] %v5102_v56  ;;  %5123 = vpow2.f32 %v4671_v58  ;;  %v3750_v48 = vadd.f32 %v3613_v55, %v3612_v42  ;;  %v3621_v58 = vmul.f32 0.0, %v7027_v37  ;;  %v7044_v11 = vpop.f32.mrb[32].mxu0  ;;  %v7053_v42 = vadd.f32 %v6907_v7, %v6780_v8 }
 0x31f   : > { %v5106_v3 = vpop.eup %5105  ;;  %v3147_v15 = vadd.f32 1.0, %v5104_v2  ;;  %5125 = vpow2.f32 %v4676_v22  ;;  %v7049_v22 = vadd.f32 %v6902_v0, %v6782_v41  ;;  %v7057_v23 = vpop.f32.mrb[32].mxu1  ;;  %v7062_v55 = vadd.f32 %v6915_v32, %v6782_v41 }
 0x320   : > { %v5108_v52 = vpop.eup %5107  ;;  %v3148_v54 = vadd.f32 1.0, %v5106_v3  ;;  %5127 = vpow2.f32 %v4677_v36  ;;  %v3751_v29 = vadd.f32 %v3750_v48, %v3614_v21  ;;  %v7055_v36 = vpop.f32.mrb[33].mxu0  ;;  %v3759_v56 = vadd.f32 %v3621_v58, %v3620_v45 }
 0x321   : > { %v5110_v59 = vpop.eup %5109  ;;  %4207 = vst [vmem:[%s5745_s20 + $0x118] sm:$0xff] %v5108_v52  ;;  %5129 = vrcp.f32 %v3147_v15  ;;  %v7064_v2 = vpop.f32.mrb[34].mxu0  ;;  %v3615_v7 = vmul.f32 0.0, %v7049_v22  ;;  %v7072_v15 = vadd.f32 %v6931_v17, %v6775_v18  ;;  %v3622_v32 = vmul.f32 0.0, %v7053_v42 }
 0x322   : > { %v5112_v35 = vpop.eup %5111  ;;  %4214 = vst [vmem:[%s5745_s20 + $0x150] sm:$0xff] %v5110_v59  ;;  %5131 = vrcp.f32 %v3148_v54  ;;  %v7066_v0 = vpop.f32.mrb[33].mxu1 }
 0x323   : > { %v5114_v3 = vpop.eup %5113  ;;  %4215 = vst [vmem:[%s5745_s20 + $0x158] sm:$0xff] %v5112_v35  ;;  %5133 = vpow2.f32 %v4684_v47  ;;  %v7074_v48 = vpop.f32.mrb[35].mxu0  ;;  %v4679_v47 = vmul.f32 -1.442695, %v6971_v14  ;;  %v7080_v59 = vadd.f32 %v3751_v29, %v3615_v7  ;;  %v3760_v5 = vadd.f32 %v3759_v56, %v3622_v32 }
 0x324   : > { %v5116_v45 = vpop.eup %5115  ;;  %v3155_v21 = vadd.f32 1.0, %v5114_v3  ;;  %5135 = vpow2.f32 %v4678_v40  ;;  %v7077_v52 = vpop.f32.mrb[34].mxu1  ;;  %v3623_v3 = vmul.f32 0.0, %v7062_v55  ;;  %v3628_v38 = vmul.f32 0.0, %v7072_v15 }
 0x325   : > { %v5118_v54 = vpop.eup %5117  ;;  %v3149_v58 = vadd.f32 1.0, %v5116_v45  ;;  %5137 = vpow2.f32 %v4685_v57  ;;  %8005 = vst [vmem:[#allocation11_spill] sm:$0xff] %v7080_v59  ;;  %v7082_v35 = vpop.f32.mrb[35].mxu1  ;;  %v7088_v57 = vadd.f32 %v6941_v39, %v6778_v62  ;;  %v7094_v45 = vadd.f32 %v6952_v60, %v6775_v18 }
 0x326   : > { %v5120_v17 = vpop.eup %5119  ;;  %5139 = vrcp.f32 %v3155_v21  ;;  %v3156_v24 = vadd.f32 1.0, %v5118_v54  ;;  %v7090_v7 = vadd.f32 %v3760_v5, %v3623_v3  ;;  %v7096_v56 = vpop.f32.mrb[36].mxu0  ;;  %v4686_v54 = vmul.f32 -1.442695, %v6976_v12 }
 0x327   : > { %v5122_v40 = vpop.eup %5121  ;;  %5141 = vrcp.f32 %v3149_v58  ;;  %v3150_v26 = vadd.f32 1.0, %v5120_v17  ;;  %v3629_v58 = vmul.f32 0.0, %v7088_v57  ;;  %v7100_v39 = vpop.f32.mrb[37].mxu0  ;;  %v4687_v60 = vmul.f32 -1.442695, %v6980_v51 }
 0x328   : > { %v5124_v14 = vpop.eup %5123  ;;  %5143 = vrcp.f32 %v3156_v24  ;;  %v3157_v29 = vadd.f32 1.0, %v5122_v40  ;;  %8006 = vst [vmem:[#allocation12_spill] sm:$0xff] %v7090_v7  ;;  %v7102_v17 = vpop.f32.mrb[36].mxu1  ;;  %v7112_v59 = vadd.f32 %v6943_v25, %v6780_v8  ;;  %v7122_v3 = vadd.f32 %v6960_v49, %v6778_v62 }
 0x329   : > { %v5126_v21 = vpop.eup %5125  ;;  %5145 = vrcp.f32 %v3150_v26  ;;  %v3158_v32 = vadd.f32 1.0, %v5124_v14  ;;  %8007 = vst [vmem:[#allocation13_spill] sm:$0xff] %v7102_v17  ;;  %v7106_v40 = vpop.f32.mrb[38].mxu0  ;;  %v3768_v7 = vadd.f32 %v3629_v58, %v3628_v38  ;;  %v7126_v38 = vadd.f32 %v6954_v10, %v6782_v41 }
 0x32a   : > { %v5128_v5 = vpop.eup %5127  ;;  %5147 = vrcp.f32 %v3157_v29  ;;  %v3163_v24 = vadd.f32 1.0, %v5126_v21  ;;  %v7108_v26 = vpop.f32.mrb[37].mxu1  ;;  %v3636_v21 = vmul.f32 0.0, %v7094_v45  ;;  %v4692_v58 = vmul.f32 -1.442695, %v6987_v13 }
 0x32b   : > { %8008 = vst [vmem:[#allocation14_spill] sm:$0xff] %v7108_v26  ;;  %v5130_v12 = vpop.eup %5129  ;;  %5149 = vrcp.f32 %v3158_v32  ;;  %v3164_v14 = vadd.f32 1.0, %v5128_v5  ;;  %v7114_v43 = vpop.f32.mrb[39].mxu0  ;;  %v3630_v5 = vmul.f32 0.0, %v7112_v59  ;;  %v4693_v10 = vmul.f32 -1.442695, %v7010_v20 }
 0x32c   : > { %v7116_v29 = vpop.f32.mrb[38].mxu1  ;;  %v5132_v51 = vpop.eup %5131  ;;  %4220 = vst [vmem:[%s5745_s20 + $0x180] sm:$0xff] %v5130_v12  ;;  %5151 = vrcp.f32 %v3163_v24  ;;  %v7135_v24 = vadd.f32 %v6963_v30, %v6780_v8  ;;  %v3637_v26 = vmul.f32 0.0, %v7122_v3  ;;  %v7141_v13 = vadd.f32 %v6967_v1, %v6782_v41 }
 0x32d   : > { %8009 = vst [vmem:[#allocation15_spill] sm:$0xff] %v7116_v29  ;;  %v7128_v32 = vpop.f32.mrb[39].mxu1  ;;  %v5134_v25 = vpop.eup %5133  ;;  %4221 = vst [vmem:[%s5745_s20 + $0x188] sm:$0xff] %v5132_v51  ;;  %5153 = vrcp.f32 %v3164_v14  ;;  %v3769_v14 = vadd.f32 %v3768_v7, %v3630_v5  ;;  %v4694_v7 = vmul.f32 -1.442695, %v7023_v61 }
 0x32e   : > { %8010 = vst [vmem:[#allocation16_spill] sm:$0xff] %v7128_v32  ;;  %v5136_v12 = vpop.eup %5135  ;;  %v3171_v49 = vadd.f32 1.0, %v5134_v25  ;;  %5155 = vpow2.f32 %v4679_v47  ;;  %v3777_v17 = vadd.f32 %v3637_v26, %v3636_v21  ;;  %v3631_v25 = vmul.f32 0.0, %v7126_v38  ;;  %v7144_v47 = vpop.f32.mrb[40].mxu0 }
 0x32f   : > { %v5138_v32 = vpop.eup %5137  ;;  %v3165_v29 = vadd.f32 1.0, %v5136_v12  ;;  %5157 = vpow2.f32 %v4686_v54  ;;  %v4700_v54 = vmul.f32 -1.442695, %v7019_v50  ;;  %v3638_v5 = vmul.f32 0.0, %v7135_v24  ;;  %v7150_v1 = vpop.f32.mrb[41].mxu0 }
 0x330   : > { %v5140_v51 = vpop.eup %5139  ;;  %5159 = vrcp.f32 %v3171_v49  ;;  %v3172_v30 = vadd.f32 1.0, %v5138_v32  ;;  %v4701_v26 = vmul.f32 -1.442695, %v7027_v37  ;;  %v7154_v21 = vadd.f32 %v3769_v14, %v3631_v25  ;;  %v7162_v50 = vpop.f32.mrb[40].mxu1 }
 0x331   : > { %v5142_v20 = vpop.eup %5141  ;;  %4228 = vst [vmem:[%s5745_s20 + $0x1c0] sm:$0xff] %v5140_v51  ;;  %5161 = vrcp.f32 %v3165_v29  ;;  %v7158_v32 = vadd.f32 %v6989_v19, %v6775_v18  ;;  %v7160_v29 = vpop.f32.mrb[42].mxu0  ;;  %v3778_v49 = vadd.f32 %v3777_v17, %v3638_v5  ;;  %v3639_v51 = vmul.f32 0.0, %v7141_v13 }
 0x332   : > { %v5144_v12 = vpop.eup %5143  ;;  %4222 = vst [vmem:[%s5745_s20 + $0x190] sm:$0xff] %v5142_v20  ;;  %5163 = vrcp.f32 %v3172_v30  ;;  %8011 = vst [vmem:[#allocation17_spill] sm:$0xff] %v7154_v21  ;;  %v7168_v37 = vadd.f32 %v6995_v27, %v6778_v62  ;;  %v7170_v14 = vpop.f32.mrb[43].mxu0  ;;  %v7182_v17 = vadd.f32 %v7004_v6, %v6780_v8  ;;  %v4695_v5 = vmul.f32 -1.442695, %v7049_v22 }
 0x333   : > { %v5146_v61 = vpop.eup %5145  ;;  %4229 = vst [vmem:[%s5745_s20 + $0x1c8] sm:$0xff] %v5144_v12  ;;  %5165 = vpow2.f32 %v4687_v60  ;;  %v7172_v30 = vpop.f32.mrb[41].mxu1  ;;  %v3644_v25 = vmul.f32 0.0, %v7158_v32  ;;  %v7178_v60 = vadd.f32 %v7002_v28, %v6775_v18  ;;  %v7188_v12 = vadd.f32 %v3778_v49, %v3639_v51 }
 0x334   : > { %8012 = vst [vmem:[#allocation18_spill] sm:$0xff] %v7172_v30  ;;  %v5148_v19 = vpop.eup %5147  ;;  %4223 = vst [vmem:[%s5745_s20 + $0x198] sm:$0xff] %v5146_v61  ;;  %5167 = vpow2.f32 %v4692_v58  ;;  %v7184_v27 = vpop.f32.mrb[42].mxu1  ;;  %v3645_v58 = vmul.f32 0.0, %v7168_v37  ;;  %v4702_v28 = vmul.f32 -1.442695, %v7053_v42  ;;  %v7210_v42 = vadd.f32 %v7012_v44, %v6778_v62 }
 0x335   : > { %v5150_v20 = vpop.eup %5149  ;;  %4230 = vst [vmem:[%s5745_s20 + $0x1d0] sm:$0xff] %v5148_v19  ;;  %5169 = vpow2.f32 %v4693_v10  ;;  %8013 = vst [vmem:[#allocation19_spill] sm:$0xff] %v7188_v12  ;;  %v7191_v61 = vpop.f32.mrb[43].mxu1  ;;  %v4703_v6 = vmul.f32 -1.442695, %v7062_v55  ;;  %v7199_v10 = vld [vmem:[%s7990_s6] sm:$0xff]  ;;  %v7216_v12 = vadd.f32 %v7014_v46, %v6782_v41  ;;  %v7226_v44 = vadd.f32 %v7035_v9, %v6782_v41 }
 0x336   : > { %8014 = vst [vmem:[#allocation20_spill] sm:$0xff] %v7191_v61  ;;  %v5152_v18 = vpop.eup %5151  ;;  %4231 = vst [vmem:[%s5745_s20 + $0x1d8] sm:$0xff] %v5150_v20  ;;  %5171 = vpow2.f32 %v4700_v54  ;;  %v8015_v22 = vsub.s32 4, %v5945_v33  ;;  %v3786_v19 = vadd.f32 %v3645_v58, %v3644_v25  ;;  %v3646_v54 = vmul.f32 0.0, %v7182_v17 }
 0x337   : > { %v5154_v51 = vpop.eup %5153  ;;  %4236 = vst [vmem:[%s5745_s20 + $0x200] sm:$0xff] %v5152_v18  ;;  %5173 = vpow2.f32 %v4694_v7  ;;  %v3652_v20 = vmul.f32 0.0, %v7178_v60  ;;  %v7220_v18 = vadd.f32 %v7029_v34, %v6780_v8  ;;  %v7222_v7 = vpop.f32.mrb[44].mxu0  ;;  %v4708_v8 = vmul.f32 -1.442695, %v7072_v15 }
 0x338   : > { %v7204_v49 = vrot.slane %v7199_v10, %v8015_v22  ;;  %v5156_v55 = vpop.eup %5155  ;;  %4237 = vst [vmem:[%s5745_s20 + $0x208] sm:$0xff] %v5154_v51  ;;  %5175 = vpow2.f32 %v4701_v26  ;;  %v3787_v62 = vadd.f32 %v3786_v19, %v3646_v54  ;;  %v7228_v26 = vpop.f32.mrb[45].mxu0  ;;  %v3653_v34 = vmul.f32 0.0, %v7210_v42 }
 0x339   : > { %v5158_v25 = vpop.eup %5157  ;;  %v3166_v58 = vadd.f32 1.0, %v5156_v55  ;;  %5177 = vpow2.f32 %v4695_v5  ;;  %v7230_v22 = vpop.f32.mrb[44].mxu1  ;;  %v4709_v41 = vmul.f32 -1.442695, %v7088_v57  ;;  %v3647_v9 = vmul.f32 0.0, %v7216_v12 }
 0x33a   : > { %8016 = vst [vmem:[#allocation21_spill] sm:$0xff] %v7230_v22  ;;  %v5160_v46 = vpop.eup %5159  ;;  %v3173_v51 = vadd.f32 1.0, %v5158_v25  ;;  %5179 = vpow2.f32 %v4702_v28  ;;  %v7234_v21 = vpop.f32.mrb[46].mxu0  ;;  %v3654_v54 = vmul.f32 0.0, %v7220_v18  ;;  %v3795_v25 = vadd.f32 %v3653_v34, %v3652_v20 }
 0x33b   : > { %v7236_v5 = vpop.f32.mrb[45].mxu1  ;;  %v5162_v19 = vpop.eup %5161  ;;  %4244 = vst [vmem:[%s5745_s20 + $0x240] sm:$0xff] %v5160_v46  ;;  %5181 = vrcp.f32 %v3166_v58  ;;  %v7251_v57 = vadd.f32 %v3787_v62, %v3647_v9  ;;  %v3655_v58 = vmul.f32 0.0, %v7226_v44  ;;  %v7256_v61 = vadd.f32 %v7044_v11, %v7204_v49 }
 0x33c   : > { %8017 = vst [vmem:[#allocation22_spill] sm:$0xff] %v7236_v5  ;;  %v7242_v55 = vpop.f32.mrb[47].mxu0  ;;  %v7244_v28 = vpop.f32.mrb[46].mxu1  ;;  %4238 = vst [vmem:[%s5745_s20 + $0x210] sm:$0xff] %v5162_v19  ;;  %5183 = vrcp.f32 %v3173_v51  ;;  %v1605_v5 = vsub.s32 5, %v5945_v33  ;;  %v3796_v51 = vadd.f32 %v3795_v25, %v3654_v54  ;;  %v7260_v20 = vadd.f32 %v7064_v2, %v7204_v49 }
 0x33d   : > { %8018 = vst [vmem:[#allocation23_spill] sm:$0xff] %v7244_v28  ;;  %v5164_v15 = vpop.eup %5163  ;;  %v7248_v22 = vpop.f32.mrb[47].mxu1  ;;  %5185 = vpow2.f32 %v4703_v6  ;;  %8020 = vst [vmem:[#allocation25_spill] sm:$0xff] %v7251_v57  ;;  %v3536_v6 = vmul.f32 0.0, %v7256_v61 }
 0x33e   : > { %8019 = vst [vmem:[#allocation24_spill] sm:$0xff] %v7248_v22  ;;  %v5166_v46 = vpop.eup %5165  ;;  %4245 = vst [vmem:[%s5745_s20 + $0x248] sm:$0xff] %v5164_v15  ;;  %5187 = vpow2.f32 %v4708_v8  ;;  %v7263_v15 = vadd.f32 %v3796_v51, %v3655_v58  ;;  %v7265_v11 = vpop.f32.mrb[48].mxu0  ;;  %v7271_v2 = vrot.slane %v7199_v10, %v1605_v5 }
 0x33f   : > { %v5168_v28 = vpop.eup %5167  ;;  %v3174_v30 = vadd.f32 1.0, %v5166_v46  ;;  %5189 = vpow2.f32 %v4709_v41  ;;  %v7268_v54 = vadd.f32 %v6792_v31, %v3536_v6  ;;  %v7275_v41 = vpop.f32.mrb[48].mxu1  ;;  %v3544_v46 = vmul.f32 0.0, %v7260_v20 }
 0x340   : > { %v5170_v34 = vpop.eup %5169  ;;  %v3179_v19 = vadd.f32 1.0, %v5168_v28  ;;  %8021 = vst [vmem:[#allocation26_spill] sm:$0xff] %v7263_v15  ;;  %v7273_v28 = vpop.f32.mrb[49].mxu0  ;;  %8022 = vst [vmem:[#allocation27_spill] sm:$0xff] %v7275_v41  ;;  %v7284_v5 = vadd.f32 %v7074_v48, %v7271_v2  ;;  %v4710_v48 = vmul.f32 -1.442695, %v7112_v59 }
 0x341   : > { %v5172_v62 = vpop.eup %5171  ;;  %5191 = vrcp.f32 %v3174_v30  ;;  %v3180_v9 = vadd.f32 1.0, %v5170_v34  ;;  %v7278_v58 = vpop.f32.mrb[50].mxu0  ;;  %v3672_v15 = vadd.f32 %v6799_v4, %v3544_v46 }
 0x342   : > { %v5174_v57 = vpop.eup %5173  ;;  %5193 = vrcp.f32 %v3179_v19  ;;  %v3187_v8 = vadd.f32 1.0, %v5172_v62  ;;  %v7280_v51 = vpop.f32.mrb[49].mxu1  ;;  %v3545_v22 = vmul.f32 0.0, %v7284_v5 }
 0x343   : > { %v5176_v25 = vpop.eup %5175  ;;  %5195 = vrcp.f32 %v3180_v9  ;;  %v3181_v30 = vadd.f32 1.0, %v5174_v57  ;;  %8023 = vst [vmem:[#allocation28_spill] sm:$0xff] %v7280_v51  ;;  %v7286_v19 = vpop.f32.mrb[51].mxu0  ;;  %v4716_v9 = vmul.f32 -1.442695, %v7094_v45  ;;  %v8027_v45 = vlaneseq }
 0x344   : > { %v5178_v34 = vpop.eup %5177  ;;  %5197 = vrcp.f32 %v3187_v8  ;;  %v3188_v31 = vadd.f32 1.0, %v5176_v25  ;;  %8024 = vst [vmem:[#allocation29_spill] sm:$0xff] %v7286_v19  ;;  %v7288_v6 = vpop.f32.mrb[50].mxu1 }
 0x345   : > { %8025 = vst [vmem:[#allocation30_spill] sm:$0xff] %v7288_v6  ;;  %v5180_v62 = vpop.eup %5179  ;;  %5199 = vrcp.f32 %v3181_v30  ;;  %v3182_v57 = vadd.f32 1.0, %v5178_v34  ;;  %v7292_v51 = vpop.f32.mrb[51].mxu1  ;;  %v1609_v6 = vsub.s32 6, %v5945_v33  ;;  %v3484_v34 = vand.u32 127, %v8027_v45 }
 0x346   : > { %8026 = vst [vmem:[#allocation31_spill] sm:$0xff] %v7292_v51  ;;  %v5182_v8 = vpop.eup %5181  ;;  %5201 = vrcp.f32 %v3188_v31  ;;  %v3189_v25 = vadd.f32 1.0, %v5180_v62  ;;  %v4717_v31 = vmul.f32 -1.442695, %v7122_v3  ;;  %v7301_v62 = vadd.f32 %v3672_v15, %v3545_v22  ;;  %v7303_v59 = vpop.f32.mrb[52].mxu0 }
 0x347   : > { %v5184_v41 = vpop.eup %5183  ;;  %4239 = vst [vmem:[%s5745_s20 + $0x218] sm:$0xff] %v5182_v8  ;;  %5203 = vrcp.f32 %v3182_v57  ;;  %v4711_v51 = vmul.f32 -1.442695, %v7126_v38  ;;  %v7306_v19 = vpop.f32.mrb[53].mxu0  ;;  %v4718_v3 = vmul.f32 -1.442695, %v7135_v24  ;;  %v7312_v22 = vrot.slane %v7199_v10, %v1609_v6 }
 0x348   : > { %v5186_v30 = vpop.eup %5185  ;;  %4246 = vst [vmem:[%s5745_s20 + $0x250] sm:$0xff] %v5184_v41  ;;  %5205 = vrcp.f32 %v3189_v25  ;;  %v7308_v41 = vpop.f32.mrb[52].mxu1  ;;  %v4719_v38 = vmul.f32 -1.442695, %v7141_v13  ;;  %v7320_v45 = vadd.s32 896, %v3484_v34  ;;  %v7335_v13 = vadd.f32 %v7106_v40, %v7204_v49 }
 0x349   : > { %v5188_v4 = vpop.eup %5187  ;;  %v3190_v46 = vadd.f32 1.0, %v5186_v30  ;;  %5207 = vpow2.f32 %v4716_v9  ;;  %v7314_v15 = vpop.f32.mrb[54].mxu0 }
 0x34a   : > { %v5190_v57 = vpop.eup %5189  ;;  %v3195_v8 = vadd.f32 1.0, %v5188_v4  ;;  %5209 = vpow2.f32 %v4710_v48  ;;  %v7316_v30 = vpop.f32.mrb[53].mxu1  ;;  %8028 = vst [vmem:[#allocation32_spill] sm:$0xff] %v7320_v45  ;;  %v7324_v4 = vadd.f32 %v7096_v56, %v7204_v49  ;;  %vm3499_vm2 = vcmp.eq.s32.totalorder %v7320_v45, 1000 }
 0x34b   : > { %v5192_v25 = vpop.eup %5191  ;;  %5211 = vrcp.f32 %v3190_v46  ;;  %v3196_v9 = vadd.f32 1.0, %v5190_v57  ;;  %v7326_v24 = vpop.f32.mrb[55].mxu0  ;;  %v4724_v57 = vmul.f32 -1.442695, %v7158_v32  ;;  %vm3507_vm3 = vcmp.eq.s32.totalorder %v7320_v45, 1001 }
 0x34c   : > { %v5194_v48 = vpop.eup %5193  ;;  %4247 = vst [vmem:[%s5745_s20 + $0x258] sm:$0xff] %v5192_v25  ;;  %5213 = vrcp.f32 %v3195_v8  ;;  %v7328_v6 = vpop.f32.mrb[54].mxu1  ;;  %v4725_v8 = vmul.f32 -1.442695, %v7168_v37  ;;  %v4732_v25 = vmul.f32 -1.442695, %v7178_v60  ;;  %v7350_v60 = vadd.f32 %v7055_v36, %v7271_v2 }
 0x34d   : > { %v5196_v46 = vpop.eup %5195  ;;  %4252 = vst [vmem:[%s5745_s20 + $0x280] sm:$0xff] %v5194_v48  ;;  %5215 = vrcp.f32 %v3196_v9  ;;  %v7337_v34 = vpop.f32.mrb[55].mxu1  ;;  %v4726_v48 = vmul.f32 -1.442695, %v7182_v17  ;;  %v1613_v9 = vsub.s32 7, %v5945_v33  ;;  %v3552_v40 = vmul.f32 0.0, %v7324_v4 }
 0x34e   : > { %8029 = vst [vmem:[#allocation33_spill] sm:$0xff] %v7337_v34  ;;  %v5198_v56 = vpop.eup %5197  ;;  %4253 = vst [vmem:[%s5745_s20 + $0x288] sm:$0xff] %v5196_v46  ;;  %5217 = vpow2.f32 %v4717_v31  ;;  %v4733_v31 = vmul.f32 -1.442695, %v7210_v42  ;;  %v7356_v17 = vadd.f32 %v7057_v23, %v7312_v22  ;;  %v7362_v42 = vpop.f32.mrb[56].mxu0 }
 0x34f   : > { %v5200_v32 = vpop.eup %5199  ;;  %4260 = vst [vmem:[%s5745_s20 + $0x2c0] sm:$0xff] %v5198_v56  ;;  %5219 = vpow2.f32 %v4711_v51  ;;  %v7359_v51 = vadd.f32 %v6808_v16, %v3552_v40  ;;  %v7366_v36 = vrot.slane %v7199_v10, %v1613_v9  ;;  %v5632_v56 = vmov 0.0   ;;  %v7374_v16 = vpop.f32.mrb[57].mxu0 }
 0x350   : > { %v5202_v37 = vpop.eup %5201  ;;  %4254 = vst [vmem:[%s5745_s20 + $0x290] sm:$0xff] %v5200_v32  ;;  %5221 = vpow2.f32 %v4718_v3  ;;  %v3560_v3 = vmul.f32 0.0, %v7335_v13  ;;  %v3515_v23 = vsel %vm3499_vm2, 1.0, %v5632_v56  ;;  %v7376_v32 = vpop.f32.mrb[56].mxu1  ;;  %v4734_v45 = vmul.f32 -1.442695, %v7220_v18 }
 0x351   : > { %v5204_v33 = vpop.eup %5203  ;;  %4261 = vst [vmem:[%s5745_s20 + $0x2c8] sm:$0xff] %v5202_v37  ;;  %5223 = vpow2.f32 %v4719_v38  ;;  %v7370_v38 = vadd.f32 %v7077_v52, %v7312_v22  ;;  %8030 = vst [vmem:[#allocation34_spill] sm:$0xff] %v7376_v32  ;;  %v7384_v52 = vadd.f32 %v7114_v43, %v7271_v2  ;;  %v7386_v9 = vpop.f32.mrb[58].mxu0 }
 0x352   : > { %v5206_v46 = vpop.eup %5205  ;;  %4255 = vst [vmem:[%s5745_s20 + $0x298] sm:$0xff] %v5204_v33  ;;  %5225 = vpow2.f32 %v4724_v57  ;;  %v3523_v57 = vsel %vm3507_vm3, 1.0, %v5632_v56  ;;  %v3690_v10 = vadd.f32 %v6813_v63, %v3560_v3  ;;  %v7388_v37 = vpop.f32.mrb[57].mxu1 }
 0x353   : > { %v5208_v40 = vpop.eup %5207  ;;  %4262 = vst [vmem:[%s5745_s20 + $0x2d0] sm:$0xff] %v5206_v46  ;;  %5227 = vpow2.f32 %v4725_v8  ;;  %8031 = vst [vmem:[#allocation35_spill] sm:$0xff] %v7388_v37  ;;  %v4727_v46 = vmul.f32 -1.442695, %v7216_v12  ;;  %v3537_v8 = vmul.f32 0.0, %v7350_v60  ;;  %v7392_v56 = vpop.f32.mrb[59].mxu0 }
 0x354   : > { %v5210_v33 = vpop.eup %5209  ;;  %v3203_v34 = vadd.f32 1.0, %v5208_v40  ;;  %5229 = vpow2.f32 %v4732_v25  ;;  %v7394_v63 = vpop.f32.mrb[58].mxu1  ;;  %v3561_v37 = vmul.f32 0.0, %v7384_v52  ;;  %v3538_v12 = vmul.f32 0.0, %v7356_v17 }
 0x355   : > { %8032 = vst [vmem:[#allocation36_spill] sm:$0xff] %v7394_v63  ;;  %v5212_v3 = vpop.eup %5211  ;;  %v3197_v43 = vadd.f32 1.0, %v5210_v33  ;;  %5231 = vpow2.f32 %v4726_v48  ;;  %v7398_v32 = vpop.f32.mrb[59].mxu1  ;;  %v7404_v40 = vadd.f32 %v7066_v0, %v7366_v36  ;;  %v7406_v63 = vsub.f32 %v3515_v23, %v3523_v57 }
 0x356   : > { %8033 = vst [vmem:[#allocation37_spill] sm:$0xff] %v7398_v32  ;;  %v5214_v25 = vpop.eup %5213  ;;  %4263 = vst [vmem:[%s5745_s20 + $0x2d8] sm:$0xff] %v5212_v3  ;;  %5233 = vrcp.f32 %v3203_v34  ;;  %v3546_v18 = vmul.f32 0.0, %v7370_v38  ;;  %v7412_v48 = vadd.f32 %v7082_v35, %v7366_v36  ;;  %v7414_v32 = vadd.f32 %v3690_v10, %v3561_v37  ;;  %v7430_v37 = vpop.f32.mrb[60].mxu0 }
 0x357   : > { %8034 = vst [vmem:[#allocation38_spill] sm:$0xff] %v7404_v40  ;;  %v5216_v33 = vpop.eup %5215  ;;  %4268 = vst [vmem:[%s5745_s20 + $0x300] sm:$0xff] %v5214_v25  ;;  %5235 = vrcp.f32 %v3197_v43  ;;  %v7418_v3 = vmul.f32 -1.442695, %v7226_v44  ;;  %v3664_v0 = vadd.f32 %v7268_v54, %v3537_v8  ;;  %v7423_v23 = vadd.f32 %v7144_v47, %v7204_v49  ;;  %v7434_v47 = vpop.f32.mrb[61].mxu0 }
 0x358   : > { %8035 = vst [vmem:[#allocation39_spill] sm:$0xff] %v7412_v48  ;;  %v5218_v34 = vpop.eup %5217  ;;  %4269 = vst [vmem:[%s5745_s20 + $0x308] sm:$0xff] %v5216_v33  ;;  %5237 = vpow2.f32 %v4733_v31  ;;  %v7427_v35 = vadd.f32 %v7150_v1, %v7271_v2  ;;  %v3674_v10 = vadd.f32 %v7301_v62, %v3546_v18  ;;  %v3539_v54 = vmul.f32 %v7406_v63, %v7404_v40  ;;  %v7436_v25 = vpop.f32.mrb[60].mxu1 }
 0x359   : > { %v5220_v57 = vpop.eup %5219  ;;  %v3204_v43 = vadd.f32 1.0, %v5218_v34  ;;  %5239 = vpow2.f32 %v4727_v46  ;;  %8036 = vst [vmem:[#allocation40_spill] sm:$0xff] %v7430_v37  ;;  %v3665_v8 = vadd.f32 %v3664_v0, %v3538_v12  ;;  %8037 = vst [vmem:[#allocation41_spill] sm:$0xff] %v7434_v47  ;;  %v3547_v1 = vmul.f32 %v7406_v63, %v7412_v48  ;;  %v7441_v18 = vpop.f32.mrb[62].mxu0 }
 0x35a   : > { %v5222_v31 = vpop.eup %5221  ;;  %v3198_v44 = vadd.f32 1.0, %v5220_v57  ;;  %5241 = vpow2.f32 %v4734_v45  ;;  %8038 = vst [vmem:[#allocation42_spill] sm:$0xff] %v7436_v25  ;;  %v3568_v62 = vmul.f32 0.0, %v7423_v23  ;;  %8039 = vst [vmem:[#allocation43_spill] sm:$0xff] %v7441_v18  ;;  %v7443_v34 = vpop.f32.mrb[61].mxu1  ;;  %v3569_v0 = vmul.f32 0.0, %v7427_v35 }
 0x35b   : > { %v5224_v46 = vpop.eup %5223  ;;  %5243 = vrcp.f32 %v3204_v43  ;;  %v3205_v33 = vadd.f32 1.0, %v5222_v31  ;;  %v3666_v12 = vadd.f32 %v3665_v8, %v3539_v54  ;;  %v7446_v40 = vpop.f32.mrb[63].mxu0  ;;  %v3675_v47 = vadd.f32 %v3674_v10, %v3547_v1 }
 0x35c   : > { %v5226_v45 = vpop.eup %5225  ;;  %5245 = vrcp.f32 %v3198_v44  ;;  %v3206_v57 = vadd.f32 1.0, %v5224_v46  ;;  %v7448_v25 = vpop.f32.mrb[62].mxu1  ;;  %v3699_v48 = vadd.f32 %v6847_v53, %v3568_v62  ;;  %v7455_v54 = vadd.f32 %v7100_v39, %v7271_v2 }
 0x35d   : > { %v5228_v43 = vpop.eup %5227  ;;  %5247 = vrcp.f32 %v3205_v33  ;;  %v3211_v31 = vadd.f32 1.0, %v5226_v45  ;;  %v7451_v37 = vpop.f32.mrb[63].mxu1  ;;  %3667 = vadd.xlane.f32.xlu0 %v3666_v12  ;;  %v7459_v8 = vadd.f32 %v7160_v29, %v7204_v49  ;;  %v7465_v33 = vadd.f32 %v7170_v14, %v7271_v2 }
 0x35e   : > { %v5230_v18 = vpop.eup %5229  ;;  %5249 = vrcp.f32 %v3206_v57  ;;  %v3212_v44 = vadd.f32 1.0, %v5228_v43  ;;  %v7461_v10 = vadd.f32 %v3699_v48, %v3569_v0  ;;  %v4616_v39 = vmul.f32 -1.442695, %v7256_v61  ;;  %v8040_v48 = vld [vmem:[#allocation13_spill] sm:$0xff]  ;;  %v8041_v0 = vld [vmem:[#allocation15_spill] sm:$0xff]  ;;  %v8042_v61 = vld [vmem:[#allocation6_spill] sm:$0xff] }
 0x35f   : > { %v5232_v46 = vpop.eup %5231  ;;  %5251 = vrcp.f32 %v3211_v31  ;;  %v3219_v53 = vadd.f32 1.0, %v5230_v18  ;;  %v3576_v45 = vmul.f32 0.0, %v7459_v8  ;;  %v4617_v29 = vmul.f32 -1.442695, %v7350_v60 }
 0x360   : > { %v5234_v1 = vpop.eup %5233  ;;  %5253 = vrcp.f32 %v3212_v44  ;;  %v3213_v62 = vadd.f32 1.0, %v5232_v46  ;;  %v4624_v18 = vmul.f32 -1.442695, %v7260_v20  ;;  %v7474_v12 = vadd.f32 %v8040_v48, %v7312_v22 }
 0x361   : > { %v5236_v57 = vpop.eup %5235  ;;  %4276 = vst [vmem:[%s5745_s20 + $0x340] sm:$0xff] %v5234_v1  ;;  %5255 = vrcp.f32 %v3219_v53  ;;  %v7479_v43 = vadd.f32 %v8041_v0, %v7312_v22  ;;  %3676 = vadd.xlane.f32.xlu0 %v3675_v47  ;;  %v3708_v31 = vadd.f32 %v8042_v61, %v3576_v45  ;;  %v3577_v44 = vmul.f32 0.0, %v7465_v33  ;;  %v8043_v53 = vld [vmem:[#allocation16_spill] sm:$0xff] }
 0x362   : > { %v5238_v14 = vpop.eup %5237  ;;  %4270 = vst [vmem:[%s5745_s20 + $0x310] sm:$0xff] %v5236_v57  ;;  %5257 = vrcp.f32 %v3213_v62  ;;  %v3553_v20 = vmul.f32 0.0, %v7455_v54  ;;  %v7487_v1 = vadd.f32 %v8043_v53, %v7366_v36  ;;  %v4618_v47 = vmul.f32 -1.442695, %v7356_v17 }
 0x363   : > { %v5240_v46 = vpop.eup %5239  ;;  %v3220_v60 = vadd.f32 1.0, %v5238_v14  ;;  %5259 = vpow2.f32 %v7418_v3  ;;  %v7490_v45 = vadd.f32 %v3708_v31, %v3577_v44  ;;  %v3554_v3 = vmul.f32 0.0, %v7474_v12  ;;  %v8044_v14 = vld [vmem:[#allocation14_spill] sm:$0xff] }
 0x364   : > { %v5242_v62 = vpop.eup %5241  ;;  %v3214_v57 = vadd.f32 1.0, %v5240_v46  ;;  %5261 = vpow2.f32 %v4616_v39  ;;  %v7495_v61 = vadd.f32 %v8044_v14, %v7366_v36  ;;  %v4625_v46 = vmul.f32 -1.442695, %v7284_v5 }
 0x365   : > { %v5244_v48 = vpop.eup %5243  ;;  %5263 = vrcp.f32 %v3220_v60  ;;  %v3221_v0 = vadd.f32 1.0, %v5242_v62  ;;  %v4626_v17 = vmul.f32 -1.442695, %v7370_v38  ;;  %v3562_v39 = vmul.f32 0.0, %v7479_v43 }
 0x366   : > { %v5246_v53 = vpop.eup %5245  ;;  %4277 = vst [vmem:[%s5745_s20 + $0x348] sm:$0xff] %v5244_v48  ;;  %5265 = vrcp.f32 %v3214_v57  ;;  %v3563_v44 = vmul.f32 %v7406_v63, %v7487_v1  ;;  %v3682_v60 = vadd.f32 %v7359_v51, %v3553_v20  ;;  %v7507_v62 = vadd.f32 %v7222_v7, %v7204_v49 }
 0x367   : > { %v5248_v31 = vpop.eup %5247  ;;  %4271 = vst [vmem:[%s5745_s20 + $0x318] sm:$0xff] %v5246_v53  ;;  %5267 = vrcp.f32 %v3221_v0  ;;  %v7512_v5 = vadd.f32 %v7228_v26, %v7271_v2  ;;  %v3692_v38 = vadd.f32 %v7414_v32, %v3562_v39  ;;  %v7517_v48 = vadd.f32 %v7234_v21, %v7204_v49 }
 0x368   : > { %v5250_v57 = vpop.eup %5249  ;;  %4278 = vst [vmem:[%s5745_s20 + $0x350] sm:$0xff] %v5248_v31  ;;  %5269 = vpow2.f32 %v4617_v29  ;;  %v3555_v7 = vmul.f32 %v7406_v63, %v7495_v61  ;;  %v3683_v51 = vadd.f32 %v3682_v60, %v3554_v3  ;;  %v3584_v29 = vmul.f32 0.0, %v7507_v62  ;;  %v8045_v3 = vld [vmem:[#allocation7_spill] sm:$0xff] }
 0x369   : > { %v5252_v0 = vpop.eup %5251  ;;  %4279 = vst [vmem:[%s5745_s20 + $0x358] sm:$0xff] %v5250_v57  ;;  %5271 = vpow2.f32 %v4624_v18  ;;  %v7526_v26 = vadd.f32 %v7162_v50, %v7312_v22  ;;  %v3585_v21 = vmul.f32 0.0, %v7512_v5  ;;  %v3693_v32 = vadd.f32 %v3692_v38, %v3563_v44  ;;  %v8047_v57 = vld [vmem:[#allocation20_spill] sm:$0xff] }
 0x36a   : > { %v5254_v20 = vpop.eup %5253  ;;  %4284 = vst [vmem:[%s5745_s20 + $0x380] sm:$0xff] %v5252_v0  ;;  %5273 = vpow2.f32 %v4618_v47  ;;  %v4632_v18 = vmul.f32 -1.442695, %v7324_v4  ;;  %v3684_v53 = vadd.f32 %v3683_v51, %v3555_v7  ;;  %v3717_v39 = vadd.f32 %v8045_v3, %v3584_v29  ;;  %v8046_v4 = vld [vmem:[#allocation18_spill] sm:$0xff]  ;;  %v8048_v29 = vld [vmem:[#allocation8_spill] sm:$0xff] }
 0x36b   : > { %v5256_v14 = vpop.eup %5255  ;;  %4285 = vst [vmem:[%s5745_s20 + $0x388] sm:$0xff] %v5254_v20  ;;  %5275 = vpow2.f32 %v4625_v46  ;;  %v7535_v47 = vadd.f32 %v7184_v27, %v7312_v22  ;;  %v3592_v50 = vmul.f32 0.0, %v7517_v48  ;;  %v7540_v60 = vadd.f32 %v7242_v55, %v7271_v2 }
 0x36c   : > { %v5258_v31 = vpop.eup %5257  ;;  %4292 = vst [vmem:[%s5745_s20 + $0x3c0] sm:$0xff] %v5256_v14  ;;  %5277 = vpow2.f32 %v4626_v17  ;;  %v7545_v46 = vadd.f32 %v8046_v4, %v7366_v36  ;;  %v7549_v38 = vadd.f32 %v8047_v57, %v7366_v36  ;;  %3685 = vadd.xlane.f32.xlu1 %v3684_v53  ;;  %v7551_v27 = vadd.f32 %v3717_v39, %v3585_v21 }
 0x36d   : > { %v5260_v44 = vpop.eup %5259  ;;  %4286 = vst [vmem:[%s5745_s20 + $0x390] sm:$0xff] %v5258_v31  ;;  %v4633_v55 = vmul.f32 -1.442695, %v7455_v54  ;;  %v3570_v51 = vmul.f32 0.0, %v7526_v26  ;;  %v3726_v17 = vadd.f32 %v8048_v29, %v3592_v50  ;;  %5279 = vpow2.f32 %v4632_v18 }
 0x36e   : > { %v5262_v0 = vpop.eup %5261  ;;  %v3222_v7 = vadd.f32 1.0, %v5260_v44  ;;  %v4640_v3 = vmul.f32 -1.442695, %v7335_v13  ;;  %v4634_v21 = vmul.f32 -1.442695, %v7474_v12  ;;  %v3578_v53 = vmul.f32 0.0, %v7535_v47 }
 0x36f   : > { %v5264_v20 = vpop.eup %5263  ;;  %v3103_v14 = vadd.f32 1.0, %v5262_v0  ;;  %v3593_v39 = vmul.f32 0.0, %v7540_v60  ;;  %v3571_v50 = vmul.f32 %v7406_v63, %v7545_v46  ;;  %v3579_v18 = vmul.f32 %v7406_v63, %v7549_v38 }
 0x370   : > { %v5266_v31 = vpop.eup %5265  ;;  %4293 = vst [vmem:[%s5745_s20 + $0x3c8] sm:$0xff] %v5264_v20  ;;  %5281 = vrcp.f32 %v3222_v7  ;;  %3694 = vadd.xlane.f32.xlu1 %v3693_v32  ;;  %v3701_v12 = vadd.f32 %v7461_v10, %v3570_v51  ;;  %v3710_v4 = vadd.f32 %v7490_v45, %v3578_v53  ;;  %v7577_v10 = vadd.f32 %v7273_v28, %v7271_v2 }
 0x371   : > { %v5268_v54 = vpop.eup %5267  ;;  %4287 = vst [vmem:[%s5745_s20 + $0x398] sm:$0xff] %v5266_v31  ;;  %5283 = vrcp.f32 %v3103_v14  ;;  %v7567_v44 = vadd.f32 %v3726_v17, %v3593_v39  ;;  %v7581_v51 = vadd.f32 %v7278_v58, %v7204_v49 }
 0x372   : > { %v5270_v13 = vpop.eup %5269  ;;  %4294 = vst [vmem:[%s5745_s20 + $0x3d0] sm:$0xff] %v5268_v54  ;;  %5285 = vpow2.f32 %v4633_v55  ;;  %v3702_v20 = vadd.f32 %v3701_v12, %v3571_v50  ;;  %v3711_v14 = vadd.f32 %v3710_v4, %v3579_v18  ;;  %v7573_v55 = vadd.f32 %v7265_v11, %v7204_v49  ;;  %v8050_v50 = vld [vmem:[#allocation9_spill] sm:$0xff] }
 0x373   : > { %v5272_v57 = vpop.eup %5271  ;;  %v3104_v0 = vadd.f32 1.0, %v5270_v13  ;;  %5287 = vpow2.f32 %v4640_v3  ;;  %v3601_v28 = vmul.f32 0.0, %v7577_v10  ;;  %v4641_v54 = vmul.f32 -1.442695, %v7384_v52  ;;  %v8053_v52 = vld [vmem:[#allocation29_spill] sm:$0xff] }
 0x374   : > { %v5274_v7 = vpop.eup %5273  ;;  %v3111_v29 = vadd.f32 1.0, %v5272_v57  ;;  %5289 = vpow2.f32 %v4634_v21  ;;  %3703 = vadd.xlane.f32.xlu0 %v3702_v20  ;;  %3712 = vadd.xlane.f32.xlu1 %v3711_v14  ;;  %v3600_v3 = vmul.f32 0.0, %v7573_v55  ;;  %v8049_v21 = vld [vmem:[#allocation21_spill] sm:$0xff]  ;;  %v3608_v12 = vmul.f32 0.0, %v7581_v51  ;;  %v8051_v57 = vld [vmem:[#allocation22_spill] sm:$0xff] }
 0x375   : > { %v5276_v31 = vpop.eup %5275  ;;  %5291 = vrcp.f32 %v3104_v0  ;;  %v3105_v32 = vadd.f32 1.0, %v5274_v7  ;;  %v7586_v53 = vadd.f32 %v8049_v21, %v7312_v22  ;;  %v7595_v0 = vadd.f32 %v8051_v57, %v7366_v36  ;;  %v8052_v7 = vld [vmem:[#allocation23_spill] sm:$0xff] }
 0x376   : > { %5293 = vrcp.f32 %v3111_v29  ;;  %v3112_v45 = vadd.f32 1.0, %v5276_v31  ;;  %v5278_v17 = vpop.eup %5277  ;;  %v3735_v58 = vadd.f32 %v8050_v50, %v3600_v3  ;;  %v7599_v29 = vadd.f32 %v8052_v7, %v7312_v22  ;;  %v8055_v3 = vld [vmem:[#allocation10_spill] sm:$0xff] }
 0x377   : > { %5295 = vrcp.f32 %v3105_v32  ;;  %v3113_v11 = vadd.f32 1.0, %v5278_v17  ;;  %v5280_v39 = vpop.eup %5279  ;;  %v7605_v14 = vadd.f32 %v8053_v52, %v7271_v2  ;;  %v3586_v32 = vmul.f32 0.0, %v7586_v53 }
 0x378   : > { %5297 = vrcp.f32 %v3112_v45  ;;  %v3119_v13 = vadd.f32 1.0, %v5280_v39  ;;  %v7601_v20 = vadd.f32 %v3735_v58, %v3601_v28  ;;  %v8054_v45 = vld [vmem:[#allocation24_spill] sm:$0xff]  ;;  %v4642_v28 = vmul.f32 -1.442695, %v7479_v43 }
 0x379   : > { %5299 = vrcp.f32 %v3113_v11  ;;  %v7611_v17 = vadd.f32 %v8054_v45, %v7366_v36  ;;  %v3744_v11 = vadd.f32 %v8055_v3, %v3608_v12  ;;  %v3609_v50 = vmul.f32 0.0, %v7605_v14 }
 0x37a   : > { %v5282_v18 = vpop.eup %5281  ;;  %5301 = vrcp.f32 %v3119_v13  ;;  %v4648_v13 = vmul.f32 -1.442695, %v7423_v23  ;;  %v3594_v12 = vmul.f32 0.0, %v7599_v29  ;;  %v3587_v43 = vmul.f32 %v7406_v63, %v7595_v0 }
 0x37b   : > { %v5284_v4 = vpop.eup %5283  ;;  %4295 = vst [vmem:[%s5745_s20 + $0x3d8] sm:$0xff] %v5282_v18  ;;  %5303 = vpow2.f32 %v4641_v54  ;;  %v3745_v52 = vadd.f32 %v3744_v11, %v3609_v50  ;;  %v3595_v54 = vmul.f32 %v7406_v63, %v7611_v17  ;;  %v3719_v23 = vadd.f32 %v7551_v27, %v3586_v32 }
 0x37c   : > { %v5286_v31 = vpop.eup %5285  ;;  %4176 = vst [vmem:[%s5745_s20 + $0x20] sm:$0xff] %v5284_v4  ;;  %v4649_v4 = vmul.f32 -1.442695, %v7427_v35  ;;  %v3728_v45 = vadd.f32 %v7567_v44, %v3594_v12  ;;  %v7629_v3 = vadd.f32 %v7303_v59, %v7204_v49  ;;  %v7633_v11 = vadd.f32 %v7306_v19, %v7271_v2  ;;  %v8056_v44 = vld [vmem:[#allocation27_spill] sm:$0xff] }
 0x37d   : > { %v5288_v21 = vpop.eup %5287  ;;  %v3120_v39 = vadd.f32 1.0, %v5286_v31  ;;  %v3720_v27 = vadd.f32 %v3719_v23, %v3587_v43  ;;  %v4650_v32 = vmul.f32 -1.442695, %v7526_v26  ;;  %v7641_v50 = vadd.f32 %v8056_v44, %v7312_v22  ;;  %v8057_v26 = vld [vmem:[#allocation30_spill] sm:$0xff] }
 0x37e   : > { %v5290_v58 = vpop.eup %5289  ;;  %v3127_v18 = vadd.f32 1.0, %v5288_v21  ;;  %v3729_v59 = vadd.f32 %v3728_v45, %v3595_v54  ;;  %v4657_v19 = vmul.f32 -1.442695, %v7465_v33  ;;  %v8059_v54 = vld [vmem:[#allocation28_spill] sm:$0xff]  ;;  %v8060_v45 = vld [vmem:[#allocation31_spill] sm:$0xff] }
 0x37f   : > { %v5292_v57 = vpop.eup %5291  ;;  %5305 = vrcp.f32 %v3120_v39  ;;  %v3121_v7 = vadd.f32 1.0, %v5290_v58  ;;  %v4656_v39 = vmul.f32 -1.442695, %v7459_v8  ;;  %v3616_v58 = vmul.f32 0.0, %v7629_v3  ;;  %3721 = vadd.xlane.f32.xlu0 %v3720_v27 }
 0x380   : > { %v5294_v31 = vpop.eup %5293  ;;  %4177 = vst [vmem:[%s5745_s20 + $0x28] sm:$0xff] %v5292_v57  ;;  %5307 = vrcp.f32 %v3127_v18  ;;  %v7648_v8 = vadd.f32 %v7314_v15, %v7204_v49  ;;  %v7653_v57 = vadd.f32 %v8057_v26, %v7312_v22  ;;  %3730 = vadd.xlane.f32.xlu1 %v3729_v59  ;;  %v7666_v23 = vadd.f32 %v8059_v54, %v7366_v36 }
 0x381   : > { %v5296_v35 = vpop.eup %5295  ;;  %4184 = vst [vmem:[%s5745_s20 + $0x60] sm:$0xff] %v5294_v31  ;;  %5309 = vrcp.f32 %v3121_v7  ;;  %v8058_v7 = vld [vmem:[#allocation11_spill] sm:$0xff]  ;;  %v4658_v31 = vmul.f32 -1.442695, %v7535_v47  ;;  %v7672_v47 = vadd.f32 %v8060_v45, %v7366_v36 }
 0x382   : > { %v5298_v21 = vpop.eup %5297  ;;  %4178 = vst [vmem:[%s5745_s20 + $0x30] sm:$0xff] %v5296_v35  ;;  %5311 = vpow2.f32 %v4642_v28  ;;  %v3617_v28 = vmul.f32 0.0, %v7633_v11  ;;  %v3753_v12 = vadd.f32 %v8058_v7, %v3616_v58  ;;  %v3624_v15 = vmul.f32 0.0, %v7648_v8 }
 0x383   : > { %4185 = vst [vmem:[%s5745_s20 + $0x68] sm:$0xff] %v5298_v21  ;;  %v5300_v18 = vpop.eup %5299  ;;  %5313 = vpow2.f32 %v4648_v13  ;;  %v7658_v13 = vadd.f32 %v7326_v24, %v7271_v2  ;;  %v8061_v21 = vld [vmem:[#allocation12_spill] sm:$0xff]  ;;  %v4664_v58 = vmul.f32 -1.442695, %v7507_v62 }
 0x384   : > { %4186 = vst [vmem:[%s5745_s20 + $0x70] sm:$0xff] %v5300_v18  ;;  %5315 = vpow2.f32 %v4649_v4  ;;  %v5302_v33 = vpop.eup %5301  ;;  %v3602_v4 = vmul.f32 0.0, %v7641_v50  ;;  %v7668_v35 = vadd.f32 %v3753_v12, %v3617_v28 }
 0x385   : > { %5317 = vpow2.f32 %v4656_v39  ;;  %v5304_v43 = vpop.eup %5303  ;;  %4192 = vst [vmem:[%s5745_s20 + $0xa0] sm:$0xff] %v5302_v33  ;;  %v3762_v39 = vadd.f32 %v8061_v21, %v3624_v15  ;;  %v3625_v44 = vmul.f32 0.0, %v7658_v13  ;;  %v3611_v33 = vmul.f32 %v7406_v63, %v7672_v47 }
 0x386   : > { %5319 = vpow2.f32 %v4650_v32  ;;  %v3128_v24 = vadd.f32 1.0, %v5304_v43  ;;  %v3610_v32 = vmul.f32 0.0, %v7653_v57  ;;  %v3737_v26 = vadd.f32 %v7601_v20, %v3602_v4 }
 0x387   : > { %5321 = vpow2.f32 %v4657_v19  ;;  %v3603_v19 = vmul.f32 %v7406_v63, %v7666_v23  ;;  %v7682_v28 = vadd.f32 %v3762_v39, %v3625_v44  ;;  %v7694_v20 = vadd.f32 %v7374_v16, %v7271_v2 }
 0x388   : > { %5323 = vrcp.f32 %v3128_v24  ;;  %v3746_v7 = vadd.f32 %v3745_v52, %v3610_v32  ;;  %v7690_v24 = vadd.f32 %v7362_v42, %v7204_v49  ;;  %v7698_v52 = vadd.f32 %v7386_v9, %v7204_v49 }
 0x389   : > { %v5306_v27 = vpop.eup %5305  ;;  %5325 = vpow2.f32 %v4658_v31  ;;  %v3738_v43 = vadd.f32 %v3737_v26, %v3603_v19  ;;  %v3633_v32 = vmul.f32 0.0, %v7694_v20  ;;  %v4665_v16 = vmul.f32 -1.442695, %v7512_v5 }
 0x38a   : > { %v5308_v59 = vpop.eup %5307  ;;  %4193 = vst [vmem:[%s5745_s20 + $0xa8] sm:$0xff] %v5306_v27  ;;  %5327 = vpow2.f32 %v4664_v58  ;;  %v3747_v62 = vadd.f32 %v3746_v7, %v3611_v33  ;;  %v3632_v39 = vmul.f32 0.0, %v7690_v24  ;;  %v8062_v58 = vld [vmem:[#allocation17_spill] sm:$0xff]  ;;  %v7706_v19 = vadd.f32 %v7308_v41, %v7312_v22  ;;  %v8063_v41 = vld [vmem:[#allocation19_spill] sm:$0xff] }
 0x38b   : > { %v5310_v18 = vpop.eup %5309  ;;  %4200 = vst [vmem:[%s5745_s20 + $0xe0] sm:$0xff] %v5308_v59  ;;  %3739 = vadd.xlane.f32.xlu0 %v3738_v43  ;;  %v3640_v26 = vmul.f32 0.0, %v7698_v52  ;;  %v7719_v5 = vadd.f32 %v7328_v6, %v7312_v22 }
 0x38c   : > { %v5312_v12 = vpop.eup %5311  ;;  %4194 = vst [vmem:[%s5745_s20 + $0xb0] sm:$0xff] %v5310_v18  ;;  %3748 = vadd.xlane.f32.xlu1 %v3747_v62  ;;  %v3771_v18 = vadd.f32 %v8062_v58, %v3632_v39  ;;  %v7724_v62 = vadd.f32 %v7316_v30, %v7366_v36  ;;  %v4673_v39 = vmul.f32 -1.442695, %v7540_v60 }
 0x38d   : > { %v3129_v15 = vadd.f32 1.0, %v5312_v12  ;;  %v5314_v54 = vpop.eup %5313  ;;  %v4672_v12 = vmul.f32 -1.442695, %v7517_v48  ;;  %v3780_v43 = vadd.f32 %v8063_v41, %v3640_v26  ;;  %v8064_v48 = vld [vmem:[#allocation33_spill] sm:$0xff] }
 0x38e   : > { %v5316_v45 = vpop.eup %5315  ;;  %v3135_v21 = vadd.f32 1.0, %v5314_v54  ;;  %v7710_v33 = vadd.f32 %v3771_v18, %v3633_v32  ;;  %v4674_v32 = vmul.f32 -1.442695, %v7599_v29  ;;  %v8067_v41 = vld [vmem:[#allocation41_spill] sm:$0xff] }
 0x38f   : > { %5329 = vrcp.f32 %v3129_v15  ;;  %v5318_v31 = vpop.eup %5317  ;;  %v3136_v4 = vadd.f32 1.0, %v5316_v45  ;;  %v7714_v15 = vadd.f32 %v7392_v56, %v7271_v2  ;;  %v7728_v45 = vadd.f32 %v8064_v48, %v7366_v36 }
 0x390   : > { %v5320_v27 = vpop.eup %5319  ;;  %5331 = vrcp.f32 %v3135_v21  ;;  %v3143_v42 = vadd.f32 1.0, %v5318_v31  ;;  %v3618_v31 = vmul.f32 0.0, %v7706_v19 }
 0x391   : > { %v5322_v44 = vpop.eup %5321  ;;  %5333 = vrcp.f32 %v3136_v4  ;;  %v3137_v59 = vadd.f32 1.0, %v5320_v27  ;;  %v3641_v56 = vmul.f32 0.0, %v7714_v15  ;;  %v4666_v4 = vmul.f32 -1.442695, %v7586_v53  ;;  %v8065_v53 = vld [vmem:[#allocation34_spill] sm:$0xff] }
 0x392   : > { %5335 = vrcp.f32 %v3143_v42  ;;  %v3144_v9 = vadd.f32 1.0, %v5322_v44  ;;  %v5324_v7 = vpop.eup %5323  ;;  %v3626_v44 = vmul.f32 0.0, %v7719_v5  ;;  %v3627_v60 = vmul.f32 %v7406_v63, %v7728_v45 }
 0x393   : > { %5337 = vrcp.f32 %v3137_v59  ;;  %4201 = vst [vmem:[%s5745_s20 + $0xe8] sm:$0xff] %v5324_v7  ;;  %v5326_v54 = vpop.eup %5325  ;;  %v7734_v27 = vadd.f32 %v3780_v43, %v3641_v56  ;;  %v4680_v59 = vmul.f32 -1.442695, %v7573_v55  ;;  %v7746_v58 = vadd.f32 %v8065_v53, %v7312_v22  ;;  %v8066_v55 = vld [vmem:[#allocation40_spill] sm:$0xff] }
 0x394   : > { %5339 = vrcp.f32 %v3144_v9  ;;  %v3145_v21 = vadd.f32 1.0, %v5326_v54  ;;  %v5328_v6 = vpop.eup %5327  ;;  %v3755_v29 = vadd.f32 %v7668_v35, %v3618_v31  ;;  %v3764_v9 = vadd.f32 %v7682_v28, %v3626_v44  ;;  %v8068_v54 = vld [vmem:[#allocation43_spill] sm:$0xff] }
 0x395   : > { %5341 = vpow2.f32 %v4665_v16  ;;  %v3151_v42 = vadd.f32 1.0, %v5328_v6  ;;  %v3619_v16 = vmul.f32 %v7406_v63, %v7724_v62  ;;  %v7752_v26 = vadd.f32 %v8066_v55, %v7204_v49 }
 0x396   : > { %5343 = vpow2.f32 %v4672_v12  ;;  %v4681_v12 = vmul.f32 -1.442695, %v7577_v10  ;;  %v7758_v43 = vadd.f32 %v8067_v41, %v7271_v2  ;;  %v7762_v35 = vadd.f32 %v8068_v54, %v7204_v49 }
 0x397   : > { %5345 = vrcp.f32 %v3145_v21  ;;  %v3756_v28 = vadd.f32 %v3755_v29, %v3619_v16  ;;  %v3765_v56 = vadd.f32 %v3764_v9, %v3627_v60  ;;  %v8069_v21 = vld [vmem:[#allocation42_spill] sm:$0xff]  ;;  %v4688_v6 = vmul.f32 -1.442695, %v7581_v51  ;;  %v8070_v51 = vld [vmem:[#allocation35_spill] sm:$0xff]  ;;  %v8073_v9 = vld [vmem:[#allocation37_spill] sm:$0xff] }
 0x398   : > { %5347 = vrcp.f32 %v3151_v42  ;;  %v7767_v31 = vadd.f32 %v8069_v21, %v7312_v22  ;;  %v3649_v49 = vmul.f32 0.0, %v7758_v43  ;;  %v3634_v44 = vmul.f32 0.0, %v7746_v58 }
 0x399   : > { %v5330_v30 = vpop.eup %5329  ;;  %5349 = vpow2.f32 %v4666_v4  ;;  %v4682_v4 = vmul.f32 -1.442695, %v7641_v50  ;;  %3757 = vadd.xlane.f32.xlu0 %v3756_v28  ;;  %3766 = vadd.xlane.f32.xlu1 %v3765_v56  ;;  %v3656_v16 = vmul.f32 0.0, %v7762_v35  ;;  %v7781_v60 = vadd.f32 %v8070_v51, %v7366_v36  ;;  %v8071_v50 = vld [vmem:[#allocation36_spill] sm:$0xff] }
 0x39a   : > { %4202 = vst [vmem:[%s5745_s20 + $0xf0] sm:$0xff] %v5330_v30  ;;  %v5332_v18 = vpop.eup %5331  ;;  %5351 = vpow2.f32 %v4673_v39  ;;  %v3648_v30 = vmul.f32 0.0, %v7752_v26  ;;  %v4689_v39 = vmul.f32 -1.442695, %v7605_v14  ;;  %v7785_v53 = vadd.f32 %v8071_v50, %v7312_v22 }
 0x39b   : > { %v5334_v7 = vpop.eup %5333  ;;  %4208 = vst [vmem:[%s5745_s20 + $0x120] sm:$0xff] %v5332_v18  ;;  %5353 = vpow2.f32 %v4674_v32  ;;  %v8072_v18 = vld [vmem:[#allocation25_spill] sm:$0xff]  ;;  %v7790_v14 = vadd.f32 %v7446_v40, %v7271_v2  ;;  %v7794_v55 = vadd.f32 %v8073_v9, %v7366_v36  ;;  %v3650_v54 = vmul.f32 0.0, %v7767_v31 }
 0x39c   : > { %v5336_v48 = vpop.eup %5335  ;;  %4209 = vst [vmem:[%s5745_s20 + $0x128] sm:$0xff] %v5334_v7  ;;  %v3789_v29 = vadd.f32 %v8072_v18, %v3648_v30  ;;  %5355 = vpow2.f32 %v4680_v59  ;;  %v8074_v7 = vld [vmem:[#allocation26_spill] sm:$0xff]  ;;  %v7800_v21 = vadd.f32 %v7443_v34, %v7366_v36  ;;  %v3642_v30 = vmul.f32 0.0, %v7785_v53 }
 0x39d   : > { %v5338_v10 = vpop.eup %5337  ;;  %4216 = vst [vmem:[%s5745_s20 + $0x160] sm:$0xff] %v5336_v48  ;;  %v3798_v41 = vadd.f32 %v8074_v7, %v3656_v16  ;;  %5357 = vpow2.f32 %v4681_v12  ;;  %v3657_v59 = vmul.f32 0.0, %v7790_v14  ;;  %v3635_v12 = vmul.f32 %v7406_v63, %v7781_v60 }
 0x39e   : > { %v5340_v42 = vpop.eup %5339  ;;  %4210 = vst [vmem:[%s5745_s20 + $0x130] sm:$0xff] %v5338_v10  ;;  %v3790_v56 = vadd.f32 %v3789_v29, %v3649_v49  ;;  %5359 = vpow2.f32 %v4688_v6  ;;  %v7805_v10 = vadd.f32 %v7448_v25, %v7312_v22  ;;  %v3773_v6 = vadd.f32 %v7710_v33, %v3634_v44 }
 0x39f   : > { %4217 = vst [vmem:[%s5745_s20 + $0x168] sm:$0xff] %v5340_v42  ;;  %v5342_v32 = vpop.eup %5341  ;;  %v3799_v34 = vadd.f32 %v3798_v41, %v3657_v59  ;;  %v7813_v42 = vadd.f32 %v7451_v37, %v7366_v36  ;;  %v3643_v22 = vmul.f32 %v7406_v63, %v7794_v55  ;;  %v3782_v25 = vadd.f32 %v7734_v27, %v3642_v30 }
 0x3a0   : > { %v5344_v48 = vpop.eup %5343  ;;  %v3152_v28 = vadd.f32 1.0, %v5342_v32  ;;  %v3791_v51 = vadd.f32 %v3790_v56, %v3650_v54  ;;  %v3651_v29 = vmul.f32 %v7406_v63, %v7800_v21  ;;  %v3658_v36 = vmul.f32 0.0, %v7805_v10 }
 0x3a1   : > { %v5346_v2 = vpop.eup %5345  ;;  %v3159_v40 = vadd.f32 1.0, %v5344_v48  ;;  %v3774_v32 = vadd.f32 %v3773_v6, %v3635_v12  ;;  %v3783_v33 = vadd.f32 %v3782_v25, %v3643_v22  ;;  %v4704_v25 = vmul.f32 -1.442695, %v7648_v8 }
 0x3a2   : > { %4218 = vst [vmem:[%s5745_s20 + $0x170] sm:$0xff] %v5346_v2  ;;  %5361 = vrcp.f32 %v3152_v28  ;;  %v5348_v49 = vpop.eup %5347  ;;  %v3792_v9 = vadd.f32 %v3791_v51, %v3651_v29  ;;  %v3800_v7 = vadd.f32 %v3799_v34, %v3658_v36  ;;  %v4690_v2 = vmul.f32 -1.442695, %v7653_v57 }
 0x3a3   : > { %5363 = vrcp.f32 %v3159_v40  ;;  %v5350_v16 = vpop.eup %5349  ;;  %4224 = vst [vmem:[%s5745_s20 + $0x1a0] sm:$0xff] %v5348_v49  ;;  %3775 = vadd.xlane.f32.xlu0 %v3774_v32  ;;  %3784 = vadd.xlane.f32.xlu1 %v3783_v33  ;;  %v4696_v57 = vmul.f32 -1.442695, %v7629_v3  ;;  %v4698_v51 = vmul.f32 -1.442695, %v7706_v19 }
 0x3a4   : > { %5365 = vpow2.f32 %v4682_v4  ;;  %v5352_v50 = vpop.eup %5351  ;;  %v3153_v18 = vadd.f32 1.0, %v5350_v16  ;;  %v3659_v4 = vmul.f32 %v7406_v63, %v7813_v42  ;;  %v4697_v16 = vmul.f32 -1.442695, %v7633_v11 }
 0x3a5   : > { %5367 = vpow2.f32 %v4689_v39  ;;  %v3160_v37 = vadd.f32 1.0, %v5352_v50  ;;  %v5354_v44 = vpop.eup %5353  ;;  %v4706_v11 = vmul.f32 -1.442695, %v7719_v5  ;;  %v4713_v32 = vmul.f32 -1.442695, %v7694_v20 }
 0x3a6   : > { %5369 = vrcp.f32 %v3153_v18  ;;  %v3161_v27 = vadd.f32 1.0, %v5354_v44  ;;  %v5356_v39 = vpop.eup %5355  ;;  %v3801_v41 = vadd.f32 %v3800_v7, %v3659_v4  ;;  %v4705_v18 = vmul.f32 -1.442695, %v7658_v13 }
 0x3a7   : > { %5371 = vrcp.f32 %v3160_v37  ;;  %v5358_v54 = vpop.eup %5357  ;;  %v3167_v48 = vadd.f32 1.0, %v5356_v39  ;;  %3793 = vadd.xlane.f32.xlu0 %v3792_v9  ;;  %v4712_v13 = vmul.f32 -1.442695, %v7690_v24  ;;  %v4720_v5 = vmul.f32 -1.442695, %v7698_v52 }
 0x3a8   : > { %5373 = vrcp.f32 %v3161_v27  ;;  %v5360_v28 = vpop.eup %5359  ;;  %v3168_v56 = vadd.f32 1.0, %v5358_v54  ;;  %3802 = vadd.xlane.f32.xlu1 %v3801_v41 }
 0x3a9   : > { %5375 = vrcp.f32 %v3167_v48  ;;  %v3175_v63 = vadd.f32 1.0, %v5360_v28  ;;  %v4714_v28 = vmul.f32 -1.442695, %v7746_v58  ;;  %v4722_v58 = vmul.f32 -1.442695, %v7785_v53 }
 0x3aa   : > { %5377 = vrcp.f32 %v3168_v56  ;;  %v4730_v53 = vmul.f32 -1.442695, %v7767_v31 }
 0x3ab   : > { %5379 = vrcp.f32 %v3175_v63 }
 0x3ac   : > { %v5362_v40 = vpop.eup %5361  ;;  %5381 = vpow2.f32 %v4690_v2  ;;  %v4721_v2 = vmul.f32 -1.442695, %v7714_v15 }
 0x3ad   : > { %v5364_v59 = vpop.eup %5363  ;;  %4225 = vst [vmem:[%s5745_s20 + $0x1a8] sm:$0xff] %v5362_v40 }
 0x3ae   : > { %v5366_v12 = vpop.eup %5365  ;;  %4232 = vst [vmem:[%s5745_s20 + $0x1e0] sm:$0xff] %v5364_v59 }
 0x3af   : > { %v5368_v30 = vpop.eup %5367  ;;  %v3169_v49 = vadd.f32 1.0, %v5366_v12 }
 0x3b0   : > { %v3176_v34 = vadd.f32 1.0, %v5368_v30  ;;  %v5370_v6 = vpop.eup %5369 }
 0x3b1   : > { %5383 = vrcp.f32 %v3169_v49  ;;  %v5372_v22 = vpop.eup %5371  ;;  %4226 = vst [vmem:[%s5745_s20 + $0x1b0] sm:$0xff] %v5370_v6  ;;  %v4728_v6 = vmul.f32 -1.442695, %v7752_v26 }
 0x3b2   : > { %5385 = vrcp.f32 %v3176_v34  ;;  %4233 = vst [vmem:[%s5745_s20 + $0x1e8] sm:$0xff] %v5372_v22  ;;  %v5374_v50 = vpop.eup %5373  ;;  %v4729_v22 = vmul.f32 -1.442695, %v7758_v43 }
 0x3b3   : > { %5387 = vpow2.f32 %v4696_v57  ;;  %4234 = vst [vmem:[%s5745_s20 + $0x1f0] sm:$0xff] %v5374_v50  ;;  %v5376_v3 = vpop.eup %5375 }
 0x3b4   : > { %5389 = vpow2.f32 %v4697_v16  ;;  %v5378_v29 = vpop.eup %5377  ;;  %4240 = vst [vmem:[%s5745_s20 + $0x220] sm:$0xff] %v5376_v3 }
 0x3b5   : > { %5391 = vpow2.f32 %v4704_v25  ;;  %v5380_v8 = vpop.eup %5379  ;;  %4241 = vst [vmem:[%s5745_s20 + $0x228] sm:$0xff] %v5378_v29 }
 0x3b6   : > { %5393 = vpow2.f32 %v4698_v51  ;;  %v5382_v19 = vpop.eup %5381  ;;  %4248 = vst [vmem:[%s5745_s20 + $0x260] sm:$0xff] %v5380_v8  ;;  %v4736_v51 = vmul.f32 -1.442695, %v7762_v35  ;;  %v4738_v35 = vmul.f32 -1.442695, %v7805_v10 }
 0x3b7   : > { %5395 = vpow2.f32 %v4705_v18  ;;  %v3177_v36 = vadd.f32 1.0, %v5382_v19  ;;  %v4737_v18 = vmul.f32 -1.442695, %v7790_v14 }
 0x3b8   : > { %5397 = vpow2.f32 %v4706_v11 }
 0x3b9   : > { %5399 = vrcp.f32 %v3177_v36 }
 0x3ba   : > { %5401 = vpow2.f32 %v4712_v13 }
 0x3bb   : > { %v5384_v37 = vpop.eup %5383  ;;  %5403 = vpow2.f32 %v4713_v32 }
 0x3bc   : > { %v5386_v33 = vpop.eup %5385  ;;  %4242 = vst [vmem:[%s5745_s20 + $0x230] sm:$0xff] %v5384_v37  ;;  %5405 = vpow2.f32 %v4720_v5 }
 0x3bd   : > { %4249 = vst [vmem:[%s5745_s20 + $0x268] sm:$0xff] %v5386_v33  ;;  %v5388_v44 = vpop.eup %5387 }
 0x3be   : > { %v5390_v4 = vpop.eup %5389  ;;  %v3183_v9 = vadd.f32 1.0, %v5388_v44 }
 0x3bf   : > { %v5392_v7 = vpop.eup %5391  ;;  %v3184_v27 = vadd.f32 1.0, %v5390_v4 }
 0x3c0   : > { %v5394_v39 = vpop.eup %5393  ;;  %5407 = vrcp.f32 %v3183_v9  ;;  %v3191_v24 = vadd.f32 1.0, %v5392_v7  ;;  %v8075_v7 = vld [vmem:[#allocation38_spill] sm:$0xff] }
 0x3c1   : > { %v5396_v41 = vpop.eup %5395  ;;  %5409 = vrcp.f32 %v3184_v27  ;;  %v3185_v20 = vadd.f32 1.0, %v5394_v39  ;;  %v4619_v27 = vmul.f32 -1.442695, %v8075_v7 }
 0x3c2   : > { %5411 = vrcp.f32 %v3191_v24  ;;  %v3192_v54 = vadd.f32 1.0, %v5396_v41  ;;  %v5398_v48 = vpop.eup %5397  ;;  %v8076_v41 = vld [vmem:[#allocation39_spill] sm:$0xff] }
 0x3c3   : > { %5413 = vrcp.f32 %v3185_v20  ;;  %v3193_v52 = vadd.f32 1.0, %v5398_v48  ;;  %v5400_v56 = vpop.eup %5399  ;;  %v4627_v20 = vmul.f32 -1.442695, %v8076_v41 }
 0x3c4   : > { %5415 = vrcp.f32 %v3192_v54  ;;  %4250 = vst [vmem:[%s5745_s20 + $0x270] sm:$0xff] %v5400_v56  ;;  %v5402_v40 = vpop.eup %5401 }
 0x3c5   : > { %5417 = vrcp.f32 %v3193_v52  ;;  %v5404_v63 = vpop.eup %5403  ;;  %v3199_v59 = vadd.f32 1.0, %v5402_v40 }
 0x3c6   : > { %5419 = vpow2.f32 %v4714_v28  ;;  %v5406_v12 = vpop.eup %5405  ;;  %v3200_v30 = vadd.f32 1.0, %v5404_v63 }
 0x3c7   : > { %5421 = vpow2.f32 %v4721_v2  ;;  %v3207_v34 = vadd.f32 1.0, %v5406_v12 }
 0x3c8   : > { %5423 = vrcp.f32 %v3199_v59 }
 0x3c9   : > { %5425 = vrcp.f32 %v3200_v30 }
 0x3ca   : > { %v5408_v49 = vpop.eup %5407  ;;  %5427 = vrcp.f32 %v3207_v34 }
 0x3cb   : > { %v5410_v57 = vpop.eup %5409  ;;  %4256 = vst [vmem:[%s5745_s20 + $0x2a0] sm:$0xff] %v5408_v49  ;;  %5429 = vpow2.f32 %v4722_v58 }
 0x3cc   : > { %v5412_v15 = vpop.eup %5411  ;;  %4257 = vst [vmem:[%s5745_s20 + $0x2a8] sm:$0xff] %v5410_v57  ;;  %5431 = vpow2.f32 %v4728_v6 }
 0x3cd   : > { %v5414_v16 = vpop.eup %5413  ;;  %4264 = vst [vmem:[%s5745_s20 + $0x2e0] sm:$0xff] %v5412_v15  ;;  %5433 = vpow2.f32 %v4729_v22 }
 0x3ce   : > { %v5416_v25 = vpop.eup %5415  ;;  %4258 = vst [vmem:[%s5745_s20 + $0x2b0] sm:$0xff] %v5414_v16  ;;  %5435 = vpow2.f32 %v4736_v51  ;;  %v4635_v16 = vmul.f32 -1.442695, %v7495_v61 }
 0x3cf   : > { %4265 = vst [vmem:[%s5745_s20 + $0x2e8] sm:$0xff] %v5416_v25  ;;  %v5418_v50 = vpop.eup %5417  ;;  %5437 = vpow2.f32 %v4730_v53  ;;  %v4643_v25 = vmul.f32 -1.442695, %v7487_v1  ;;  %v4651_v53 = vmul.f32 -1.442695, %v7545_v46 }
 0x3d0   : > { %4266 = vst [vmem:[%s5745_s20 + $0x2f0] sm:$0xff] %v5418_v50  ;;  %v5420_v26 = vpop.eup %5419  ;;  %5439 = vpow2.f32 %v4737_v18 }
 0x3d1   : > { %v5422_v43 = vpop.eup %5421  ;;  %v3201_v3 = vadd.f32 1.0, %v5420_v26 }
 0x3d2   : > { %v5424_v11 = vpop.eup %5423  ;;  %v3208_v29 = vadd.f32 1.0, %v5422_v43  ;;  %v4659_v43 = vmul.f32 -1.442695, %v7549_v38 }
 0x3d3   : > { %v5426_v31 = vpop.eup %5425  ;;  %4272 = vst [vmem:[%s5745_s20 + $0x320] sm:$0xff] %v5424_v11  ;;  %5441 = vrcp.f32 %v3201_v3 }
 0x3d4   : > { %v5428_v8 = vpop.eup %5427  ;;  %4273 = vst [vmem:[%s5745_s20 + $0x328] sm:$0xff] %v5426_v31  ;;  %5443 = vrcp.f32 %v3208_v29 }
 0x3d5   : > { %4280 = vst [vmem:[%s5745_s20 + $0x360] sm:$0xff] %v5428_v8  ;;  %v5430_v14 = vpop.eup %5429  ;;  %5445 = vpow2.f32 %v4738_v35 }
 0x3d6   : > { %v3209_v19 = vadd.f32 1.0, %v5430_v14  ;;  %v5432_v36 = vpop.eup %5431 }
 0x3d7   : > { %v5434_v13 = vpop.eup %5433  ;;  %v3215_v37 = vadd.f32 1.0, %v5432_v36 }
 0x3d8   : > { %5447 = vrcp.f32 %v3209_v19  ;;  %v5436_v32 = vpop.eup %5435  ;;  %v3216_v33 = vadd.f32 1.0, %v5434_v13 }
 0x3d9   : > { %v5438_v5 = vpop.eup %5437  ;;  %5449 = vrcp.f32 %v3215_v37  ;;  %v3223_v10 = vadd.f32 1.0, %v5436_v32 }
 0x3da   : > { %v5440_v44 = vpop.eup %5439  ;;  %5451 = vrcp.f32 %v3216_v33  ;;  %v3217_v4 = vadd.f32 1.0, %v5438_v5 }
 0x3db   : > { %5453 = vrcp.f32 %v3223_v10  ;;  %v3224_v39 = vadd.f32 1.0, %v5440_v44 }
 0x3dc   : > { %5455 = vrcp.f32 %v3217_v4  ;;  %v4667_v4 = vmul.f32 -1.442695, %v7595_v0 }
 0x3dd   : > { %v5442_v9 = vpop.eup %5441  ;;  %5457 = vrcp.f32 %v3224_v39 }
 0x3de   : > { %v5444_v24 = vpop.eup %5443  ;;  %4274 = vst [vmem:[%s5745_s20 + $0x330] sm:$0xff] %v5442_v9  ;;  %5459 = vpow2.f32 %v4619_v27 }
 0x3df   : > { %4281 = vst [vmem:[%s5745_s20 + $0x368] sm:$0xff] %v5444_v24  ;;  %v5446_v54 = vpop.eup %5445  ;;  %5461 = vpow2.f32 %v4627_v20 }
 0x3e0   : > { %v3225_v48 = vadd.f32 1.0, %v5446_v54 }
 0x3e2   : > { %v5448_v52 = vpop.eup %5447  ;;  %5463 = vrcp.f32 %v3225_v48 }
 0x3e3   : > { %4282 = vst [vmem:[%s5745_s20 + $0x370] sm:$0xff] %v5448_v52  ;;  %v5450_v28 = vpop.eup %5449  ;;  %v4675_v52 = vmul.f32 -1.442695, %v7611_v17 }
 0x3e4   : > { %v5452_v56 = vpop.eup %5451  ;;  %4288 = vst [vmem:[%s5745_s20 + $0x3a0] sm:$0xff] %v5450_v28 }
 0x3e5   : > { %v5454_v40 = vpop.eup %5453  ;;  %4289 = vst [vmem:[%s5745_s20 + $0x3a8] sm:$0xff] %v5452_v56 }
 0x3e6   : > { %v5456_v59 = vpop.eup %5455  ;;  %4296 = vst [vmem:[%s5745_s20 + $0x3e0] sm:$0xff] %v5454_v40 }
 0x3e7   : > { %v5458_v12 = vpop.eup %5457  ;;  %4290 = vst [vmem:[%s5745_s20 + $0x3b0] sm:$0xff] %v5456_v59 }
 0x3e8   : > { %4297 = vst [vmem:[%s5745_s20 + $0x3e8] sm:$0xff] %v5458_v12  ;;  %v5460_v49 = vpop.eup %5459 }
 0x3e9   : > { %v5462_v58 = vpop.eup %5461  ;;  %v3106_v15 = vadd.f32 1.0, %v5460_v49 }
 0x3ea   : > { %v3668_v2 = vpop.xlane.xlu0 %3667  ;;  %v3114_v6 = vadd.f32 1.0, %v5462_v58  ;;  %v4683_v58 = vmul.f32 -1.442695, %v7666_v23 }
 0x3eb   : > { %v4740_v63 = vmul.f32 -1.442695, %v3668_v2 }
 0x3ec   : > { %v5464_v57 = vpop.eup %5463 }
 0x3ed   : > { %5465 = vpow2.f32 %v4740_v63  ;;  %4298 = vst [vmem:[%s5745_s20 + $0x3f0] sm:$0xff] %v5464_v57 }
 0x3ee   : > { %v3677_v30 = vpop.xlane.xlu0 %3676 }
 0x3ef   : > { %v4741_v34 = vmul.f32 -1.442695, %v3677_v30 }
 0x3f1   : > { %5467 = vpow2.f32 %v4741_v34 }
 0x3f2   : > { %5469 = vrcp.f32 %v3106_v15 }
 0x3f3   : > { %5471 = vrcp.f32 %v3114_v6 }
 0x3f4   : > { %5473 = vpow2.f32 %v4635_v16 }
 0x3f7   : > { %v5466_v22 = vpop.eup %5465 }
 0x3f8   : > { %v3852_v51 = vadd.f32 1.0, %v5466_v22 }
 0x3f9   : > { %v3686_v50 = vpop.xlane.xlu1 %3685 }
 0x3fa   : > { %5475 = vrcp.f32 %v3852_v51  ;;  %v4742_v18 = vmul.f32 -1.442695, %v3686_v50 }
 0x3fb   : > { %v5468_v26 = vpop.eup %5467  ;;  %5477 = vpow2.f32 %v4643_v25  ;;  %v4691_v25 = vmul.f32 -1.442695, %v7672_v47 }
 0x3fc   : > { %v3853_v3 = vadd.f32 1.0, %v5468_v26  ;;  %5479 = vpow2.f32 %v4742_v18  ;;  %v5470_v1 = vpop.eup %5469 }
 0x3fd   : > { %5481 = vpow2.f32 %v4651_v53  ;;  %v3695_v61 = vpop.xlane.xlu1 %3694  ;;  %v5472_v29 = vpop.eup %5471 }
 0x3fe   : > { %5483 = vrcp.f32 %v3853_v3  ;;  %v4743_v11 = vmul.f32 -1.442695, %v3695_v61  ;;  %v5474_v46 = vpop.eup %5473 }
 0x3ff   : > { %5485 = vpow2.f32 %v4659_v43  ;;  %v3122_v32 = vadd.f32 1.0, %v5474_v46 }
 0x400   : > { %5487 = vpow2.f32 %v4743_v11  ;;  %v4699_v11 = vmul.f32 -1.442695, %v7724_v62 }
 0x401   : > { %v3704_v35 = vpop.xlane.xlu0 %3703  ;;  %v3713_v31 = vpop.xlane.xlu1 %3712 }
 0x402   : > { %v4744_v8 = vmul.f32 -1.442695, %v3704_v35  ;;  %v4745_v14 = vmul.f32 -1.442695, %v3713_v31 }
 0x404   : > { %v5476_v19 = vpop.eup %5475  ;;  %5489 = vpow2.f32 %v4744_v8  ;;  %v4707_v8 = vmul.f32 -1.442695, %v7728_v45 }
 0x405   : > { %v5478_v36 = vpop.eup %5477  ;;  %v3900_v13 = vsub.f32 1.0, %v5476_v19  ;;  %5491 = vpow2.f32 %v4745_v14 }
 0x406   : > { %v5480_v38 = vpop.eup %5479  ;;  %v3130_v24 = vadd.f32 1.0, %v5478_v36 }
 0x407   : > { %v5482_v37 = vpop.eup %5481  ;;  %v3923_v5 = vsel %vm3507_vm3, %v3900_v13, %v5470_v1  ;;  %v3854_v10 = vadd.f32 1.0, %v5480_v38 }
 0x408   : > { %v5484_v44 = vpop.eup %5483  ;;  %v4051_v9 = vsel %vm3499_vm2, %v5476_v19, %v3923_v5  ;;  %v3138_v41 = vadd.f32 1.0, %v5482_v37 }
 0x409   : > { %v5486_v7 = vpop.eup %5485  ;;  %4179 = vst [vmem:[%s5745_s20 + $0x38] sm:$0xff] %v4051_v9  ;;  %v3901_v27 = vsub.f32 1.0, %v5484_v44  ;;  %5493 = vrcp.f32 %v3854_v10 }
 0x40a   : > { %v5488_v39 = vpop.eup %5487  ;;  %5495 = vrcp.f32 %v3122_v32  ;;  %v3146_v48 = vadd.f32 1.0, %v5486_v7 }
 0x40b   : > { %v3931_v20 = vsel %vm3507_vm3, %v3901_v27, %v5472_v29  ;;  %v3855_v54 = vadd.f32 1.0, %v5488_v39  ;;  %5497 = vpow2.f32 %v4667_v4 }
 0x40c   : > { %v4059_v0 = vsel %vm3499_vm2, %v5484_v44, %v3931_v20  ;;  %v3722_v40 = vpop.xlane.xlu0 %3721 }
 0x40d   : > { %4187 = vst [vmem:[%s5745_s20 + $0x78] sm:$0xff] %v4059_v0  ;;  %5499 = vrcp.f32 %v3855_v54  ;;  %v4746_v59 = vmul.f32 -1.442695, %v3722_v40  ;;  %v3731_v12 = vpop.xlane.xlu1 %3730 }
 0x40e   : > { %5501 = vrcp.f32 %v3130_v24  ;;  %v5490_v28 = vpop.eup %5489  ;;  %v4747_v30 = vmul.f32 -1.442695, %v3731_v12 }
 0x40f   : > { %5503 = vrcp.f32 %v3138_v41  ;;  %v5492_v56 = vpop.eup %5491  ;;  %v3856_v2 = vadd.f32 1.0, %v5490_v28 }
 0x410   : > { %5505 = vrcp.f32 %v3146_v48  ;;  %v3857_v63 = vadd.f32 1.0, %v5492_v56 }
 0x411   : > { %5507 = vpow2.f32 %v4675_v52 }
 0x412   : > { %5509 = vrcp.f32 %v3856_v2 }
 0x413   : > { %v5494_v49 = vpop.eup %5493  ;;  %5511 = vrcp.f32 %v3857_v63 }
 0x414   : > { %v3902_v34 = vsub.f32 1.0, %v5494_v49  ;;  %5513 = vpow2.f32 %v4746_v59  ;;  %v5496_v17 = vpop.eup %5495 }
 0x415   : > { %5515 = vpow2.f32 %v4747_v30  ;;  %v5498_v57 = vpop.eup %5497 }
 0x416   : > { %v3939_v15 = vsel %vm3507_vm3, %v3902_v34, %v5496_v17  ;;  %v3154_v50 = vadd.f32 1.0, %v5498_v57  ;;  %5517 = vpow2.f32 %v4683_v58  ;;  %v4715_v34 = vmul.f32 -1.442695, %v7781_v60 }
 0x417   : > { %v5500_v6 = vpop.eup %5499  ;;  %v4067_v16 = vsel %vm3499_vm2, %v5494_v49, %v3939_v15  ;;  %5519 = vpow2.f32 %v4691_v25  ;;  %v4723_v57 = vmul.f32 -1.442695, %v7794_v55  ;;  %v4731_v15 = vmul.f32 -1.442695, %v7800_v21 }
 0x418   : > { %v5502_v22 = vpop.eup %5501  ;;  %4195 = vst [vmem:[%s5745_s20 + $0xb8] sm:$0xff] %v4067_v16  ;;  %v3903_v51 = vsub.f32 1.0, %v5500_v6  ;;  %v3740_v3 = vpop.xlane.xlu0 %3739  ;;  %5521 = vrcp.f32 %v3154_v50  ;;  %v4739_v16 = vmul.f32 -1.442695, %v7813_v42 }
 0x419   : > { %v5504_v53 = vpop.eup %5503  ;;  %v4748_v47 = vmul.f32 -1.442695, %v3740_v3  ;;  %v3749_v1 = vpop.xlane.xlu1 %3748 }
 0x41a   : > { %v5506_v18 = vpop.eup %5505  ;;  %v3947_v23 = vsel %vm3507_vm3, %v3903_v51, %v5502_v22  ;;  %v4749_v31 = vmul.f32 -1.442695, %v3749_v1 }
 0x41b   : > { %v5508_v26 = vpop.eup %5507  ;;  %v4075_v43 = vsel %vm3499_vm2, %v5500_v6, %v3947_v23  ;;  %5523 = vpow2.f32 %v4748_v47 }
 0x41c   : > { %v5510_v61 = vpop.eup %5509  ;;  %4203 = vst [vmem:[%s5745_s20 + $0xf8] sm:$0xff] %v4075_v43  ;;  %v3162_v36 = vadd.f32 1.0, %v5508_v26  ;;  %5525 = vpow2.f32 %v4749_v31 }
 0x41d   : > { %v5512_v29 = vpop.eup %5511  ;;  %v3904_v35 = vsub.f32 1.0, %v5510_v61  ;;  %5527 = vpow2.f32 %v4699_v11 }
 0x41e   : > { %v5514_v46 = vpop.eup %5513  ;;  %v3905_v14 = vsub.f32 1.0, %v5512_v29 }
 0x41f   : > { %v5516_v19 = vpop.eup %5515  ;;  %v3955_v13 = vsel %vm3507_vm3, %v3904_v35, %v5504_v53  ;;  %v3858_v62 = vadd.f32 1.0, %v5514_v46 }
 0x420   : > { %v4083_v38 = vsel %vm3499_vm2, %v5510_v61, %v3955_v13  ;;  %v3963_v37 = vsel %vm3507_vm3, %v3905_v14, %v5506_v18  ;;  %v3859_v32 = vadd.f32 1.0, %v5516_v19  ;;  %v5518_v5 = vpop.eup %5517 }
 0x421   : > { %4211 = vst [vmem:[%s5745_s20 + $0x138] sm:$0xff] %v4083_v38  ;;  %v4091_v45 = vsel %vm3499_vm2, %v5512_v29, %v3963_v37  ;;  %5529 = vrcp.f32 %v3858_v62  ;;  %v5520_v10 = vpop.eup %5519  ;;  %v3170_v44 = vadd.f32 1.0, %v5518_v5 }
 0x422   : > { %4219 = vst [vmem:[%s5745_s20 + $0x178] sm:$0xff] %v4091_v45  ;;  %5531 = vrcp.f32 %v3859_v32  ;;  %v5522_v4 = vpop.eup %5521  ;;  %v3178_v27 = vadd.f32 1.0, %v5520_v10 }
 0x423   : > { %5533 = vrcp.f32 %v3162_v36 }
 0x424   : > { %5535 = vpow2.f32 %v4707_v8 }
 0x425   : > { %v5524_v9 = vpop.eup %5523  ;;  %5537 = vrcp.f32 %v3170_v44 }
 0x426   : > { %v5526_v7 = vpop.eup %5525  ;;  %v3860_v39 = vadd.f32 1.0, %v5524_v9  ;;  %v3758_v54 = vpop.xlane.xlu0 %3757 }
 0x427   : > { %v5528_v24 = vpop.eup %5527  ;;  %v3861_v41 = vadd.f32 1.0, %v5526_v7  ;;  %v3767_v48 = vpop.xlane.xlu1 %3766  ;;  %v4750_v28 = vmul.f32 -1.442695, %v3758_v54 }
 0x428   : > { %5539 = vrcp.f32 %v3860_v39  ;;  %v4751_v56 = vmul.f32 -1.442695, %v3767_v48  ;;  %v3186_v12 = vadd.f32 1.0, %v5528_v24 }
 0x429   : > { %5541 = vrcp.f32 %v3861_v41 }
 0x42a   : > { %5543 = vrcp.f32 %v3178_v27 }
 0x42b   : > { %v5530_v20 = vpop.eup %5529  ;;  %5545 = vpow2.f32 %v4750_v28 }
 0x42c   : > { %v5532_v0 = vpop.eup %5531  ;;  %v3906_v52 = vsub.f32 1.0, %v5530_v20  ;;  %5547 = vpow2.f32 %v4751_v56 }
 0x42d   : > { %v5534_v2 = vpop.eup %5533  ;;  %v3907_v40 = vsub.f32 1.0, %v5532_v0  ;;  %5549 = vrcp.f32 %v3186_v12 }
 0x42e   : > { %v5536_v63 = vpop.eup %5535  ;;  %v3971_v59 = vsel %vm3507_vm3, %v3906_v52, %v5522_v4  ;;  %5551 = vpow2.f32 %v4715_v34 }
 0x42f   : > { %v4099_v30 = vsel %vm3499_vm2, %v5530_v20, %v3971_v59  ;;  %v3979_v49 = vsel %vm3507_vm3, %v3907_v40, %v5534_v2  ;;  %v3194_v58 = vadd.f32 1.0, %v5536_v63  ;;  %v5538_v6 = vpop.eup %5537 }
 0x430   : > { %4227 = vst [vmem:[%s5745_s20 + $0x1b8] sm:$0xff] %v4099_v30  ;;  %v4107_v17 = vsel %vm3499_vm2, %v5532_v0, %v3979_v49  ;;  %v3776_v51 = vpop.xlane.xlu0 %3775  ;;  %v3785_v53 = vpop.xlane.xlu1 %3784 }
 0x431   : > { %4235 = vst [vmem:[%s5745_s20 + $0x1f8] sm:$0xff] %v4107_v17  ;;  %5553 = vrcp.f32 %v3194_v58  ;;  %v4752_v23 = vmul.f32 -1.442695, %v3776_v51  ;;  %v4753_v55 = vmul.f32 -1.442695, %v3785_v53 }
 0x432   : > { %v5540_v22 = vpop.eup %5539  ;;  %5555 = vpow2.f32 %v4723_v57 }
 0x433   : > { %v5542_v25 = vpop.eup %5541  ;;  %v3908_v60 = vsub.f32 1.0, %v5540_v22  ;;  %5557 = vpow2.f32 %v4731_v15 }
 0x434   : > { %v5544_v50 = vpop.eup %5543  ;;  %v3909_v18 = vsub.f32 1.0, %v5542_v25  ;;  %5559 = vpow2.f32 %v4739_v16  ;;  %v3794_v1 = vpop.xlane.xlu0 %3793 }
 0x435   : > { %v5546_v26 = vpop.eup %5545  ;;  %v3987_v21 = vsel %vm3507_vm3, %v3908_v60, %v5538_v6  ;;  %5561 = vpow2.f32 %v4752_v23  ;;  %v3803_v29 = vpop.xlane.xlu1 %3802  ;;  %v4754_v35 = vmul.f32 -1.442695, %v3794_v1 }
 0x436   : > { %v5548_v42 = vpop.eup %5547  ;;  %v4115_v43 = vsel %vm3499_vm2, %v5540_v22, %v3987_v21  ;;  %v3995_v3 = vsel %vm3507_vm3, %v3909_v18, %v5544_v50  ;;  %v3862_v61 = vadd.f32 1.0, %v5546_v26  ;;  %5563 = vpow2.f32 %v4753_v55 }
 0x437   : > { %4243 = vst [vmem:[%s5745_s20 + $0x238] sm:$0xff] %v4115_v43  ;;  %v4123_v11 = vsel %vm3499_vm2, %v5542_v25, %v3995_v3  ;;  %v3863_v47 = vadd.f32 1.0, %v5548_v42  ;;  %v4755_v31 = vmul.f32 -1.442695, %v3803_v29  ;;  %v5550_v46 = vpop.eup %5549 }
 0x438   : > { %4251 = vst [vmem:[%s5745_s20 + $0x278] sm:$0xff] %v4123_v11  ;;  %5565 = vrcp.f32 %v3862_v61  ;;  %v5552_v8 = vpop.eup %5551 }
 0x439   : > { %5567 = vrcp.f32 %v3863_v47  ;;  %v3202_v13 = vadd.f32 1.0, %v5552_v8 }
 0x43a   : > { %5569 = vpow2.f32 %v4754_v35 }
 0x43b   : > { %5571 = vpow2.f32 %v4755_v31  ;;  %v5554_v14 = vpop.eup %5553 }
 0x43c   : > { %v5556_v19 = vpop.eup %5555  ;;  %5573 = vrcp.f32 %v3202_v13 }
 0x43d   : > { %v5558_v36 = vpop.eup %5557  ;;  %v3210_v32 = vadd.f32 1.0, %v5556_v19 }
 0x43e   : > { %v5560_v62 = vpop.eup %5559  ;;  %v3218_v39 = vadd.f32 1.0, %v5558_v36 }
 0x43f   : > { %v5562_v38 = vpop.eup %5561  ;;  %v3226_v20 = vadd.f32 1.0, %v5560_v62 }
 0x440   : > { %v5564_v37 = vpop.eup %5563  ;;  %v3864_v45 = vadd.f32 1.0, %v5562_v38 }
 0x441   : > { %v3865_v10 = vadd.f32 1.0, %v5564_v37 }
 0x442   : > { %v5566_v5 = vpop.eup %5565  ;;  %5575 = vrcp.f32 %v3864_v45 }
 0x443   : > { %v5568_v44 = vpop.eup %5567  ;;  %v3910_v4 = vsub.f32 1.0, %v5566_v5  ;;  %5577 = vrcp.f32 %v3865_v10 }
 0x444   : > { %v5570_v9 = vpop.eup %5569  ;;  %v3911_v7 = vsub.f32 1.0, %v5568_v44  ;;  %5579 = vrcp.f32 %v3210_v32 }
 0x445   : > { %v5572_v27 = vpop.eup %5571  ;;  %v4003_v24 = vsel %vm3507_vm3, %v3910_v4, %v5550_v46  ;;  %v3866_v41 = vadd.f32 1.0, %v5570_v9 }
 0x446   : > { %v4131_v54 = vsel %vm3499_vm2, %v5566_v5, %v4003_v24  ;;  %v4011_v48 = vsel %vm3507_vm3, %v3911_v7, %v5554_v14  ;;  %v3867_v0 = vadd.f32 1.0, %v5572_v27  ;;  %v5574_v28 = vpop.eup %5573 }
 0x447   : > { %4259 = vst [vmem:[%s5745_s20 + $0x2b8] sm:$0xff] %v4131_v54  ;;  %v4139_v52 = vsel %vm3499_vm2, %v5568_v44, %v4011_v48  ;;  %5581 = vrcp.f32 %v3866_v41 }
 0x448   : > { %4267 = vst [vmem:[%s5745_s20 + $0x2f8] sm:$0xff] %v4139_v52  ;;  %5583 = vrcp.f32 %v3867_v0 }
 0x449   : > { %5585 = vrcp.f32 %v3218_v39 }
 0x44a   : > { %5587 = vrcp.f32 %v3226_v20 }
 0x44c   : > { %v5576_v56 = vpop.eup %5575 }
 0x44d   : > { %v5578_v2 = vpop.eup %5577  ;;  %v3912_v40 = vsub.f32 1.0, %v5576_v56 }
 0x44e   : > { %v5580_v63 = vpop.eup %5579  ;;  %v3913_v59 = vsub.f32 1.0, %v5578_v2 }
 0x44f   : > { %v4019_v12 = vsel %vm3507_vm3, %v3912_v40, %v5574_v28 }
 0x450   : > { %v4147_v49 = vsel %vm3499_vm2, %v5576_v56, %v4019_v12  ;;  %v4027_v34 = vsel %vm3507_vm3, %v3913_v59, %v5580_v63 }
 0x451   : > { %v5582_v30 = vpop.eup %5581  ;;  %4275 = vst [vmem:[%s5745_s20 + $0x338] sm:$0xff] %v4147_v49  ;;  %v4155_v58 = vsel %vm3499_vm2, %v5578_v2, %v4027_v34 }
 0x452   : > { %v5584_v17 = vpop.eup %5583  ;;  %v3914_v57 = vsub.f32 1.0, %v5582_v30  ;;  %4283 = vst [vmem:[%s5745_s20 + $0x378] sm:$0xff] %v4155_v58 }
 0x453   : > { %v5586_v15 = vpop.eup %5585  ;;  %v3915_v6 = vsub.f32 1.0, %v5584_v17 }
 0x454   : > { %v5588_v16 = vpop.eup %5587  ;;  %v4035_v22 = vsel %vm3507_vm3, %v3914_v57, %v5586_v15 }
 0x455   : > { %v4163_v25 = vsel %vm3499_vm2, %v5582_v30, %v4035_v22  ;;  %v4043_v60 = vsel %vm3507_vm3, %v3915_v6, %v5588_v16 }
 0x456   : > { %4291 = vst [vmem:[%s5745_s20 + $0x3b8] sm:$0xff] %v4163_v25  ;;  %v4171_v51 = vsel %vm3499_vm2, %v5584_v17, %v4043_v60 }
 0x457   : > { %4299 = vst [vmem:[%s5745_s20 + $0x3f8] sm:$0xff] %v4171_v51 }
 0x458 PF: > { %s17_s28 = sadd.s32 1, %s5628_s28   ;;  %s8078_s24 = smov %s5620_s26 }
 0x459   : > { %p14_p11 = scmp.ge.s32.totalorder %s17_s28, 6   ;;  %s8079_s25 = smov %s5624_s27 }
 0x45a   : > { %s8080_s26 = smov %s8083_s29  ;;  %s8081_s27 = smov %s8087_s30 }
 0x45b   :  { %16 = sbr.rel (!%p14_p11) target bundleno = 3 (0x3), region = 94 }

</bundles_post_ra>
